<compile_context>
chip_gen: v7x
topology: tpu7x:2x2x1
jax: 0.10.0
libtpu: 0.0.40
codegen_flags: <defaults>
</compile_context>

<pallas_src>
import functools

import jax
import jax.numpy as jnp
import numpy as np
from jax.experimental import pallas as pl
from jax.experimental.pallas import tpu as pltpu

NEG_INF = float("-inf")  # plain Python float: never a captured jax.Array const


def _chain_kernels(k_sizes):
    """SPP pool sizes -> chained (SPPF-style) pool sizes.

    For stride-1 'same' max pooling with -inf padding the radii add:
    pool(r1+r2) == pool(r2) o pool(r1), so e.g. (5, 9, 13) -> (5, 5, 5).
    """
    chain = []
    prev_r = 0
    for k in k_sizes:
        assert k % 2 == 1, "SPP pool sizes must be odd"
        r = k // 2
        dr = r - prev_r
        assert dr > 0, "SPP pool sizes must be strictly increasing"
        chain.append(2 * dr + 1)
        prev_r = r
    return tuple(chain)


def _spp_kernel(x_ref, w1_ref, b1_ref, w2_ref, b2_ref, o_ref, pad_ref,
                *, H, W, PH, PW, chain_ks, slope):
    """One batch element per grid step.

    x_ref:   (1, H*W, C1)         input image, flattened NHWC
    w1_ref:  (C1, C_)             cv1 weight (BN folded), b1_ref: (1, C_)
    w2_ref:  (len(k)+1, C_, C2)   cv2 weight (BN folded, pre-split per branch)
    b2_ref:  (1, C2)
    o_ref:   (1, H*W, C2)
    pad_ref: (H+2*PH, W+2*PW, C_) -inf padded pooling scratch (VMEM)
    """
    HW = H * W
    C_ = w1_ref.shape[1]

    # ---- cv1: 1x1 conv (BN folded in) + LeakyReLU(0.1) ----
    x = x_ref[0]                                             # (HW, C1)
    y = jnp.dot(x, w1_ref[...], preferred_element_type=jnp.float32)
    y = y + b1_ref[...]
    y = jnp.where(y > 0, y, slope * y)                       # (HW, C_)

    # ---- padded pooling scratch: fill with -inf once; only the interior is
    #      overwritten below, so the border stays -inf for every pool. ----
    pad_ref[...] = jnp.full(pad_ref.shape, NEG_INF, dtype=pad_ref.dtype)

    def pool_same(img, k):
        """MaxPool2d(k, stride=1, padding=k//2) on an (H, W, C_) image."""
        r = k // 2
        # rows (H direction): shifted static slices out of the padded scratch
        pad_ref[PH:PH + H, PW:PW + W, :] = img
        acc = img
        for dy in range(-r, r + 1):
            if dy == 0:
                continue
            acc = jnp.maximum(acc, pad_ref[PH + dy:PH + dy + H, PW:PW + W, :])
        # cols (W direction): the -inf W-pad makes boundary masks unnecessary
        pad_ref[PH:PH + H, PW:PW + W, :] = acc
        out = acc
        for dx in range(-r, r + 1):
            if dx == 0:
                continue
            out = jnp.maximum(out, pad_ref[PH:PH + H, PW + dx:PW + dx + W, :])
        return out

    # ---- cv2 accumulated branch-by-branch with SPPF-chained pooling:
    #      concat([y, p5, p9, p13]) @ W2 == sum_i branch_i @ W2_i
    #      with p9 = pool5(p5), p13 = pool5(p9).  One live branch at a time. ----
    z = jnp.dot(y, w2_ref[0], preferred_element_type=jnp.float32)
    cur = y.reshape(H, W, C_)
    for i, kc in enumerate(chain_ks):
        cur = pool_same(cur, kc)
        z = z + jnp.dot(cur.reshape(HW, C_), w2_ref[i + 1],
                        preferred_element_type=jnp.float32)
    z = z + b2_ref[...]
    z = jnp.where(z > 0, z, slope * z)
    o_ref[0] = z.astype(o_ref.dtype)


def spp_pallas(x_nchw, w1f, b1f, w2f, b2f, k_sizes=(5, 9, 13)):
    N, C1, H, W = x_nchw.shape
    HW = H * W
    C_ = w1f.shape[1]
    C2 = w2f.shape[1]
    nb = len(k_sizes) + 1
    assert w2f.shape[0] == nb * C_

    chain_ks = _chain_kernels(k_sizes)
    max_r = max(k // 2 for k in chain_ks)
    pad = max(8, ((max_r + 7) // 8) * 8)   # 8-aligned so the interior start is aligned
    PH = PW = pad

    # NCHW -> (N, H*W, C): channels on the lane axis, space on sublanes.
    # TODO(synk): keep activations NHWC across the network to drop these two
    # wrapper-level full-tensor relayouts (and consider lane-packing for
    # tiny-channel configs); for real SPP widths (C >= 256) this layout is
    # already lane-dense.
    x_flat = jnp.transpose(x_nchw, (0, 2, 3, 1)).reshape(N, HW, C1)
    w2_split = w2f.reshape(nb, C_, C2)

    kernel = functools.partial(_spp_kernel, H=H, W=W, PH=PH, PW=PW,
                               chain_ks=chain_ks, slope=0.1)

    out_flat = pl.pallas_call(
        kernel,
        out_shape=jax.ShapeDtypeStruct((N, HW, C2), x_nchw.dtype),
        grid_spec=pltpu.PrefetchScalarGridSpec(
            num_scalar_prefetch=0,
            grid=(N,),
            in_specs=[
                pl.BlockSpec((1, HW, C1), lambda n: (n, 0, 0)),
                pl.BlockSpec((C1, C_), lambda n: (0, 0)),
                pl.BlockSpec((1, C_), lambda n: (0, 0)),
                pl.BlockSpec((nb, C_, C2), lambda n: (0, 0, 0)),
                pl.BlockSpec((1, C2), lambda n: (0, 0)),
            ],
            out_specs=pl.BlockSpec((1, HW, C2), lambda n: (n, 0, 0)),
            scratch_shapes=[
                pltpu.VMEM((H + 2 * PH, W + 2 * PW, C_), jnp.float32),
            ],
        ),
        compiler_params=pltpu.CompilerParams(
            dimension_semantics=("parallel",),          # grid=(N,) across TCs
            vmem_limit_bytes=48 * 1024 * 1024,          # explicit budget, fits v7x
        ),
    )(x_flat, w1f, b1f, w2_split, b2f)

    return jnp.transpose(out_flat.reshape(N, H, W, C2), (0, 3, 1, 2))


def fuse_conv_bn(key, cin, cout, eps=1e-5):
    """Deterministic 1x1-conv + BatchNorm2d params, BN folded (eval mode)."""
    kw, kg, kb, km, kv = jax.random.split(key, 5)
    w = jax.random.normal(kw, (cout, cin), jnp.float32) * 0.1   # Conv2d weight (k=1)
    gamma = 1.0 + 0.1 * jax.random.normal(kg, (cout,), jnp.float32)
    beta = 0.1 * jax.random.normal(kb, (cout,), jnp.float32)
    mean = 0.1 * jax.random.normal(km, (cout,), jnp.float32)
    var = jnp.abs(jax.random.normal(kv, (cout,), jnp.float32)) + 0.5
    scale = gamma / jnp.sqrt(var + eps)
    w_fused = (w * scale[:, None]).T                            # (cin, cout)
    b_fused = (beta - mean * scale)[None, :]                    # (1, cout)
    return w_fused, b_fused


def ref_spp(x_nchw, w1f, b1f, w2f, b2f, k_sizes=(5, 9, 13)):
    """Pure-JAX reference (NHWC), matching PyTorch SPP with folded BN."""
    x = jnp.transpose(x_nchw, (0, 2, 3, 1))
    y = jnp.matmul(x, w1f) + b1f
    y = jnp.where(y > 0, y, 0.1 * y)

    def mp(img, k):
        p = k // 2
        return jax.lax.reduce_window(
            img, jnp.float32(-jnp.inf), jax.lax.max,
            (1, k, k, 1), (1, 1, 1, 1),
            [(0, 0), (p, p), (p, p), (0, 0)])

    cat = jnp.concatenate([y] + [mp(y, k) for k in k_sizes], axis=-1)
    z = jnp.matmul(cat, w2f) + b2f
    z = jnp.where(z > 0, z, 0.1 * z)
    return jnp.transpose(z, (0, 3, 1, 2))


if __name__ == "__main__":
    # SPP(c1=4, c2=8), width_multiple=1.0  =>  c_ = 2, cv2 in-channels = 8
    N, C1, H, W = 2, 4, 16, 16
    C2 = 8
    C_ = C1 // 2
    k_sizes = (5, 9, 13)

    key = jax.random.PRNGKey(0)
    kx, k1, k2 = jax.random.split(key, 3)
    x = jax.random.normal(kx, (N, C1, H, W), jnp.float32)
    w1f, b1f = fuse_conv_bn(k1, C1, C_)
    w2f, b2f = fuse_conv_bn(k2, C_ * (len(k_sizes) + 1), C2)

    out = spp_pallas(x, w1f, b1f, w2f, b2f, k_sizes)
    out = jax.block_until_ready(out)

    ref = ref_spp(x, w1f, b1f, w2f, b2f, k_sizes)
    # Tolerance loosened since both sides now run default (non-HIGHEST) matmul
    # precision on the MXU.
    np.testing.assert_allclose(np.asarray(out), np.asarray(ref),
                               rtol=2e-2, atol=2e-2)
    print("KERNEL_OK")
</pallas_src>

<mosaic_0001>
module attributes {stable_mosaic.version = 11 : i64} {
  func.func @_spp_kernel(%arg0: i32, %arg1: memref<1x256x4xf32, #tpu.memory_space<vmem>>, %arg2: memref<4x2xf32, #tpu.memory_space<vmem>>, %arg3: memref<1x2xf32, #tpu.memory_space<vmem>>, %arg4: memref<4x2x8xf32, #tpu.memory_space<vmem>>, %arg5: memref<1x8xf32, #tpu.memory_space<vmem>>, %arg6: memref<1x256x8xf32, #tpu.memory_space<vmem>>, %arg7: memref<32x32x2xf32, #tpu.memory_space<vmem>>) attributes {dimension_semantics = [#tpu.dimension_semantics<parallel>], iteration_bounds = array<i64: 2>, scalar_prefetch = 0 : i64, scratch_operands = 1 : i64, tpu.core_type = #tpu.core_type<tc>, window_params = [{transform_indices = @transform_0, window_bounds = array<i64: 1, 256, 4>}, {pipeline_mode = #tpu.pipeline_mode<synchronous>, transform_indices = @transform_1, window_bounds = array<i64: 4, 2>}, {pipeline_mode = #tpu.pipeline_mode<synchronous>, transform_indices = @transform_2, window_bounds = array<i64: 1, 2>}, {pipeline_mode = #tpu.pipeline_mode<synchronous>, transform_indices = @transform_3, window_bounds = array<i64: 4, 2, 8>}, {pipeline_mode = #tpu.pipeline_mode<synchronous>, transform_indices = @transform_4, window_bounds = array<i64: 1, 8>}, {transform_indices = @transform_5, window_bounds = array<i64: 1, 256, 8>}]} {
    %c0 = arith.constant 0 : index
    %c0_0 = arith.constant 0 : index
    %c0_1 = arith.constant 0 : index
    %0 = vector.load %arg1[%c0, %c0_0, %c0_1] : memref<1x256x4xf32, #tpu.memory_space<vmem>>, vector<1x256x4xf32>
    %1 = vector.shape_cast %0 : vector<1x256x4xf32> to vector<256x4xf32>
    %c0_2 = arith.constant 0 : index
    %c0_3 = arith.constant 0 : index
    %2 = vector.load %arg2[%c0_2, %c0_3] : memref<4x2xf32, #tpu.memory_space<vmem>>, vector<4x2xf32>
    %cst = arith.constant dense<0.000000e+00> : vector<256x2xf32>
    %3 = tpu.matmul %1, %2, %cst {dimension_numbers = #tpu.dot_dimension_numbers<[1], [0], [0], [1], [0, 0, 1, 1], [], []>} : vector<256x4xf32>, vector<4x2xf32>, vector<256x2xf32> -> vector<256x2xf32>
    %c0_4 = arith.constant 0 : index
    %c0_5 = arith.constant 0 : index
    %4 = vector.load %arg3[%c0_4, %c0_5] : memref<1x2xf32, #tpu.memory_space<vmem>>, vector<1x2xf32>
    %5 = vector.broadcast %4 : vector<1x2xf32> to vector<256x2xf32>
    %6 = arith.addf %3, %5 : vector<256x2xf32>
    %cst_6 = arith.constant 0.000000e+00 : f32
    %7 = vector.broadcast %cst_6 : f32 to vector<256x2xf32>
    %8 = arith.cmpf ogt, %6, %7 : vector<256x2xf32>
    %cst_7 = arith.constant 1.000000e-01 : f32
    %9 = vector.broadcast %cst_7 : f32 to vector<256x2xf32>
    %10 = arith.mulf %9, %6 : vector<256x2xf32>
    %11 = arith.select %8, %6, %10 : vector<256x2xi1>, vector<256x2xf32>
    %cst_8 = arith.constant 0xFF800000 : f32
    %12 = vector.broadcast %cst_8 : f32 to vector<32x32x2xf32>
    %c0_9 = arith.constant 0 : index
    %c0_10 = arith.constant 0 : index
    %c0_11 = arith.constant 0 : index
    %13 = vector.load %arg7[%c0_9, %c0_10, %c0_11] : memref<32x32x2xf32, #tpu.memory_space<vmem>>, vector<32x32x2xf32>
    tpu.vector_store %arg7[%c0_9, %c0_10, %c0_11], %12 {strides = array<i32>} : memref<32x32x2xf32, #tpu.memory_space<vmem>>, vector<32x32x2xf32>,
    %c0_12 = arith.constant 0 : index
    %c0_13 = arith.constant 0 : index
    %c0_14 = arith.constant 0 : index
    %14 = vector.load %arg4[%c0_12, %c0_13, %c0_14] : memref<4x2x8xf32, #tpu.memory_space<vmem>>, vector<1x2x8xf32>
    %15 = vector.shape_cast %14 : vector<1x2x8xf32> to vector<2x8xf32>
    %cst_15 = arith.constant dense<0.000000e+00> : vector<256x8xf32>
    %16 = tpu.matmul %11, %15, %cst_15 {dimension_numbers = #tpu.dot_dimension_numbers<[1], [0], [0], [1], [0, 0, 1, 1], [], []>} : vector<256x2xf32>, vector<2x8xf32>, vector<256x8xf32> -> vector<256x8xf32>
    %17 = vector.shape_cast %11 : vector<256x2xf32> to vector<16x16x2xf32>
    %c8 = arith.constant 8 : index
    %c8_16 = arith.constant 8 : index
    %c0_17 = arith.constant 0 : index
    %18 = vector.load %arg7[%c8, %c8_16, %c0_17] : memref<32x32x2xf32, #tpu.memory_space<vmem>>, vector<16x16x2xf32>
    tpu.vector_store %arg7[%c8, %c8_16, %c0_17], %17 {strides = array<i32>} : memref<32x32x2xf32, #tpu.memory_space<vmem>>, vector<16x16x2xf32>,
    %c6 = arith.constant 6 : index
    %c8_18 = arith.constant 8 : index
    %c0_19 = arith.constant 0 : index
    %19 = vector.load %arg7[%c6, %c8_18, %c0_19] : memref<32x32x2xf32, #tpu.memory_space<vmem>>, vector<16x16x2xf32>
    %20 = arith.maximumf %17, %19 : vector<16x16x2xf32>
    %c7 = arith.constant 7 : index
    %c8_20 = arith.constant 8 : index
    %c0_21 = arith.constant 0 : index
    %21 = vector.load %arg7[%c7, %c8_20, %c0_21] : memref<32x32x2xf32, #tpu.memory_space<vmem>>, vector<16x16x2xf32>
    %22 = arith.maximumf %20, %21 : vector<16x16x2xf32>
    %c9 = arith.constant 9 : index
    %c8_22 = arith.constant 8 : index
    %c0_23 = arith.constant 0 : index
    %23 = vector.load %arg7[%c9, %c8_22, %c0_23] : memref<32x32x2xf32, #tpu.memory_space<vmem>>, vector<16x16x2xf32>
    %24 = arith.maximumf %22, %23 : vector<16x16x2xf32>
    %c10 = arith.constant 10 : index
    %c8_24 = arith.constant 8 : index
    %c0_25 = arith.constant 0 : index
    %25 = vector.load %arg7[%c10, %c8_24, %c0_25] : memref<32x32x2xf32, #tpu.memory_space<vmem>>, vector<16x16x2xf32>
    %26 = arith.maximumf %24, %25 : vector<16x16x2xf32>
    %c8_26 = arith.constant 8 : index
    %c8_27 = arith.constant 8 : index
    %c0_28 = arith.constant 0 : index
    %27 = vector.load %arg7[%c8_26, %c8_27, %c0_28] : memref<32x32x2xf32, #tpu.memory_space<vmem>>, vector<16x16x2xf32>
    tpu.vector_store %arg7[%c8_26, %c8_27, %c0_28], %26 {strides = array<i32>} : memref<32x32x2xf32, #tpu.memory_space<vmem>>, vector<16x16x2xf32>,
    %c8_29 = arith.constant 8 : index
    %c6_30 = arith.constant 6 : index
    %c0_31 = arith.constant 0 : index
    %28 = vector.load %arg7[%c8_29, %c6_30, %c0_31] : memref<32x32x2xf32, #tpu.memory_space<vmem>>, vector<16x16x2xf32>
    %29 = arith.maximumf %26, %28 : vector<16x16x2xf32>
    %c8_32 = arith.constant 8 : index
    %c7_33 = arith.constant 7 : index
    %c0_34 = arith.constant 0 : index
    %30 = vector.load %arg7[%c8_32, %c7_33, %c0_34] : memref<32x32x2xf32, #tpu.memory_space<vmem>>, vector<16x16x2xf32>
    %31 = arith.maximumf %29, %30 : vector<16x16x2xf32>
    %c8_35 = arith.constant 8 : index
    %c9_36 = arith.constant 9 : index
    %c0_37 = arith.constant 0 : index
    %32 = vector.load %arg7[%c8_35, %c9_36, %c0_37] : memref<32x32x2xf32, #tpu.memory_space<vmem>>, vector<16x16x2xf32>
    %33 = arith.maximumf %31, %32 : vector<16x16x2xf32>
    %c8_38 = arith.constant 8 : index
    %c10_39 = arith.constant 10 : index
    %c0_40 = arith.constant 0 : index
    %34 = vector.load %arg7[%c8_38, %c10_39, %c0_40] : memref<32x32x2xf32, #tpu.memory_space<vmem>>, vector<16x16x2xf32>
    %35 = arith.maximumf %33, %34 : vector<16x16x2xf32>
    %36 = vector.shape_cast %35 : vector<16x16x2xf32> to vector<256x2xf32>
    %c1 = arith.constant 1 : index
    %c0_41 = arith.constant 0 : index
    %c0_42 = arith.constant 0 : index
    %37 = vector.load %arg4[%c1, %c0_41, %c0_42] : memref<4x2x8xf32, #tpu.memory_space<vmem>>, vector<1x2x8xf32>
    %38 = vector.shape_cast %37 : vector<1x2x8xf32> to vector<2x8xf32>
    %cst_43 = arith.constant dense<0.000000e+00> : vector<256x8xf32>
    %39 = tpu.matmul %36, %38, %cst_43 {dimension_numbers = #tpu.dot_dimension_numbers<[1], [0], [0], [1], [0, 0, 1, 1], [], []>} : vector<256x2xf32>, vector<2x8xf32>, vector<256x8xf32> -> vector<256x8xf32>
    %40 = arith.addf %16, %39 : vector<256x8xf32>
    %c8_44 = arith.constant 8 : index
    %c8_45 = arith.constant 8 : index
    %c0_46 = arith.constant 0 : index
    %41 = vector.load %arg7[%c8_44, %c8_45, %c0_46] : memref<32x32x2xf32, #tpu.memory_space<vmem>>, vector<16x16x2xf32>
    tpu.vector_store %arg7[%c8_44, %c8_45, %c0_46], %35 {strides = array<i32>} : memref<32x32x2xf32, #tpu.memory_space<vmem>>, vector<16x16x2xf32>,
    %c6_47 = arith.constant 6 : index
    %c8_48 = arith.constant 8 : index
    %c0_49 = arith.constant 0 : index
    %42 = vector.load %arg7[%c6_47, %c8_48, %c0_49] : memref<32x32x2xf32, #tpu.memory_space<vmem>>, vector<16x16x2xf32>
    %43 = arith.maximumf %35, %42 : vector<16x16x2xf32>
    %c7_50 = arith.constant 7 : index
    %c8_51 = arith.constant 8 : index
    %c0_52 = arith.constant 0 : index
    %44 = vector.load %arg7[%c7_50, %c8_51, %c0_52] : memref<32x32x2xf32, #tpu.memory_space<vmem>>, vector<16x16x2xf32>
    %45 = arith.maximumf %43, %44 : vector<16x16x2xf32>
    %c9_53 = arith.constant 9 : index
    %c8_54 = arith.constant 8 : index
    %c0_55 = arith.constant 0 : index
    %46 = vector.load %arg7[%c9_53, %c8_54, %c0_55] : memref<32x32x2xf32, #tpu.memory_space<vmem>>, vector<16x16x2xf32>
    %47 = arith.maximumf %45, %46 : vector<16x16x2xf32>
    %c10_56 = arith.constant 10 : index
    %c8_57 = arith.constant 8 : index
    %c0_58 = arith.constant 0 : index
    %48 = vector.load %arg7[%c10_56, %c8_57, %c0_58] : memref<32x32x2xf32, #tpu.memory_space<vmem>>, vector<16x16x2xf32>
    %49 = arith.maximumf %47, %48 : vector<16x16x2xf32>
    %c8_59 = arith.constant 8 : index
    %c8_60 = arith.constant 8 : index
    %c0_61 = arith.constant 0 : index
    %50 = vector.load %arg7[%c8_59, %c8_60, %c0_61] : memref<32x32x2xf32, #tpu.memory_space<vmem>>, vector<16x16x2xf32>
    tpu.vector_store %arg7[%c8_59, %c8_60, %c0_61], %49 {strides = array<i32>} : memref<32x32x2xf32, #tpu.memory_space<vmem>>, vector<16x16x2xf32>,
    %c8_62 = arith.constant 8 : index
    %c6_63 = arith.constant 6 : index
    %c0_64 = arith.constant 0 : index
    %51 = vector.load %arg7[%c8_62, %c6_63, %c0_64] : memref<32x32x2xf32, #tpu.memory_space<vmem>>, vector<16x16x2xf32>
    %52 = arith.maximumf %49, %51 : vector<16x16x2xf32>
    %c8_65 = arith.constant 8 : index
    %c7_66 = arith.constant 7 : index
    %c0_67 = arith.constant 0 : index
    %53 = vector.load %arg7[%c8_65, %c7_66, %c0_67] : memref<32x32x2xf32, #tpu.memory_space<vmem>>, vector<16x16x2xf32>
    %54 = arith.maximumf %52, %53 : vector<16x16x2xf32>
    %c8_68 = arith.constant 8 : index
    %c9_69 = arith.constant 9 : index
    %c0_70 = arith.constant 0 : index
    %55 = vector.load %arg7[%c8_68, %c9_69, %c0_70] : memref<32x32x2xf32, #tpu.memory_space<vmem>>, vector<16x16x2xf32>
    %56 = arith.maximumf %54, %55 : vector<16x16x2xf32>
    %c8_71 = arith.constant 8 : index
    %c10_72 = arith.constant 10 : index
    %c0_73 = arith.constant 0 : index
    %57 = vector.load %arg7[%c8_71, %c10_72, %c0_73] : memref<32x32x2xf32, #tpu.memory_space<vmem>>, vector<16x16x2xf32>
    %58 = arith.maximumf %56, %57 : vector<16x16x2xf32>
    %59 = vector.shape_cast %58 : vector<16x16x2xf32> to vector<256x2xf32>
    %c2 = arith.constant 2 : index
    %c0_74 = arith.constant 0 : index
    %c0_75 = arith.constant 0 : index
    %60 = vector.load %arg4[%c2, %c0_74, %c0_75] : memref<4x2x8xf32, #tpu.memory_space<vmem>>, vector<1x2x8xf32>
    %61 = vector.shape_cast %60 : vector<1x2x8xf32> to vector<2x8xf32>
    %cst_76 = arith.constant dense<0.000000e+00> : vector<256x8xf32>
    %62 = tpu.matmul %59, %61, %cst_76 {dimension_numbers = #tpu.dot_dimension_numbers<[1], [0], [0], [1], [0, 0, 1, 1], [], []>} : vector<256x2xf32>, vector<2x8xf32>, vector<256x8xf32> -> vector<256x8xf32>
    %63 = arith.addf %40, %62 : vector<256x8xf32>
    %c8_77 = arith.constant 8 : index
    %c8_78 = arith.constant 8 : index
    %c0_79 = arith.constant 0 : index
    %64 = vector.load %arg7[%c8_77, %c8_78, %c0_79] : memref<32x32x2xf32, #tpu.memory_space<vmem>>, vector<16x16x2xf32>
    tpu.vector_store %arg7[%c8_77, %c8_78, %c0_79], %58 {strides = array<i32>} : memref<32x32x2xf32, #tpu.memory_space<vmem>>, vector<16x16x2xf32>,
    %c6_80 = arith.constant 6 : index
    %c8_81 = arith.constant 8 : index
    %c0_82 = arith.constant 0 : index
    %65 = vector.load %arg7[%c6_80, %c8_81, %c0_82] : memref<32x32x2xf32, #tpu.memory_space<vmem>>, vector<16x16x2xf32>
    %66 = arith.maximumf %58, %65 : vector<16x16x2xf32>
    %c7_83 = arith.constant 7 : index
    %c8_84 = arith.constant 8 : index
    %c0_85 = arith.constant 0 : index
    %67 = vector.load %arg7[%c7_83, %c8_84, %c0_85] : memref<32x32x2xf32, #tpu.memory_space<vmem>>, vector<16x16x2xf32>
    %68 = arith.maximumf %66, %67 : vector<16x16x2xf32>
    %c9_86 = arith.constant 9 : index
    %c8_87 = arith.constant 8 : index
    %c0_88 = arith.constant 0 : index
    %69 = vector.load %arg7[%c9_86, %c8_87, %c0_88] : memref<32x32x2xf32, #tpu.memory_space<vmem>>, vector<16x16x2xf32>
    %70 = arith.maximumf %68, %69 : vector<16x16x2xf32>
    %c10_89 = arith.constant 10 : index
    %c8_90 = arith.constant 8 : index
    %c0_91 = arith.constant 0 : index
    %71 = vector.load %arg7[%c10_89, %c8_90, %c0_91] : memref<32x32x2xf32, #tpu.memory_space<vmem>>, vector<16x16x2xf32>
    %72 = arith.maximumf %70, %71 : vector<16x16x2xf32>
    %c8_92 = arith.constant 8 : index
    %c8_93 = arith.constant 8 : index
    %c0_94 = arith.constant 0 : index
    %73 = vector.load %arg7[%c8_92, %c8_93, %c0_94] : memref<32x32x2xf32, #tpu.memory_space<vmem>>, vector<16x16x2xf32>
    tpu.vector_store %arg7[%c8_92, %c8_93, %c0_94], %72 {strides = array<i32>} : memref<32x32x2xf32, #tpu.memory_space<vmem>>, vector<16x16x2xf32>,
    %c8_95 = arith.constant 8 : index
    %c6_96 = arith.constant 6 : index
    %c0_97 = arith.constant 0 : index
    %74 = vector.load %arg7[%c8_95, %c6_96, %c0_97] : memref<32x32x2xf32, #tpu.memory_space<vmem>>, vector<16x16x2xf32>
    %75 = arith.maximumf %72, %74 : vector<16x16x2xf32>
    %c8_98 = arith.constant 8 : index
    %c7_99 = arith.constant 7 : index
    %c0_100 = arith.constant 0 : index
    %76 = vector.load %arg7[%c8_98, %c7_99, %c0_100] : memref<32x32x2xf32, #tpu.memory_space<vmem>>, vector<16x16x2xf32>
    %77 = arith.maximumf %75, %76 : vector<16x16x2xf32>
    %c8_101 = arith.constant 8 : index
    %c9_102 = arith.constant 9 : index
    %c0_103 = arith.constant 0 : index
    %78 = vector.load %arg7[%c8_101, %c9_102, %c0_103] : memref<32x32x2xf32, #tpu.memory_space<vmem>>, vector<16x16x2xf32>
    %79 = arith.maximumf %77, %78 : vector<16x16x2xf32>
    %c8_104 = arith.constant 8 : index
    %c10_105 = arith.constant 10 : index
    %c0_106 = arith.constant 0 : index
    %80 = vector.load %arg7[%c8_104, %c10_105, %c0_106] : memref<32x32x2xf32, #tpu.memory_space<vmem>>, vector<16x16x2xf32>
    %81 = arith.maximumf %79, %80 : vector<16x16x2xf32>
    %82 = vector.shape_cast %81 : vector<16x16x2xf32> to vector<256x2xf32>
    %c3 = arith.constant 3 : index
    %c0_107 = arith.constant 0 : index
    %c0_108 = arith.constant 0 : index
    %83 = vector.load %arg4[%c3, %c0_107, %c0_108] : memref<4x2x8xf32, #tpu.memory_space<vmem>>, vector<1x2x8xf32>
    %84 = vector.shape_cast %83 : vector<1x2x8xf32> to vector<2x8xf32>
    %cst_109 = arith.constant dense<0.000000e+00> : vector<256x8xf32>
    %85 = tpu.matmul %82, %84, %cst_109 {dimension_numbers = #tpu.dot_dimension_numbers<[1], [0], [0], [1], [0, 0, 1, 1], [], []>} : vector<256x2xf32>, vector<2x8xf32>, vector<256x8xf32> -> vector<256x8xf32>
    %86 = arith.addf %63, %85 : vector<256x8xf32>
    %c0_110 = arith.constant 0 : index
    %c0_111 = arith.constant 0 : index
    %87 = vector.load %arg5[%c0_110, %c0_111] : memref<1x8xf32, #tpu.memory_space<vmem>>, vector<1x8xf32>
    %88 = vector.broadcast %87 : vector<1x8xf32> to vector<256x8xf32>
    %89 = arith.addf %86, %88 : vector<256x8xf32>
    %cst_112 = arith.constant 0.000000e+00 : f32
    %90 = vector.broadcast %cst_112 : f32 to vector<256x8xf32>
    %91 = arith.cmpf ogt, %89, %90 : vector<256x8xf32>
    %cst_113 = arith.constant 1.000000e-01 : f32
    %92 = vector.broadcast %cst_113 : f32 to vector<256x8xf32>
    %93 = arith.mulf %92, %89 : vector<256x8xf32>
    %94 = arith.select %91, %89, %93 : vector<256x8xi1>, vector<256x8xf32>
    %c0_114 = arith.constant 0 : index
    %c0_115 = arith.constant 0 : index
    %c0_116 = arith.constant 0 : index
    %95 = vector.load %arg6[%c0_114, %c0_115, %c0_116] : memref<1x256x8xf32, #tpu.memory_space<vmem>>, vector<1x256x8xf32>
    %96 = vector.shape_cast %95 : vector<1x256x8xf32> to vector<256x8xf32>
    %97 = vector.shape_cast %94 : vector<256x8xf32> to vector<1x256x8xf32>
    tpu.vector_store %arg6[%c0_114, %c0_115, %c0_116], %97 {strides = array<i32>} : memref<1x256x8xf32, #tpu.memory_space<vmem>>, vector<1x256x8xf32>,
    return
  }
  func.func @transform_0(%arg0: i32) -> (i32, i32, i32) {
    %c0_i32 = arith.constant 0 : i32
    %c0_i32_0 = arith.constant 0 : i32
    %c0_i32_1 = arith.constant 0 : i32
    return %arg0, %c0_i32, %c0_i32_0 : i32, i32, i32
  }
  func.func @transform_1(%arg0: i32) -> (i32, i32) {
    %c0_i32 = arith.constant 0 : i32
    %c0_i32_0 = arith.constant 0 : i32
    %c0_i32_1 = arith.constant 0 : i32
    return %c0_i32, %c0_i32_0 : i32, i32
  }
  func.func @transform_2(%arg0: i32) -> (i32, i32) {
    %c0_i32 = arith.constant 0 : i32
    %c0_i32_0 = arith.constant 0 : i32
    %c0_i32_1 = arith.constant 0 : i32
    return %c0_i32, %c0_i32_0 : i32, i32
  }
  func.func @transform_3(%arg0: i32) -> (i32, i32, i32) {
    %c0_i32 = arith.constant 0 : i32
    %c0_i32_0 = arith.constant 0 : i32
    %c0_i32_1 = arith.constant 0 : i32
    %c0_i32_2 = arith.constant 0 : i32
    return %c0_i32, %c0_i32_0, %c0_i32_1 : i32, i32, i32
  }
  func.func @transform_4(%arg0: i32) -> (i32, i32) {
    %c0_i32 = arith.constant 0 : i32
    %c0_i32_0 = arith.constant 0 : i32
    %c0_i32_1 = arith.constant 0 : i32
    return %c0_i32, %c0_i32_0 : i32, i32
  }
  func.func @transform_5(%arg0: i32) -> (i32, i32, i32) {
    %c0_i32 = arith.constant 0 : i32
    %c0_i32_0 = arith.constant 0 : i32
    %c0_i32_1 = arith.constant 0 : i32
    return %arg0, %c0_i32, %c0_i32_0 : i32, i32, i32
  }
}

</mosaic_0001>

<bundles_post_ra>
// kernel: tpu_custom_call.1
= control target key start
LH: loop header
LB: loop body
LE: loop exit
PB: predicated region body
PF: predicated region fallthrough
CT: control target
= control target key end

     0   :  { %s4886_s18 = smov 0   ;;  %s7292_s0 = inlined_call_operand.vmem [shape: f32[2,256,4], index: 0, kind: input, shape index: {}]   ;;  %s7293_s1 = inlined_call_operand.vmem [shape: f32[4,2], index: 1, kind: input, shape index: {}]   ;;  %s7294_s2 = inlined_call_operand.vmem [shape: f32[1,2], index: 2, kind: input, shape index: {}]   ;;  %s7295_s3 = inlined_call_operand.vmem [shape: f32[4,2,8], index: 3, kind: input, shape index: {}]   ;;  %s7296_s4 = inlined_call_operand.vmem [shape: f32[1,8], index: 4, kind: input, shape index: {}]   ;;  %s7297_s5 = inlined_call_operand.vmem [shape: f32[2,256,8], index: 5, kind: output, shape index: {}]  }
   0x1 LB: > { %s4140_s19 = sadd.s32 4294967295, %s4853_s18   ;;  %p4144_p0 = scmp.ge.s32.totalorder %s4853_s18, 1  ;;  %s4853_s18 = sphi %s4886_s18, %s15_s18  }
   0x2   : > { %p187_p1 = scmp.lt.s32.totalorder %s4853_s18, 3 }
   0x4   : > { %p188_p2 = pnand %p4144_p0, %p187_p1 }
   0x6   : > { %191 = sbr.rel (%p188_p2) target bundleno = 779 (0x30b), region = 40 }
   0xd   : > { %v257_v0 = vld [vmem:[%s7293_s1] sm:$0xf]  ;;  %vm362_vm0 = vcmask 1043456   ;;  %p215_p3 = scmp.lt.s32.totalorder %s4140_s19, 1  ;;  %vm265_vm1 = vcmask 31744   ;;  %vm687_vm2 = vcmask 15360  }
   0xe   : > { %4488 = vmatprep.subr.msk.mxu0 %vm362_vm0, %v257_v0  ;;  %v4855_v33 = vmov -inf   ;;  %v5118_v34 = vld [vmem:[%s7295_s3] sm:$0x3]  ;;  %vm1496_vm3 = vcmask 1041408   ;;  %v4183_v35 = vld [vmem:[%s7295_s3 + $0x2] sm:$0x3] }
   0xf   : > { %4489 = vmatpush3.msk.msra.mxu0 %vm362_vm0, %v257_v0  ;;  %s7356_s19 = smov (!%p215_p3, %s4140_s19), 1  ;;  %714 = vst.msk [vmem:[#allocation2 + $0xd0] sm:$0xff] %vm687_vm2, %v4855_v33  ;;  %718 = vst.msk [vmem:[#allocation2 + $0xf0] sm:$0xff] %vm687_vm2, %v4855_v33  ;;  %4738 = vmatprep.subr.msk.mxu1 %vm1496_vm3, %v5118_v34  ;;  %v5134_v36 = vld [vmem:[%s7295_s3 + $0x4] sm:$0x3] }
  0x10   : > { %s4321_s22 = sshll.u32 %s7356_s19, 8  ;;  %722 = vst.msk [vmem:[#allocation2 + $0x110] sm:$0xff] %vm687_vm2, %v4855_v33  ;;  %713 = vst.msk [vmem:[#allocation2 + $0xc8] sm:$0xff] %vm687_vm2, %v4855_v33  ;;  %4739 = vmatpush3.msk.msra.mxu1 %vm1496_vm3, %v5118_v34  ;;  %4538 = vmatprep.subr.msk.mxu0 %vm1496_vm3, %v4183_v35  ;;  %v5141_v37 = vld [vmem:[%s7294_s2] ss:$0 sm:$0xff] }
  0x11   : > { %s4905_s25 = scalar_lea.vmem %s7292_s0, %s4321_s22  ;;  %717 = vst.msk [vmem:[#allocation2 + $0xe8] sm:$0xff] %vm687_vm2, %v4855_v33  ;;  %720 = vst.msk [vmem:[#allocation2 + $0x100] sm:$0xff] %vm687_vm2, %v4855_v33  ;;  %4638 = vmatprep.subr.msk.mxu1 %vm1496_vm3, %v5134_v36  ;;  %s7170_s17 = scalar_lea.vmem %s7297_s5, %s4321_s22 }
  0x12   : > { %v225_v1 = vld [vmem:[%s4905_s25] sm:$0xff]  ;;  %v226_v2 = vld [vmem:[%s4905_s25 + $0x8] sm:$0xff]  ;;  %v227_v3 = vld [vmem:[%s4905_s25 + $0x10] sm:$0xff]  ;;  %721 = vst.msk [vmem:[#allocation2 + $0x108] sm:$0xff] %vm687_vm2, %v4855_v33 }
  0x13   : > { %4490 = vmatprep.mubr.msk.f32.mxu0 %vm265_vm1, %v225_v1  ;;  %v228_v4 = vld [vmem:[%s4905_s25 + $0x18] sm:$0xff]  ;;  %v229_v5 = vld [vmem:[%s4905_s25 + $0x20] sm:$0xff]  ;;  %v230_v6 = vld [vmem:[%s4905_s25 + $0x28] sm:$0xff]  ;;  %723 = vst.msk [vmem:[#allocation2 + $0x118] sm:$0xff] %vm687_vm2, %v4855_v33 }
  0x14   : > { %4491 = vmatmul.mubr.msk.f32.vlgmr.msra.gmra.mrb[0].mxu0 %vm265_vm1, %v226_v2  ;;  %v231_v7 = vld [vmem:[%s4905_s25 + $0x30] sm:$0xff]  ;;  %v232_v8 = vld [vmem:[%s4905_s25 + $0x38] sm:$0xff]  ;;  %v233_v9 = vld [vmem:[%s4905_s25 + $0x40] sm:$0xff]  ;;  %724 = vst.msk [vmem:[#allocation2 + $0x120] sm:$0xff] %vm687_vm2, %v4855_v33 }
  0x15   : > { %4493 = vmatprep.mubr.msk.f32.mxu0 %vm265_vm1, %v227_v3  ;;  %v234_v10 = vld [vmem:[%s4905_s25 + $0x48] sm:$0xff]  ;;  %v235_v11 = vld [vmem:[%s4905_s25 + $0x50] sm:$0xff]  ;;  %v236_v12 = vld [vmem:[%s4905_s25 + $0x58] sm:$0xff]  ;;  %725 = vst.msk [vmem:[#allocation2 + $0x128] sm:$0xff] %vm687_vm2, %v4855_v33  ;;  %4539 = vmatpush3.msk.msra.mxu0 %vm1496_vm3, %v4183_v35 }
  0x16   : > { %v237_v13 = vld [vmem:[%s4905_s25 + $0x60] sm:$0xff]  ;;  %v238_v14 = vld [vmem:[%s4905_s25 + $0x68] sm:$0xff]  ;;  %v239_v15 = vld [vmem:[%s4905_s25 + $0x70] sm:$0xff]  ;;  %726 = vst.msk [vmem:[#allocation2 + $0x130] sm:$0xff] %vm687_vm2, %v4855_v33  ;;  %4588 = vmatprep.subr.msk.mxu0 %vm1496_vm3, %v5118_v34 }
  0x17   : > { %v240_v16 = vld [vmem:[%s4905_s25 + $0x78] sm:$0xff]  ;;  %v241_v17 = vld [vmem:[%s4905_s25 + $0x80] sm:$0xff]  ;;  %v242_v18 = vld [vmem:[%s4905_s25 + $0x88] sm:$0xff]  ;;  %727 = vst.msk [vmem:[#allocation2 + $0x138] sm:$0xff] %vm687_vm2, %v4855_v33 }
  0x18   : > { %4494 = vmatmul.mubr.msk.f32.gmra.mrb[2].mxu0 %vm265_vm1, %v228_v4  ;;  %v243_v19 = vld [vmem:[%s4905_s25 + $0x90] sm:$0xff]  ;;  %v244_v20 = vld [vmem:[%s4905_s25 + $0x98] sm:$0xff]  ;;  %v245_v21 = vld [vmem:[%s4905_s25 + $0xa0] sm:$0xff]  ;;  %728 = vst.msk [vmem:[#allocation2 + $0x140] sm:$0xff] %vm687_vm2, %v4855_v33 }
  0x19   : > { %4496 = vmatprep.mubr.msk.f32.mxu0 %vm265_vm1, %v229_v5  ;;  %v246_v22 = vld [vmem:[%s4905_s25 + $0xa8] sm:$0xff]  ;;  %v247_v23 = vld [vmem:[%s4905_s25 + $0xb0] sm:$0xff]  ;;  %v248_v24 = vld [vmem:[%s4905_s25 + $0xb8] sm:$0xff]  ;;  %729 = vst.msk [vmem:[#allocation2 + $0x148] sm:$0xff] %vm687_vm2, %v4855_v33 }
  0x1a   : > { %v249_v25 = vld [vmem:[%s4905_s25 + $0xc0] sm:$0xff]  ;;  %v250_v26 = vld [vmem:[%s4905_s25 + $0xc8] sm:$0xff]  ;;  %v251_v27 = vld [vmem:[%s4905_s25 + $0xd0] sm:$0xff]  ;;  %730 = vst.msk [vmem:[#allocation2 + $0x150] sm:$0xff] %vm687_vm2, %v4855_v33 }
  0x1b   : > { %v252_v28 = vld [vmem:[%s4905_s25 + $0xd8] sm:$0xff]  ;;  %v253_v29 = vld [vmem:[%s4905_s25 + $0xe0] sm:$0xff]  ;;  %v254_v30 = vld [vmem:[%s4905_s25 + $0xe8] sm:$0xff]  ;;  %731 = vst.msk [vmem:[#allocation2 + $0x158] sm:$0xff] %vm687_vm2, %v4855_v33 }
  0x1c   : > { %4497 = vmatmul.mubr.msk.f32.gmra.mrb[4].mxu0 %vm265_vm1, %v230_v6  ;;  %v255_v31 = vld [vmem:[%s4905_s25 + $0xf0] sm:$0xff]  ;;  %v256_v32 = vld [vmem:[%s4905_s25 + $0xf8] sm:$0xff]  ;;  %732 = vst.msk [vmem:[#allocation2 + $0x160] sm:$0xff] %vm687_vm2, %v4855_v33  ;;  %733 = vst.msk [vmem:[#allocation2 + $0x168] sm:$0xff] %vm687_vm2, %v4855_v33 }
  0x1d   : > { %4499 = vmatprep.mubr.msk.f32.mxu0 %vm265_vm1, %v231_v7  ;;  %734 = vst.msk [vmem:[#allocation2 + $0x170] sm:$0xff] %vm687_vm2, %v4855_v33  ;;  %735 = vst.msk [vmem:[#allocation2 + $0x178] sm:$0xff] %vm687_vm2, %v4855_v33  ;;  %v5163_v58 = vld [vmem:[#allocation2 + $0xd0] sm:$0xff]  ;;  %v5167_v60 = vld [vmem:[#allocation2 + $0xc8] sm:$0xff] }
  0x1e   : > { %736 = vst.msk [vmem:[#allocation2 + $0x180] sm:$0xff] %vm687_vm2, %v4855_v33  ;;  %737 = vst.msk [vmem:[#allocation2 + $0x188] sm:$0xff] %vm687_vm2, %v4855_v33  ;;  %v5179_v5 = vld [vmem:[#allocation2 + $0xf0] sm:$0xff] }
  0x1f   : > { %738 = vst.msk [vmem:[#allocation2 + $0x190] sm:$0xff] %vm687_vm2, %v4855_v33  ;;  %739 = vst.msk [vmem:[#allocation2 + $0x198] sm:$0xff] %vm687_vm2, %v4855_v33 }
  0x20   : > { %4500 = vmatmul.mubr.msk.f32.gmra.mrb[6].mxu0 %vm265_vm1, %v232_v8  ;;  %740 = vst.msk [vmem:[#allocation2 + $0x1a0] sm:$0xff] %vm687_vm2, %v4855_v33  ;;  %741 = vst.msk [vmem:[#allocation2 + $0x1a8] sm:$0xff] %vm687_vm2, %v4855_v33  ;;  %v5185_v8 = vld [vmem:[#allocation2 + $0xe8] sm:$0xff] }
  0x21   : > { %4502 = vmatprep.mubr.msk.f32.mxu0 %vm265_vm1, %v233_v9  ;;  %742 = vst.msk [vmem:[#allocation2 + $0x1b0] sm:$0xff] %vm687_vm2, %v4855_v33  ;;  %743 = vst.msk [vmem:[#allocation2 + $0x1b8] sm:$0xff] %vm687_vm2, %v4855_v33 }
  0x22   : > { %744 = vst.msk [vmem:[#allocation2 + $0x1c0] sm:$0xff] %vm687_vm2, %v4855_v33  ;;  %745 = vst.msk [vmem:[#allocation2 + $0x1c8] sm:$0xff] %vm687_vm2, %v4855_v33 }
  0x23   : > { %746 = vst.msk [vmem:[#allocation2 + $0x1d0] sm:$0xff] %vm687_vm2, %v4855_v33  ;;  %747 = vst.msk [vmem:[#allocation2 + $0x1d8] sm:$0xff] %vm687_vm2, %v4855_v33 }
  0x24   : > { %4503 = vmatmul.mubr.msk.f32.gmra.mrb[8].mxu0 %vm265_vm1, %v234_v10  ;;  %748 = vst.msk [vmem:[#allocation2 + $0x1e0] sm:$0xff] %vm687_vm2, %v4855_v33  ;;  %749 = vst.msk [vmem:[#allocation2 + $0x1e8] sm:$0xff] %vm687_vm2, %v4855_v33 }
  0x25   : > { %4505 = vmatprep.mubr.msk.f32.mxu0 %vm265_vm1, %v235_v11  ;;  %750 = vst.msk [vmem:[#allocation2 + $0x1f0] sm:$0xff] %vm687_vm2, %v4855_v33  ;;  %751 = vst.msk [vmem:[#allocation2 + $0x1f8] sm:$0xff] %vm687_vm2, %v4855_v33 }
  0x26   : > { %752 = vst.msk [vmem:[#allocation2 + $0x200] sm:$0xff] %vm687_vm2, %v4855_v33  ;;  %753 = vst.msk [vmem:[#allocation2 + $0x208] sm:$0xff] %vm687_vm2, %v4855_v33 }
  0x27   : > { %754 = vst.msk [vmem:[#allocation2 + $0x210] sm:$0xff] %vm687_vm2, %v4855_v33  ;;  %755 = vst.msk [vmem:[#allocation2 + $0x218] sm:$0xff] %vm687_vm2, %v4855_v33 }
  0x28   : > { %4506 = vmatmul.mubr.msk.f32.gmra.mrb[10].mxu0 %vm265_vm1, %v236_v12  ;;  %756 = vst.msk [vmem:[#allocation2 + $0x220] sm:$0xff] %vm687_vm2, %v4855_v33  ;;  %757 = vst.msk [vmem:[#allocation2 + $0x228] sm:$0xff] %vm687_vm2, %v4855_v33 }
  0x29   : > { %4508 = vmatprep.mubr.msk.f32.mxu0 %vm265_vm1, %v237_v13  ;;  %758 = vst.msk [vmem:[#allocation2 + $0x230] sm:$0xff] %vm687_vm2, %v4855_v33  ;;  %759 = vst.msk [vmem:[#allocation2 + $0x238] sm:$0xff] %vm687_vm2, %v4855_v33 }
  0x2a   : > { %760 = vst.msk [vmem:[#allocation2 + $0x240] sm:$0xff] %vm687_vm2, %v4855_v33  ;;  %761 = vst.msk [vmem:[#allocation2 + $0x248] sm:$0xff] %vm687_vm2, %v4855_v33 }
  0x2b   : > { %762 = vst.msk [vmem:[#allocation2 + $0x250] sm:$0xff] %vm687_vm2, %v4855_v33  ;;  %763 = vst.msk [vmem:[#allocation2 + $0x258] sm:$0xff] %vm687_vm2, %v4855_v33 }
  0x2c   : > { %4509 = vmatmul.mubr.msk.f32.gmra.mrb[12].mxu0 %vm265_vm1, %v238_v14  ;;  %764 = vst.msk [vmem:[#allocation2 + $0x260] sm:$0xff] %vm687_vm2, %v4855_v33  ;;  %765 = vst.msk [vmem:[#allocation2 + $0x268] sm:$0xff] %vm687_vm2, %v4855_v33 }
  0x2d   : > { %4511 = vmatprep.mubr.msk.f32.mxu0 %vm265_vm1, %v239_v15  ;;  %766 = vst.msk [vmem:[#allocation2 + $0x270] sm:$0xff] %vm687_vm2, %v4855_v33  ;;  %767 = vst.msk [vmem:[#allocation2 + $0x278] sm:$0xff] %vm687_vm2, %v4855_v33 }
  0x2e   : > { %768 = vst.msk [vmem:[#allocation2 + $0x280] sm:$0xff] %vm687_vm2, %v4855_v33  ;;  %769 = vst.msk [vmem:[#allocation2 + $0x288] sm:$0xff] %vm687_vm2, %v4855_v33 }
  0x2f   : > { %770 = vst.msk [vmem:[#allocation2 + $0x290] sm:$0xff] %vm687_vm2, %v4855_v33  ;;  %771 = vst.msk [vmem:[#allocation2 + $0x298] sm:$0xff] %vm687_vm2, %v4855_v33 }
  0x30   : > { %4512 = vmatmul.mubr.msk.f32.gmra.mrb[14].mxu0 %vm265_vm1, %v240_v16  ;;  %772 = vst.msk [vmem:[#allocation2 + $0x2a0] sm:$0xff] %vm687_vm2, %v4855_v33  ;;  %773 = vst.msk [vmem:[#allocation2 + $0x2a8] sm:$0xff] %vm687_vm2, %v4855_v33 }
  0x31   : > { %4514 = vmatprep.mubr.msk.f32.mxu0 %vm265_vm1, %v241_v17  ;;  %774 = vst.msk [vmem:[#allocation2 + $0x2b0] sm:$0xff] %vm687_vm2, %v4855_v33  ;;  %775 = vst.msk [vmem:[#allocation2 + $0x2b8] sm:$0xff] %vm687_vm2, %v4855_v33 }
  0x32   : > { %776 = vst.msk [vmem:[#allocation2 + $0x2c0] sm:$0xff] %vm687_vm2, %v4855_v33  ;;  %777 = vst.msk [vmem:[#allocation2 + $0x2c8] sm:$0xff] %vm687_vm2, %v4855_v33 }
  0x33   : > { %778 = vst.msk [vmem:[#allocation2 + $0x2d0] sm:$0xff] %vm687_vm2, %v4855_v33  ;;  %779 = vst.msk [vmem:[#allocation2 + $0x2d8] sm:$0xff] %vm687_vm2, %v4855_v33 }
  0x34   : > { %4515 = vmatmul.mubr.msk.f32.gmra.mrb[16].mxu0 %vm265_vm1, %v242_v18  ;;  %780 = vst.msk [vmem:[#allocation2 + $0x2e0] sm:$0xff] %vm687_vm2, %v4855_v33  ;;  %781 = vst.msk [vmem:[#allocation2 + $0x2e8] sm:$0xff] %vm687_vm2, %v4855_v33 }
  0x35   : > { %4517 = vmatprep.mubr.msk.f32.mxu0 %vm265_vm1, %v243_v19  ;;  %782 = vst.msk [vmem:[#allocation2 + $0x2f0] sm:$0xff] %vm687_vm2, %v4855_v33  ;;  %783 = vst.msk [vmem:[#allocation2 + $0x2f8] sm:$0xff] %vm687_vm2, %v4855_v33 }
  0x36   : > { %785 = vst.msk [vmem:[#allocation2 + $0x308] sm:$0xff] %vm687_vm2, %v4855_v33  ;;  %786 = vst.msk [vmem:[#allocation2 + $0x310] sm:$0xff] %vm687_vm2, %v4855_v33 }
  0x37   : > { %789 = vst.msk [vmem:[#allocation2 + $0x328] sm:$0xff] %vm687_vm2, %v4855_v33  ;;  %790 = vst.msk [vmem:[#allocation2 + $0x330] sm:$0xff] %vm687_vm2, %v4855_v33 }
  0x38   : > { %4518 = vmatmul.mubr.msk.f32.gmra.mrb[18].mxu0 %vm265_vm1, %v244_v20 }
  0x39   : > { %4520 = vmatprep.mubr.msk.f32.mxu0 %vm265_vm1, %v245_v21 }
  0x3c   : > { %4521 = vmatmul.mubr.msk.f32.gmra.mrb[20].mxu0 %vm265_vm1, %v246_v22 }
  0x3d   : > { %4523 = vmatprep.mubr.msk.f32.mxu0 %vm265_vm1, %v247_v23 }
  0x40   : > { %4524 = vmatmul.mubr.msk.f32.gmra.mrb[22].mxu0 %vm265_vm1, %v248_v24 }
  0x41   : > { %4526 = vmatprep.mubr.msk.f32.mxu0 %vm265_vm1, %v249_v25 }
  0x44   : > { %4527 = vmatmul.mubr.msk.f32.gmra.mrb[24].mxu0 %vm265_vm1, %v250_v26 }
  0x45   : > { %4529 = vmatprep.mubr.msk.f32.mxu0 %vm265_vm1, %v251_v27 }
  0x48   : > { %4530 = vmatmul.mubr.msk.f32.gmra.mrb[26].mxu0 %vm265_vm1, %v252_v28 }
  0x49   : > { %4532 = vmatprep.mubr.msk.f32.mxu0 %vm265_vm1, %v253_v29 }
  0x4c   : > { %4533 = vmatmul.mubr.msk.f32.gmra.mrb[28].mxu0 %vm265_vm1, %v254_v30 }
  0x4d   : > { %4535 = vmatprep.mubr.msk.f32.mxu0 %vm265_vm1, %v255_v31 }
  0x50   : > { %4536 = vmatmul.mubr.msk.f32.gmra.mrb[30].mxu0 %vm265_vm1, %v256_v32 }
  0xe7   : > { %v4492_v38 = vpop.f32.mrb[0].mxu0 }
  0xe8   : > { %v438_v39 = vadd.f32 %v4492_v38, %v5141_v37  ;;  %v432_v40 = vpop.f32.mrb[1].mxu0 }
  0xe9   : > { %v433_v41 = vadd.f32 %v5141_v37, %v432_v40 }
  0xea   : > { %vm592_vm4 = vcmp.gt.f32.partialorder %v438_v39, 0.0  ;;  %v624_v42 = vmul.f32 0.1, %v438_v39 }
  0xeb   : > { %vm591_vm5 = vcmp.gt.f32.partialorder %v433_v41, 0.0  ;;  %v623_v43 = vmul.f32 0.1, %v433_v41  ;;  %v4495_v44 = vpop.f32.mrb[2].mxu0 }
  0xec   : > { %v5145_v45 = vsel %vm592_vm4, %v438_v39, %v624_v42  ;;  %v448_v46 = vadd.f32 %v4495_v44, %v5141_v37  ;;  %v442_v47 = vpop.f32.mrb[3].mxu0 }
  0xed   : > { %7316 = vst [vmem:[#allocation3_spill] sm:$0xff] %v5145_v45  ;;  %819 = vst.msk [vmem:[#allocation2 + $0x110] sm:$0xff] %vm687_vm2, %v5145_v45  ;;  %v5150_v48 = vsel %vm591_vm5, %v433_v41, %v623_v43  ;;  %v443_v49 = vadd.f32 %v5141_v37, %v442_v47  ;;  %v884_v2 = vmax.f32 %v5145_v45, %v5163_v58 }
  0xee   : > { %7317 = vst [vmem:[#allocation4_spill] sm:$0xff] %v5150_v48  ;;  %818 = vst.msk [vmem:[#allocation2 + $0x108] sm:$0xff] %vm687_vm2, %v5150_v48  ;;  %vm594_vm6 = vcmp.gt.f32.partialorder %v448_v46, 0.0  ;;  %v626_v50 = vmul.f32 0.1, %v448_v46  ;;  %v883_v6 = vmax.f32 %v5150_v48, %v5167_v60 }
  0xef   : > { %vm593_vm7 = vcmp.gt.f32.partialorder %v443_v49, 0.0  ;;  %v625_v51 = vmul.f32 0.1, %v443_v49  ;;  %v4498_v52 = vpop.f32.mrb[4].mxu0  ;;  %v949_v15 = vmax.f32 %v884_v2, %v5179_v5 }
  0xf0   : > { %v5155_v53 = vsel %vm594_vm6, %v448_v46, %v626_v50  ;;  %v458_v54 = vadd.f32 %v4498_v52, %v5141_v37  ;;  %v452_v55 = vpop.f32.mrb[5].mxu0  ;;  %v948_v19 = vmax.f32 %v883_v6, %v5185_v8 }
  0xf1   : > { %7318 = vst [vmem:[#allocation5_spill] sm:$0xff] %v5155_v53  ;;  %821 = vst.msk [vmem:[#allocation2 + $0x130] sm:$0xff] %vm687_vm2, %v5155_v53  ;;  %v5160_v56 = vsel %vm593_vm7, %v443_v49, %v625_v51  ;;  %v453_v57 = vadd.f32 %v5141_v37, %v452_v55  ;;  %v886_v20 = vmax.f32 %v5155_v53, %v5179_v5 }
  0xf2   : > { %7319 = vst [vmem:[#allocation6_spill] sm:$0xff] %v5160_v56  ;;  %820 = vst.msk [vmem:[#allocation2 + $0x128] sm:$0xff] %vm687_vm2, %v5160_v56  ;;  %vm596_vm8 = vcmp.gt.f32.partialorder %v458_v54, 0.0  ;;  %v628_v59 = vmul.f32 0.1, %v458_v54  ;;  %v885_v30 = vmax.f32 %v5160_v56, %v5185_v8  ;;  %v1012_v56 = vld [vmem:[#allocation2 + $0x310] sm:$0xff] }
  0xf3   : > { %vm595_vm9 = vcmp.gt.f32.partialorder %v453_v57, 0.0  ;;  %v627_v61 = vmul.f32 0.1, %v453_v57  ;;  %v4501_v62 = vpop.f32.mrb[6].mxu0 }
  0xf4   : > { %v5169_v63 = vsel %vm596_vm8, %v458_v54, %v628_v59  ;;  %v468_v0 = vadd.f32 %v4501_v62, %v5141_v37  ;;  %v462_v1 = vpop.f32.mrb[7].mxu0  ;;  %v919_v16 = vld [vmem:[#allocation2 + $0x110] sm:$0xff] }
  0xf5   : > { %7320 = vst [vmem:[#allocation7_spill] sm:$0xff] %v5169_v63  ;;  %823 = vst.msk [vmem:[#allocation2 + $0x150] sm:$0xff] %vm687_vm2, %v5169_v63  ;;  %v5176_v3 = vsel %vm595_vm9, %v453_v57, %v627_v61  ;;  %v463_v4 = vadd.f32 %v5141_v37, %v462_v1  ;;  %v951_v25 = vmax.f32 %v886_v20, %v919_v16  ;;  %v5212_v31 = vld [vmem:[#allocation2 + $0x108] sm:$0xff] }
  0xf6   : > { %7321 = vst [vmem:[#allocation8_spill] sm:$0xff] %v5176_v3  ;;  %822 = vst.msk [vmem:[#allocation2 + $0x148] sm:$0xff] %vm687_vm2, %v5176_v3  ;;  %vm598_vm10 = vcmp.gt.f32.partialorder %v468_v0, 0.0  ;;  %v630_v7 = vmul.f32 0.1, %v468_v0  ;;  %v888_v38 = vmax.f32 %v5169_v63, %v919_v16  ;;  %v950_v46 = vmax.f32 %v885_v30, %v5212_v31 }
  0xf7   : > { %vm597_vm11 = vcmp.gt.f32.partialorder %v463_v4, 0.0  ;;  %v629_v9 = vmul.f32 0.1, %v463_v4  ;;  %v4504_v10 = vpop.f32.mrb[8].mxu0 }
  0xf8   : > { %v5187_v11 = vld [vmem:[#allocation2 + $0x130] sm:$0xff]  ;;  %v5189_v12 = vsel %vm598_vm10, %v468_v0, %v630_v7  ;;  %v478_v13 = vadd.f32 %v4504_v10, %v5141_v37  ;;  %v472_v14 = vpop.f32.mrb[9].mxu0 }
  0xf9   : > { %7322 = vst [vmem:[#allocation9_spill] sm:$0xff] %v5189_v12  ;;  %v5193_v17 = vld [vmem:[#allocation2 + $0x128] sm:$0xff]  ;;  %825 = vst.msk [vmem:[#allocation2 + $0x170] sm:$0xff] %vm687_vm2, %v5189_v12  ;;  %v5197_v18 = vsel %vm597_vm11, %v463_v4, %v629_v9  ;;  %v1014_v21 = vmax.f32 %v949_v15, %v5187_v11  ;;  %v473_v23 = vadd.f32 %v5141_v37, %v472_v14 }
  0xfa   : > { %7323 = vst [vmem:[#allocation10_spill] sm:$0xff] %v5197_v18  ;;  %824 = vst.msk [vmem:[#allocation2 + $0x168] sm:$0xff] %vm687_vm2, %v5197_v18  ;;  %vm600_vm12 = vcmp.gt.f32.partialorder %v478_v13, 0.0  ;;  %v632_v22 = vmul.f32 0.1, %v478_v13  ;;  %v1013_v27 = vmax.f32 %v948_v19, %v5193_v17  ;;  %v953_v51 = vmax.f32 %v888_v38, %v5187_v11 }
  0xfb   : > { %v4507_v24 = vpop.f32.mrb[10].mxu0  ;;  %vm599_vm13 = vcmp.gt.f32.partialorder %v473_v23, 0.0  ;;  %v631_v41 = vmul.f32 0.1, %v473_v23  ;;  %v890_v62 = vmax.f32 %v5189_v12, %v5187_v11  ;;  %v887_v11 = vmax.f32 %v5176_v3, %v5212_v31 }
  0xfc   : > { %v5206_v26 = vld [vmem:[#allocation2 + $0x150] sm:$0xff]  ;;  %v488_v28 = vadd.f32 %v4507_v24, %v5141_v37  ;;  %v482_v29 = vpop.f32.mrb[11].mxu0  ;;  %v5219_v35 = vsel %vm600_vm12, %v478_v13, %v632_v22  ;;  %v889_v19 = vmax.f32 %v5197_v18, %v5193_v17 }
  0xfd   : > { %v5215_v32 = vmax.f32 %v1014_v21, %v5206_v26  ;;  %v5217_v33 = vld [vmem:[#allocation2 + $0x148] sm:$0xff]  ;;  %7324 = vst [vmem:[#allocation11_spill] sm:$0xff] %v5219_v35  ;;  %v1016_v40 = vmax.f32 %v951_v25, %v5206_v26  ;;  %827 = vst.msk [vmem:[#allocation2 + $0x190] sm:$0xff] %vm687_vm2, %v5219_v35  ;;  %v483_v43 = vadd.f32 %v5141_v37, %v482_v29 }
  0xfe   : > { %v5223_v39 = vmax.f32 %v1013_v27, %v5217_v33  ;;  %vm602_vm14 = vcmp.gt.f32.partialorder %v488_v28, 0.0  ;;  %v634_v42 = vmul.f32 0.1, %v488_v28  ;;  %v5241_v54 = vsel %vm599_vm13, %v473_v23, %v631_v41 }
  0xff   : > { %1111 = vst.msk [vmem:[#allocation2 + $0x110] sm:$0xff] %vm687_vm2, %v5215_v32  ;;  %v4510_v44 = vpop.f32.mrb[12].mxu0  ;;  %7325 = vst [vmem:[#allocation12_spill] sm:$0xff] %v5241_v54  ;;  %vm601_vm15 = vcmp.gt.f32.partialorder %v483_v43, 0.0  ;;  %v633_v59 = vmul.f32 0.1, %v483_v43  ;;  %v1015_v61 = vmax.f32 %v950_v46, %v5217_v33  ;;  %v955_v16 = vmax.f32 %v890_v62, %v5206_v26 }
 0x100   : > { %1110 = vst.msk [vmem:[#allocation2 + $0x108] sm:$0xff] %vm687_vm2, %v5223_v39  ;;  %v5234_v47 = vld [vmem:[#allocation2 + $0x170] sm:$0xff]  ;;  %v498_v49 = vadd.f32 %v4510_v44, %v5141_v37  ;;  %v492_v50 = vpop.f32.mrb[13].mxu0  ;;  %826 = vst.msk [vmem:[#allocation2 + $0x188] sm:$0xff] %vm687_vm2, %v5241_v54  ;;  %v5247_v57 = vsel %vm602_vm14, %v488_v28, %v634_v42  ;;  %v892_v20 = vmax.f32 %v5219_v35, %v5206_v26 }
 0x101   : > { %v5239_v52 = vmax.f32 %v1016_v40, %v5234_v47  ;;  %v5243_v55 = vld [vmem:[#allocation2 + $0x168] sm:$0xff]  ;;  %7326 = vst [vmem:[#allocation13_spill] sm:$0xff] %v5247_v57  ;;  %829 = vst.msk [vmem:[#allocation2 + $0x1b0] sm:$0xff] %vm687_vm2, %v5247_v57  ;;  %v493_v1 = vadd.f32 %v5141_v37, %v492_v50  ;;  %v1018_v4 = vmax.f32 %v953_v51, %v5234_v47 }
 0x102   : > { %vm604_vm0 = vcmp.gt.f32.partialorder %v498_v49, 0.0  ;;  %v636_v0 = vmul.f32 0.1, %v498_v49  ;;  %v5258_v6 = vsel %vm601_vm15, %v483_v43, %v633_v59  ;;  %v5262_v10 = vmax.f32 %v1015_v61, %v5243_v55 }
 0x103   : > { %1113 = vst.msk [vmem:[#allocation2 + $0x130] sm:$0xff] %vm687_vm2, %v5239_v52  ;;  %v4513_v2 = vpop.f32.mrb[14].mxu0  ;;  %7327 = vst [vmem:[#allocation14_spill] sm:$0xff] %v5258_v6  ;;  %vm603_vm1 = vcmp.gt.f32.partialorder %v493_v1, 0.0  ;;  %v635_v15 = vmul.f32 0.1, %v493_v1  ;;  %v957_v27 = vmax.f32 %v892_v20, %v5234_v47  ;;  %v891_v28 = vmax.f32 %v5241_v54, %v5217_v33 }
 0x104   : > { %v508_v7 = vadd.f32 %v4513_v2, %v5141_v37  ;;  %v502_v9 = vpop.f32.mrb[15].mxu0  ;;  %v5266_v13 = vld [vmem:[#allocation2 + $0x190] sm:$0xff]  ;;  %828 = vst.msk [vmem:[#allocation2 + $0x1a8] sm:$0xff] %vm687_vm2, %v5258_v6  ;;  %v5270_v14 = vsel %vm604_vm0, %v498_v49, %v636_v0  ;;  %1112 = vst.msk [vmem:[#allocation2 + $0x128] sm:$0xff] %vm687_vm2, %v5262_v10  ;;  %v5300_v41 = vmax.f32 %v887_v11, %v5193_v17 }
 0x105   : > { %7328 = vst [vmem:[#allocation15_spill] sm:$0xff] %v5270_v14  ;;  %v5278_v21 = vmax.f32 %v1018_v4, %v5266_v13  ;;  %831 = vst.msk [vmem:[#allocation2 + $0x1d0] sm:$0xff] %vm687_vm2, %v5270_v14  ;;  %v5284_v22 = vsel %vm603_vm1, %v493_v1, %v635_v15  ;;  %v503_v24 = vadd.f32 %v5141_v37, %v502_v9 }
 0x106   : > { %7329 = vst [vmem:[#allocation16_spill] sm:$0xff] %v5284_v22  ;;  %vm606_vm4 = vcmp.gt.f32.partialorder %v508_v7, 0.0  ;;  %v638_v23 = vmul.f32 0.1, %v508_v7  ;;  %v1020_v26 = vmax.f32 %v955_v16, %v5266_v13  ;;  %830 = vst.msk [vmem:[#allocation2 + $0x1c8] sm:$0xff] %vm687_vm2, %v5284_v22  ;;  %v5303_v43 = vmax.f32 %v889_v19, %v5217_v33 }
 0x107   : > { %v4516_v25 = vpop.f32.mrb[16].mxu0  ;;  %1115 = vst.msk [vmem:[#allocation2 + $0x150] sm:$0xff] %vm687_vm2, %v5278_v21  ;;  %vm605_vm5 = vcmp.gt.f32.partialorder %v503_v24, 0.0  ;;  %v637_v38 = vmul.f32 0.1, %v503_v24  ;;  %v1143_v42 = vld [vmem:[#allocation2 + $0x10e] sm:$0xff]  ;;  %v5310_v49 = vmax.f32 %v891_v28, %v5243_v55  ;;  %v894_v50 = vmax.f32 %v5247_v57, %v5234_v47 }
 0x108   : > { %v518_v29 = vadd.f32 %v4516_v25, %v5141_v37  ;;  %v512_v30 = vpop.f32.mrb[17].mxu0  ;;  %v5296_v31 = vsel %vm606_vm4, %v508_v7, %v638_v23  ;;  %v5305_v44 = vld [vmem:[#allocation2 + $0x1b0] sm:$0xff]  ;;  %v893_v1 = vmax.f32 %v5258_v6, %v5243_v55  ;;  %v5325_v47 = vld [vmem:[#allocation2 + $0x188] sm:$0xff]  ;;  %v1175_v11 = vmax.f32 %v5215_v32, %v1143_v42 }
 0x109   : > { %7330 = vst [vmem:[#allocation17_spill] sm:$0xff] %v5296_v31  ;;  %v513_v40 = vadd.f32 %v5141_v37, %v512_v30  ;;  %833 = vst.msk [vmem:[#allocation2 + $0x1f0] sm:$0xff] %vm687_vm2, %v5296_v31  ;;  %v1022_v17 = vmax.f32 %v957_v27, %v5305_v44  ;;  %v5316_v51 = vmax.f32 %v1020_v26, %v5305_v44  ;;  %v1142_v9 = vld [vmem:[#allocation2 + $0x106] sm:$0xff]  ;;  %v1207_v25 = vld [vmem:[#allocation2 + $0x10f] sm:$0xff] }
 0x10a   : > { %vm608_vm6 = vcmp.gt.f32.partialorder %v518_v29, 0.0  ;;  %v640_v46 = vmul.f32 0.1, %v518_v29  ;;  %v5318_v59 = vsel %vm605_vm5, %v503_v24, %v637_v38  ;;  %v959_v15 = vmax.f32 %v894_v50, %v5266_v13 }
 0x10b   : > { %v4519_v33 = vpop.f32.mrb[18].mxu0  ;;  %7331 = vst [vmem:[#allocation18_spill] sm:$0xff] %v5318_v59  ;;  %v639_v61 = vmul.f32 0.1, %v513_v40  ;;  %vm607_vm7 = vcmp.gt.f32.partialorder %v513_v40, 0.0  ;;  %1117 = vst.msk [vmem:[#allocation2 + $0x170] sm:$0xff] %vm687_vm2, %v5316_v51  ;;  %v896_v16 = vmax.f32 %v5270_v14, %v5266_v13  ;;  %v5348_v32 = vmax.f32 %v893_v1, %v5325_v47 }
 0x10c   : > { %v528_v62 = vadd.f32 %v4519_v33, %v5141_v37  ;;  %v522_v0 = vpop.f32.mrb[19].mxu0  ;;  %v5327_v2 = vld [vmem:[#allocation2 + $0x1d0] sm:$0xff]  ;;  %832 = vst.msk [vmem:[#allocation2 + $0x1e8] sm:$0xff] %vm687_vm2, %v5318_v59  ;;  %v5333_v7 = vsel %vm608_vm6, %v518_v29, %v640_v46  ;;  %v5353_v13 = vld [vmem:[#allocation2 + $0x1a8] sm:$0xff]  ;;  %v1174_v28 = vmax.f32 %v5223_v39, %v1142_v9  ;;  %v895_v30 = vmax.f32 %v5284_v22, %v5325_v47  ;;  %v4284_v39 = vld [vmem:[%s7295_s3 + $0x6] sm:$0x3] }
 0x10d   : > { %v523_v4 = vadd.f32 %v5141_v37, %v522_v0  ;;  %v5340_v19 = vmax.f32 %v1022_v17, %v5327_v2  ;;  %835 = vst.msk [vmem:[#allocation2 + $0x210] sm:$0xff] %vm687_vm2, %v5333_v7  ;;  %v5345_v24 = vsel %vm607_vm7, %v513_v40, %v639_v61  ;;  %v1024_v27 = vmax.f32 %v959_v15, %v5327_v2  ;;  %v1206_v1 = vld [vmem:[#allocation2 + $0x107] sm:$0xff]  ;;  %v1273_v14 = vld [vmem:[#allocation2 + $0x131] sm:$0xff] }
 0x10e   : > { %vm610_vm8 = vcmp.gt.f32.partialorder %v528_v62, 0.0  ;;  %v642_v20 = vmul.f32 0.1, %v528_v62  ;;  %834 = vst.msk [vmem:[#allocation2 + $0x208] sm:$0xff] %vm687_vm2, %v5345_v24  ;;  %4614 = vmatprep.mubr.msk.f32.mxu1 %vm687_vm2, %v5345_v24  ;;  %v1239_v42 = vmax.f32 %v1175_v11, %v1207_v25  ;;  %v961_v17 = vmax.f32 %v896_v16, %v5305_v44 }
 0x10f   : > { %vm609_vm9 = vcmp.gt.f32.partialorder %v523_v4, 0.0  ;;  %v641_v23 = vmul.f32 0.1, %v523_v4  ;;  %1119 = vst.msk [vmem:[#allocation2 + $0x190] sm:$0xff] %vm687_vm2, %v5340_v19  ;;  %v4522_v26 = vpop.f32.mrb[20].mxu0  ;;  %4615 = vmatmul.mubr.msk.f32.vlgmr.msra.gmra.mrb[0].mxu1 %vm687_vm2, %v5333_v7  ;;  %v898_v33 = vmax.f32 %v5296_v31, %v5305_v44  ;;  %v5393_v44 = vld [vmem:[#allocation2 + $0x1c8] sm:$0xff]  ;;  %v1238_v11 = vmax.f32 %v1174_v28, %v1206_v1 }
 0x110   : > { %v5364_v38 = vld [vmem:[#allocation2 + $0x1f0] sm:$0xff]  ;;  %v532_v40 = vpop.f32.mrb[21].mxu0  ;;  %v5372_v50 = vsel %vm610_vm8, %v528_v62, %v642_v20  ;;  %v5391_v62 = vmax.f32 %v895_v30, %v5353_v13  ;;  %v5396_v9 = vadd.f32 %v4522_v26, %v5141_v37  ;;  %4639 = vmatpush3.msk.msra.mxu1 %vm1496_vm3, %v5134_v36  ;;  %v897_v25 = vmax.f32 %v5318_v59, %v5353_v13 }
 0x111   : > { %v5369_v46 = vsel %vm609_vm9, %v523_v4, %v641_v23  ;;  %v5381_v61 = vmax.f32 %v1024_v27, %v5364_v38  ;;  %v533_v0 = vadd.f32 %v5141_v37, %v532_v40  ;;  %v1271_v4 = vld [vmem:[#allocation2 + $0x111] sm:$0xff]  ;;  %837 = vst.msk [vmem:[#allocation2 + $0x230] sm:$0xff] %vm687_vm2, %v5372_v50  ;;  %v963_v20 = vmax.f32 %v898_v33, %v5327_v2  ;;  %v1270_v30 = vld [vmem:[#allocation2 + $0x109] sm:$0xff] }
 0x112   : > { %836 = vst.msk [vmem:[#allocation2 + $0x228] sm:$0xff] %vm687_vm2, %v5369_v46  ;;  %4617 = vmatprep.mubr.msk.f32.mxu1 %vm687_vm2, %v5369_v46  ;;  %v1303_v15 = vmax.f32 %v1239_v42, %v1271_v4  ;;  %v1026_v23 = vmax.f32 %v961_v17, %v5364_v38  ;;  %v1335_v26 = vld [vmem:[#allocation2 + $0x112] sm:$0xff]  ;;  %4688 = vmatprep.subr.msk.mxu1 %vm1496_vm3, %v4284_v39  ;;  %v1144_v33 = vld [vmem:[#allocation2 + $0x126] sm:$0xff]  ;;  %vm612_vm11 = vcmp.gt.f32.partialorder %v5396_v9, 0.0 }
 0x113   : > { %v4525_v16 = vpop.f32.mrb[22].mxu0  ;;  %1121 = vst.msk [vmem:[#allocation2 + $0x1b0] sm:$0xff] %vm687_vm2, %v5381_v61  ;;  %v643_v27 = vmul.f32 0.1, %v533_v0  ;;  %vm611_vm10 = vcmp.gt.f32.partialorder %v533_v0, 0.0  ;;  %v1302_v36 = vmax.f32 %v1238_v11, %v1270_v30  ;;  %4618 = vmatmul.mubr.msk.f32.gmra.mrb[2].mxu1 %vm687_vm2, %v5372_v50  ;;  %v1145_v1 = vld [vmem:[#allocation2 + $0x12e] sm:$0xff]  ;;  %v5417_v4 = vmax.f32 %v897_v25, %v5393_v44 }
 0x114   : > { %v542_v40 = vpop.f32.mrb[23].mxu0  ;;  %v5407_v28 = vld [vmem:[#allocation2 + $0x210] sm:$0xff]  ;;  %v5409_v42 = vmax.f32 %v1303_v15, %v1335_v26  ;;  %v5412_v17 = vadd.f32 %v4525_v16, %v5141_v37  ;;  %v899_v39 = vmax.f32 %v5345_v24, %v5393_v44  ;;  %v900_v29 = vmax.f32 %v5333_v7, %v5327_v2 }
 0x115   : > { %v5424_v11 = vmax.f32 %v1026_v23, %v5407_v28  ;;  %v1334_v15 = vld [vmem:[#allocation2 + $0x10a] sm:$0xff]  ;;  %v644_v16 = vmul.f32 0.1, %v5396_v9  ;;  %v543_v25 = vadd.f32 %v5141_v37, %v542_v40  ;;  %v1028_v24 = vmax.f32 %v963_v20, %v5407_v28 }
 0x116   : > { %v1366_v30 = vmax.f32 %v1302_v36, %v1334_v15  ;;  %2050 = vst.msk [vmem:[#allocation2 + $0x110] sm:$0xff] %vm687_vm2, %v5409_v42  ;;  %v1176_v2 = vmax.f32 %v5262_v10, %v1144_v33  ;;  %v1177_v7 = vmax.f32 %v5239_v52, %v1145_v1  ;;  %v5437_v23 = vsel %vm611_vm10, %v533_v0, %v643_v27  ;;  %v1208_v52 = vld [vmem:[#allocation2 + $0x127] sm:$0xff]  ;;  %v1209_v0 = vld [vmem:[#allocation2 + $0x12f] sm:$0xff] }
 0x117   : > { %v4528_v26 = vpop.f32.mrb[24].mxu0  ;;  %1123 = vst.msk [vmem:[#allocation2 + $0x1d0] sm:$0xff] %vm687_vm2, %v5424_v11  ;;  %v5440_v36 = vmax.f32 %v900_v29, %v5364_v38  ;;  %vm614_vm12 = vcmp.gt.f32.partialorder %v5412_v17, 0.0  ;;  %v902_v10 = vmax.f32 %v5372_v50, %v5364_v38  ;;  %838 = vst.msk [vmem:[#allocation2 + $0x248] sm:$0xff] %vm687_vm2, %v5437_v23  ;;  %4620 = vmatprep.mubr.msk.f32.mxu1 %vm687_vm2, %v5437_v23  ;;  %v5454_v29 = vld [vmem:[#allocation2 + $0x1e8] sm:$0xff]  ;;  %vm613_vm13 = vcmp.gt.f32.partialorder %v543_v25, 0.0 }
 0x118   : > { %v552_v31 = vpop.f32.mrb[25].mxu0  ;;  %4540 = vmatprep.mubr.msk.f32.mxu0 %vm687_vm2, %v1366_v30  ;;  %2049 = vst.msk [vmem:[#allocation2 + $0x108] sm:$0xff] %vm687_vm2, %v1366_v30  ;;  %v2113_v20 = vmax.f32 %v1366_v30, %v5167_v60  ;;  %v5448_v40 = vld [vmem:[#allocation2 + $0x230] sm:$0xff]  ;;  %v646_v60 = vmul.f32 0.1, %v5412_v17  ;;  %v1240_v38 = vmax.f32 %v1176_v2, %v1208_v52  ;;  %v1241_v50 = vmax.f32 %v1177_v7, %v1209_v0  ;;  %v5467_v15 = vld [vmem:[#allocation2 + $0x208] sm:$0xff] }
 0x119   : > { %4541 = vmatmul.mubr.msk.f32.vlgmr.msra.gmra.mrb[32].mxu0 %vm687_vm2, %v5409_v42  ;;  %v5460_v27 = vmax.f32 %v1028_v24, %v5448_v40  ;;  %v2114_v1 = vmax.f32 %v5409_v42, %v5163_v58  ;;  %v645_v30 = vmul.f32 0.1, %v543_v25  ;;  %v1272_v59 = vld [vmem:[#allocation2 + $0x129] sm:$0xff]  ;;  %v676_v22 = vsel %vm612_vm11, %v5396_v9, %v644_v16  ;;  %v1337_v16 = vld [vmem:[#allocation2 + $0x132] sm:$0xff] }
 0x11a   : > { %v5463_v33 = vmax.f32 %v2113_v20, %v5185_v8  ;;  %4589 = vmatpush3.msk.msra.mxu0 %vm1496_vm3, %v5118_v34  ;;  %v1304_v24 = vmax.f32 %v1240_v38, %v1272_v59  ;;  %v1305_v2 = vmax.f32 %v1241_v50, %v1273_v14  ;;  %839 = vst.msk [vmem:[#allocation2 + $0x250] sm:$0xff] %vm687_vm2, %v676_v22  ;;  %v1336_v34 = vld [vmem:[#allocation2 + $0x12a] sm:$0xff] }
 0x11b   : > { %v4531_v57 = vpop.f32.mrb[26].mxu0  ;;  %1125 = vst.msk [vmem:[#allocation2 + $0x1f0] sm:$0xff] %vm687_vm2, %v5460_v27  ;;  %4621 = vmatmul.mubr.msk.f32.gmra.mrb[4].mxu1 %vm687_vm2, %v676_v22  ;;  %v553_v58 = vadd.f32 %v5141_v37, %v552_v31  ;;  %v5480_v7 = vmax.f32 %v899_v39, %v5454_v29  ;;  %v901_v9 = vmax.f32 %v5369_v46, %v5454_v29  ;;  %v5500_v0 = vld [vmem:[#allocation2 + $0x228] sm:$0xff]  ;;  %v1281_v3 = vld [vmem:[#allocation2 + $0x1b1] sm:$0xff] }
 0x11c   : > { %v562_v42 = vpop.f32.mrb[27].mxu0  ;;  %v558_v20 = vadd.f32 %v4528_v26, %v5141_v37  ;;  %v7332_v14 = vmax.f32 %v5300_v41, %v5243_v55  ;;  %v5492_v52 = vmax.f32 %v902_v10, %v5407_v28  ;;  %v5494_v31 = vmax.f32 %v1304_v24, %v1336_v34 }
 0x11d   : > { %v5496_v39 = vmax.f32 %v1305_v2, %v1337_v16  ;;  %v903_v46 = vmax.f32 %v5437_v23, %v5467_v15  ;;  %v647_v38 = vmul.f32 0.1, %v553_v58  ;;  %v5505_v55 = vsel %vm613_vm13, %v543_v25, %v645_v30 }
 0x11e   : > { %v5489_v59 = vmax.f32 %v7332_v14, %v5325_v47  ;;  %v568_v41 = vadd.f32 %v4531_v57, %v5141_v37  ;;  %v5511_v26 = vsel %vm614_vm12, %v5412_v17, %v646_v60  ;;  %v5514_v50 = vmax.f32 %v2114_v1, %v5179_v5  ;;  %4543 = vmatprep.mubr.msk.f32.mxu0 %vm687_vm2, %v5494_v31 }
 0x11f   : > { %v4534_v10 = vpop.f32.mrb[28].mxu0  ;;  %v5517_v23 = vmax.f32 %v901_v9, %v5467_v15  ;;  %2052 = vst.msk [vmem:[#allocation2 + $0x130] sm:$0xff] %vm687_vm2, %v5496_v39  ;;  %2051 = vst.msk [vmem:[#allocation2 + $0x128] sm:$0xff] %vm687_vm2, %v5494_v31  ;;  %v904_v57 = vmax.f32 %v676_v22, %v5407_v28  ;;  %vm615_vm14 = vcmp.gt.f32.partialorder %v553_v58, 0.0  ;;  %4623 = vmatprep.mubr.msk.f32.mxu1 %vm687_vm2, %v5505_v55  ;;  %4544 = vmatmul.mubr.msk.f32.gmra.mrb[34].mxu0 %vm687_vm2, %v5496_v39 }
 0x120   : > { %1114 = vst.msk [vmem:[#allocation2 + $0x148] sm:$0xff] %vm687_vm2, %v5489_v59  ;;  %840 = vst.msk [vmem:[#allocation2 + $0x268] sm:$0xff] %vm687_vm2, %v5505_v55  ;;  %v572_v17 = vpop.f32.mrb[29].mxu0  ;;  %v1030_v25 = vmax.f32 %v5440_v36, %v5448_v40  ;;  %v5537_v60 = vmax.f32 %v903_v46, %v5500_v0  ;;  %v648_v22 = vmul.f32 0.1, %v558_v20  ;;  %4624 = vmatmul.mubr.msk.f32.gmra.mrb[6].mxu1 %vm687_vm2, %v5511_v26  ;;  %vm616_vm15 = vcmp.gt.f32.partialorder %v558_v20, 0.0 }
 0x121   : > { %841 = vst.msk [vmem:[#allocation2 + $0x270] sm:$0xff] %vm687_vm2, %v5511_v26  ;;  %v563_v28 = vadd.f32 %v5141_v37, %v562_v42  ;;  %v5543_v1 = vmax.f32 %v904_v57, %v5448_v40  ;;  %v650_v30 = vmul.f32 0.1, %v568_v41  ;;  %v1019_v36 = vmax.f32 %v5303_v43, %v5325_v47  ;;  %v5547_v24 = vld [vmem:[#allocation2 + $0x250] sm:$0xff] }
 0x122   : > { %v5550_v9 = vsel %vm615_vm14, %v553_v58, %v647_v38  ;;  %v5553_v34 = vadd.f32 %v4534_v10, %v5141_v37  ;;  %v2115_v42 = vmax.f32 %v5494_v31, %v5185_v8  ;;  %v5558_v14 = vmax.f32 %v1030_v25, %v5547_v24  ;;  %v5567_v58 = vld [vmem:[#allocation2 + $0x108] sm:$0xff]  ;;  %v5571_v8 = vld [vmem:[#allocation2 + $0x110] sm:$0xff] }
 0x123   : > { %vm617_vm0 = vcmp.gt.f32.partialorder %v563_v28, 0.0  ;;  %v649_v2 = vmul.f32 0.1, %v563_v28  ;;  %v4537_v16 = vpop.f32.mrb[30].mxu0  ;;  %vm618_vm1 = vcmp.gt.f32.partialorder %v568_v41, 0.0  ;;  %v5561_v43 = vmax.f32 %v1019_v36, %v5353_v13  ;;  %842 = vst.msk [vmem:[#allocation2 + $0x288] sm:$0xff] %vm687_vm2, %v5550_v9  ;;  %4626 = vmatprep.mubr.msk.f32.mxu1 %vm687_vm2, %v5550_v9 }
 0x124   : > { %v582_v47 = vpop.f32.mrb[31].mxu0  ;;  %v2116_v46 = vmax.f32 %v5496_v39, %v5179_v5  ;;  %v905_v31 = vmax.f32 %v5505_v55, %v5500_v0  ;;  %v5575_v38 = vld [vmem:[#allocation2 + $0x248] sm:$0xff]  ;;  %v906_v10 = vmax.f32 %v5511_v26, %v5448_v40  ;;  %v680_v57 = vsel %vm616_vm15, %v558_v20, %v648_v22  ;;  %1127 = vst.msk [vmem:[#allocation2 + $0x210] sm:$0xff] %vm687_vm2, %v5558_v14 }
 0x125   : > { %v1032_v25 = vmax.f32 %v5492_v52, %v5547_v24  ;;  %1116 = vst.msk [vmem:[#allocation2 + $0x168] sm:$0xff] %vm687_vm2, %v5561_v43  ;;  %843 = vst.msk [vmem:[#allocation2 + $0x290] sm:$0xff] %vm687_vm2, %v680_v57  ;;  %4627 = vmatmul.mubr.msk.f32.gmra.mrb[8].mxu1 %vm687_vm2, %v680_v57  ;;  %v573_v5 = vadd.f32 %v5141_v37, %v572_v17  ;;  %v1021_v40 = vmax.f32 %v5310_v49, %v5353_v13 }
 0x126   : > { %v5592_v20 = vsel %vm617_vm0, %v563_v28, %v649_v2  ;;  %v5600_v39 = vadd.f32 %v4537_v16, %v5141_v37  ;;  %v5603_v55 = vsel %vm618_vm1, %v568_v41, %v650_v30  ;;  %v5606_v26 = vadd.f32 %v5141_v37, %v582_v47  ;;  %v5624_v37 = vld [vmem:[#allocation2 + $0x130] sm:$0xff] }
 0x127   : > { %v1146_v36 = vld [vmem:[#allocation2 + $0x146] sm:$0xff]  ;;  %844 = vst.msk [vmem:[#allocation2 + $0x2a8] sm:$0xff] %vm687_vm2, %v5592_v20  ;;  %4629 = vmatprep.mubr.msk.f32.mxu1 %vm687_vm2, %v5592_v20  ;;  %v5609_v49 = vmax.f32 %v2115_v42, %v5567_v58  ;;  %v5612_v13 = vmax.f32 %v2116_v46, %v5571_v8  ;;  %v1147_v17 = vld [vmem:[#allocation2 + $0x14e] sm:$0xff]  ;;  %v5615_v22 = vmax.f32 %v905_v31, %v5575_v38  ;;  %845 = vst.msk [vmem:[#allocation2 + $0x2b0] sm:$0xff] %vm687_vm2, %v5603_v55 }
 0x128   : > { %v1178_v52 = vmax.f32 %v5489_v59, %v1146_v36  ;;  %v1210_v59 = vld [vmem:[#allocation2 + $0x147] sm:$0xff]  ;;  %v5617_v28 = vld [vmem:[#allocation2 + $0x270] sm:$0xff]  ;;  %v5620_v2 = vmax.f32 %v1021_v40, %v5393_v44  ;;  %v1179_v30 = vmax.f32 %v5278_v21, %v1147_v17  ;;  %vm620_vm4 = vcmp.gt.f32.partialorder %v5553_v34, 0.0 }
 0x129   : > { %v5628_v16 = vmax.f32 %v1032_v25, %v5617_v28  ;;  %v5630_v42 = vld [vmem:[#allocation2 + $0x268] sm:$0xff]  ;;  %v971_v31 = vmax.f32 %v906_v10, %v5547_v24  ;;  %v907_v36 = vmax.f32 %v5550_v9, %v5575_v38  ;;  %v652_v40 = vmul.f32 0.1, %v5553_v34  ;;  %4630 = vmatmul.mubr.msk.f32.gmra.mrb[10].mxu1 %vm687_vm2, %v5603_v55  ;;  %v1339_v9 = vld [vmem:[#allocation2 + $0x152] sm:$0xff] }
 0x12a   : > { %v1242_v41 = vmax.f32 %v1178_v52, %v1210_v59  ;;  %v1274_v47 = vld [vmem:[#allocation2 + $0x149] sm:$0xff]  ;;  %v651_v6 = vmul.f32 0.1, %v573_v5  ;;  %1118 = vst.msk [vmem:[#allocation2 + $0x188] sm:$0xff] %vm687_vm2, %v5620_v2  ;;  %v908_v52 = vmax.f32 %v680_v57, %v5547_v24  ;;  %vm619_vm5 = vcmp.gt.f32.partialorder %v573_v5, 0.0  ;;  %v1275_v59 = vld [vmem:[#allocation2 + $0x151] sm:$0xff] }
 0x12b   : > { %v1211_v46 = vld [vmem:[#allocation2 + $0x14f] sm:$0xff]  ;;  %1129 = vst.msk [vmem:[#allocation2 + $0x230] sm:$0xff] %vm687_vm2, %v5628_v16  ;;  %v1034_v17 = vmax.f32 %v5543_v1, %v5617_v28  ;;  %v5649_v35 = vmax.f32 %v907_v36, %v5630_v42  ;;  %v1025_v57 = vmax.f32 %v5391_v62, %v5454_v29  ;;  %vm621_vm6 = vcmp.gt.f32.partialorder %v5606_v26, 0.0 }
 0x12c   : > { %v1306_v21 = vmax.f32 %v1242_v41, %v1274_v47  ;;  %v1243_v25 = vmax.f32 %v1179_v30, %v1211_v46  ;;  %v1338_v10 = vld [vmem:[#allocation2 + $0x14a] sm:$0xff]  ;;  %v1023_v41 = vmax.f32 %v5348_v32, %v5393_v44  ;;  %v5656_v24 = vmax.f32 %v908_v52, %v5617_v28 }
 0x12d   : > { %v1148_v46 = vld [vmem:[#allocation2 + $0x166] sm:$0xff]  ;;  %v1149_v1 = vld [vmem:[#allocation2 + $0x16e] sm:$0xff]  ;;  %v5665_v12 = vsel %vm619_vm5, %v573_v5, %v651_v6  ;;  %v5670_v32 = vsel %vm620_vm4, %v5553_v34, %v652_v40  ;;  %v653_v5 = vmul.f32 0.1, %v5606_v26  ;;  %v5685_v34 = vmax.f32 %v1025_v57, %v5467_v15 }
 0x12e   : > { %v5653_v30 = vmax.f32 %v1306_v21, %v1338_v10  ;;  %v1307_v47 = vmax.f32 %v1243_v25, %v1275_v59  ;;  %v1180_v54 = vmax.f32 %v5561_v43, %v1148_v46  ;;  %v5662_v36 = vmax.f32 %v1023_v41, %v5454_v29  ;;  %v1212_v62 = vld [vmem:[#allocation2 + $0x167] sm:$0xff]  ;;  %v5679_v43 = vld [vmem:[#allocation2 + $0x290] sm:$0xff]  ;;  %846 = vst.msk [vmem:[#allocation2 + $0x2c8] sm:$0xff] %vm687_vm2, %v5665_v12 }
 0x12f   : > { %v1181_v29 = vmax.f32 %v5316_v51, %v1149_v1  ;;  %v5681_v6 = vld [vmem:[#allocation2 + $0x2b0] sm:$0xff]  ;;  %847 = vst.msk [vmem:[#allocation2 + $0x2d0] sm:$0xff] %vm687_vm2, %v5670_v32  ;;  %v1036_v25 = vmax.f32 %v971_v31, %v5679_v43  ;;  %v5693_v51 = vmax.f32 %v1034_v17, %v5679_v43  ;;  %v1027_v52 = vmax.f32 %v5417_v4, %v5467_v15  ;;  %v5707_v59 = vld [vmem:[#allocation2 + $0x288] sm:$0xff] }
 0x130   : > { %4546 = vmatprep.mubr.msk.f32.mxu0 %vm687_vm2, %v5653_v30  ;;  %v5674_v44 = vmax.f32 %v1307_v47, %v1339_v9  ;;  %2053 = vst.msk [vmem:[#allocation2 + $0x148] sm:$0xff] %vm687_vm2, %v5653_v30  ;;  %v1244_v40 = vmax.f32 %v1180_v54, %v1212_v62  ;;  %v1213_v21 = vld [vmem:[#allocation2 + $0x16f] sm:$0xff]  ;;  %1120 = vst.msk [vmem:[#allocation2 + $0x1a8] sm:$0xff] %vm687_vm2, %v5662_v36  ;;  %4632 = vmatprep.mubr.msk.f32.mxu1 %vm687_vm2, %v5665_v12  ;;  %v654_v17 = vmul.f32 0.1, %v5600_v39 }
 0x131   : > { %v1276_v54 = vld [vmem:[#allocation2 + $0x169] sm:$0xff]  ;;  %v1245_v31 = vmax.f32 %v1181_v29, %v1213_v21  ;;  %v909_v10 = vmax.f32 %v5592_v20, %v5630_v42  ;;  %1122 = vst.msk [vmem:[#allocation2 + $0x1c8] sm:$0xff] %vm687_vm2, %v5685_v34  ;;  %v1277_v15 = vld [vmem:[#allocation2 + $0x171] sm:$0xff]  ;;  %1131 = vst.msk [vmem:[#allocation2 + $0x250] sm:$0xff] %vm687_vm2, %v5693_v51  ;;  %v5717_v46 = vmax.f32 %v1036_v25, %v5681_v6  ;;  %4633 = vmatmul.mubr.msk.f32.gmra.mrb[12].mxu1 %vm687_vm2, %v5670_v32 }
 0x132   : > { %4547 = vmatmul.mubr.msk.f32.gmra.mrb[36].mxu0 %vm687_vm2, %v5674_v44  ;;  %2054 = vst.msk [vmem:[#allocation2 + $0x150] sm:$0xff] %vm687_vm2, %v5674_v44  ;;  %v1150_v9 = vld [vmem:[#allocation2 + $0x186] sm:$0xff]  ;;  %v1308_v4 = vmax.f32 %v1244_v40, %v1276_v54  ;;  %v1151_v47 = vld [vmem:[#allocation2 + $0x18e] sm:$0xff]  ;;  %v5720_v20 = vmax.f32 %v1027_v52, %v5500_v0  ;;  %vm622_vm7 = vcmp.gt.f32.partialorder %v5600_v39, 0.0 }
 0x133   : > { %v1182_v41 = vmax.f32 %v5620_v2, %v1150_v9  ;;  %7333 = vst [vmem:[#allocation19_spill] sm:$0xff] %v5717_v46  ;;  %v5722_v57 = vld [vmem:[#allocation2 + $0x2a8] sm:$0xff]  ;;  %v1309_v62 = vmax.f32 %v1245_v31, %v1277_v15  ;;  %v1183_v40 = vmax.f32 %v5340_v19, %v1151_v47  ;;  %v910_v2 = vmax.f32 %v5603_v55, %v5617_v28  ;;  %v1341_v25 = vld [vmem:[#allocation2 + $0x172] sm:$0xff] }
 0x134   : > { %v1340_v1 = vld [vmem:[#allocation2 + $0x16a] sm:$0xff]  ;;  %v5733_v9 = vmax.f32 %v909_v10, %v5707_v59  ;;  %1133 = vst.msk [vmem:[#allocation2 + $0x270] sm:$0xff] %vm687_vm2, %v5717_v46  ;;  %1124 = vst.msk [vmem:[#allocation2 + $0x1e8] sm:$0xff] %vm687_vm2, %v5720_v20  ;;  %v685_v19 = vsel %vm621_vm6, %v5606_v26, %v653_v5  ;;  %v1038_v10 = vmax.f32 %v5656_v24, %v5681_v6 }
 0x135   : > { %v1214_v29 = vld [vmem:[#allocation2 + $0x187] sm:$0xff]  ;;  %v5730_v21 = vmax.f32 %v1308_v4, %v1340_v1  ;;  %v1215_v54 = vld [vmem:[#allocation2 + $0x18f] sm:$0xff]  ;;  %v5744_v55 = vmax.f32 %v1309_v62, %v1341_v25  ;;  %848 = vst.msk [vmem:[#allocation2 + $0x2e8] sm:$0xff] %vm687_vm2, %v685_v19  ;;  %v913_v15 = vmax.f32 %v685_v19, %v5722_v57  ;;  %4635 = vmatprep.mubr.msk.f32.mxu1 %vm687_vm2, %v685_v19 }
 0x136   : > { %v1246_v52 = vmax.f32 %v1182_v41, %v1214_v29  ;;  %v5742_v31 = vld [vmem:[#allocation2 + $0x128] sm:$0xff]  ;;  %v1247_v4 = vmax.f32 %v1183_v40, %v1215_v54  ;;  %v2117_v41 = vmax.f32 %v5653_v30, %v5567_v58  ;;  %v2118_v26 = vmax.f32 %v5674_v44, %v5571_v8  ;;  %v1279_v24 = vld [vmem:[#allocation2 + $0x191] sm:$0xff] }
 0x137   : > { %v1278_v28 = vld [vmem:[#allocation2 + $0x189] sm:$0xff]  ;;  %4549 = vmatprep.mubr.msk.f32.mxu0 %vm687_vm2, %v5730_v21  ;;  %2055 = vst.msk [vmem:[#allocation2 + $0x168] sm:$0xff] %vm687_vm2, %v5730_v21  ;;  %v686_v58 = vsel %vm622_vm7, %v5600_v39, %v654_v17  ;;  %2056 = vst.msk [vmem:[#allocation2 + $0x170] sm:$0xff] %vm687_vm2, %v5744_v55  ;;  %v1343_v44 = vld [vmem:[#allocation2 + $0x192] sm:$0xff]  ;;  %v5773_v29 = vmax.f32 %v910_v2, %v5679_v43 }
 0x138   : > { %v1310_v5 = vmax.f32 %v1246_v52, %v1278_v28  ;;  %v5759_v47 = vld [vmem:[#allocation2 + $0x2d0] sm:$0xff]  ;;  %v5761_v1 = vld [vmem:[#allocation2 + $0x2c8] sm:$0xff]  ;;  %4550 = vmatmul.mubr.msk.f32.gmra.mrb[38].mxu0 %vm687_vm2, %v5744_v55  ;;  %v1311_v30 = vmax.f32 %v1247_v4, %v1279_v24  ;;  %849 = vst.msk [vmem:[#allocation2 + $0x2f0] sm:$0xff] %vm687_vm2, %v686_v58  ;;  %v5781_v39 = vmax.f32 %v2117_v41, %v5742_v31 }
 0x139   : > { %v5763_v62 = vld [vmem:[#allocation2 + $0x308] sm:$0xff]  ;;  %v5776_v25 = vmax.f32 %v1038_v10, %v5759_v47  ;;  %v978_v52 = vmax.f32 %v913_v15, %v5761_v1  ;;  %v5784_v17 = vmax.f32 %v2118_v26, %v5624_v37  ;;  %v5786_v54 = vld [vmem:[#allocation2 + $0x150] sm:$0xff]  ;;  %4636 = vmatmul.mubr.msk.f32.gmra.mrb[14].mxu1 %vm687_vm2, %v686_v58  ;;  %v7335_v10 = vmax.f32 %v5514_v50, %v5624_v37 }
 0x13a   : > { %v1342_v8 = vld [vmem:[#allocation2 + $0x18a] sm:$0xff]  ;;  %v5798_v41 = vmax.f32 %v1311_v30, %v1343_v44 }
 0x13b   : > { %v1152_v40 = vld [vmem:[#allocation2 + $0x1a6] sm:$0xff]  ;;  %7334 = vst [vmem:[#allocation20_spill] sm:$0xff] %v5776_v25  ;;  %v5788_v19 = vmax.f32 %v1310_v5, %v1342_v8  ;;  %v1155_v28 = vld [vmem:[#allocation2 + $0x1ce] sm:$0xff]  ;;  %v5796_v15 = vmax.f32 %v7335_v10, %v5786_v54  ;;  %v912_v5 = vmax.f32 %v5670_v32, %v5679_v43  ;;  %1135 = vst.msk [vmem:[#allocation2 + $0x290] sm:$0xff] %vm687_vm2, %v5776_v25 }
 0x13c   : > { %v1154_v2 = vld [vmem:[#allocation2 + $0x1c6] sm:$0xff]  ;;  %v1184_v4 = vmax.f32 %v5662_v36, %v1152_v40  ;;  %v2119_v36 = vmax.f32 %v5730_v21, %v5742_v31  ;;  %v1153_v44 = vld [vmem:[#allocation2 + $0x1ae] sm:$0xff]  ;;  %v1187_v40 = vmax.f32 %v5424_v11, %v1155_v28  ;;  %v2244_v43 = vmax.f32 %v5612_v13, %v5786_v54  ;;  %2058 = vst.msk [vmem:[#allocation2 + $0x190] sm:$0xff] %vm687_vm2, %v5798_v41 }
 0x13d   : > { %v1216_v26 = vld [vmem:[#allocation2 + $0x1a7] sm:$0xff]  ;;  %4552 = vmatprep.mubr.msk.f32.mxu0 %vm687_vm2, %v5788_v19  ;;  %2057 = vst.msk [vmem:[#allocation2 + $0x188] sm:$0xff] %vm687_vm2, %v5788_v19  ;;  %v1186_v50 = vmax.f32 %v5685_v34, %v1154_v2  ;;  %2338 = vst.msk [vmem:[#allocation2 + $0x110] sm:$0xff] %vm687_vm2, %v5796_v15  ;;  %v1219_v34 = vld [vmem:[#allocation2 + $0x1cf] sm:$0xff]  ;;  %v1043_v11 = vmax.f32 %v978_v52, %v5763_v62  ;;  %v914_v28 = vmax.f32 %v686_v58, %v5681_v6 }
 0x13e   : > { %v1248_v8 = vmax.f32 %v1184_v4, %v1216_v26  ;;  %v1280_v30 = vld [vmem:[#allocation2 + $0x1a9] sm:$0xff]  ;;  %4553 = vmatmul.mubr.msk.f32.gmra.mrb[40].mxu0 %vm687_vm2, %v5798_v41  ;;  %v1185_v4 = vmax.f32 %v5381_v61, %v1153_v44  ;;  %v1251_v63 = vmax.f32 %v1187_v40, %v1219_v34 }
 0x13f   : > { %v1076_v32 = vld [vmem:[#allocation2 + $0x328] sm:$0xff]  ;;  %v979_v58 = vmax.f32 %v914_v28, %v5759_v47  ;;  %v5832_v44 = vld [vmem:[#allocation2 + $0x170] sm:$0xff] }
 0x140   : > { %v1218_v21 = vld [vmem:[#allocation2 + $0x1c7] sm:$0xff]  ;;  %v1312_v26 = vmax.f32 %v1248_v8, %v1280_v30  ;;  %v1217_v18 = vld [vmem:[#allocation2 + $0x1af] sm:$0xff]  ;;  %v5829_v52 = vmax.f32 %v1043_v11, %v1076_v32  ;;  %v977_v30 = vmax.f32 %v912_v5, %v5681_v6  ;;  %v2246_v6 = vmax.f32 %v5784_v17, %v5832_v44 }
 0x141   : > { %v1157_v2 = vld [vmem:[#allocation2 + $0x1ee] sm:$0xff]  ;;  %v1250_v13 = vmax.f32 %v1186_v50, %v1218_v21  ;;  %v1156_v53 = vld [vmem:[#allocation2 + $0x1e6] sm:$0xff]  ;;  %v1249_v46 = vmax.f32 %v1185_v4, %v1217_v18  ;;  %v5845_v18 = vmax.f32 %v2244_v43, %v5832_v44  ;;  %v1044_v11 = vmax.f32 %v979_v58, %v1012_v56 }
 0x142   : > { %v5825_v10 = vld [vmem:[#allocation2 + $0x148] sm:$0xff]  ;;  %v1189_v24 = vmax.f32 %v5460_v27, %v1157_v2  ;;  %v1188_v61 = vmax.f32 %v5720_v20, %v1156_v53  ;;  %v1010_v21 = vld [vmem:[#allocation2 + $0x2f0] sm:$0xff]  ;;  %v2120_v53 = vmax.f32 %v5744_v55, %v5624_v37  ;;  %v2122_v58 = vmax.f32 %v5798_v41, %v5786_v54 }
 0x143   : > { %v1282_v45 = vld [vmem:[#allocation2 + $0x1c9] sm:$0xff]  ;;  %v5840_v34 = vmax.f32 %v2119_v36, %v5825_v10  ;;  %v1283_v32 = vld [vmem:[#allocation2 + $0x1d1] sm:$0xff]  ;;  %2340 = vst.msk [vmem:[#allocation2 + $0x130] sm:$0xff] %vm687_vm2, %v5845_v18  ;;  %v1042_v4 = vmax.f32 %v977_v30, %v1010_v21 }
 0x144   : > { %v1344_v48 = vld [vmem:[#allocation2 + $0x1aa] sm:$0xff]  ;;  %v1314_v50 = vmax.f32 %v1250_v13, %v1282_v45  ;;  %v1345_v55 = vld [vmem:[#allocation2 + $0x1b2] sm:$0xff]  ;;  %v2186_v41 = vmax.f32 %v2122_v58, %v5832_v44 }
 0x145   : > { %v1221_v25 = vld [vmem:[#allocation2 + $0x1ef] sm:$0xff]  ;;  %v5834_v8 = vmax.f32 %v1312_v26, %v1344_v48  ;;  %v1313_v48 = vmax.f32 %v1249_v46, %v1281_v3  ;;  %v1220_v5 = vld [vmem:[#allocation2 + $0x1e7] sm:$0xff] }
 0x146   : > { %v1253_v27 = vmax.f32 %v1189_v24, %v1221_v25  ;;  %v5837_v40 = vld [vmem:[#allocation2 + $0x2e8] sm:$0xff]  ;;  %v1285_v45 = vld [vmem:[#allocation2 + $0x1f1] sm:$0xff]  ;;  %v1315_v24 = vmax.f32 %v1251_v63, %v1283_v32  ;;  %v1252_v2 = vmax.f32 %v1188_v61, %v1220_v5  ;;  %v2121_v63 = vmax.f32 %v5788_v19, %v5825_v10 }
 0x147   : > { %v1346_v20 = vld [vmem:[#allocation2 + $0x1ca] sm:$0xff]  ;;  %1140 = vst.msk [vmem:[#allocation2 + $0x2e8] sm:$0xff] %vm687_vm2, %v5829_v52  ;;  %4555 = vmatprep.mubr.msk.f32.mxu0 %vm687_vm2, %v5834_v8  ;;  %2059 = vst.msk [vmem:[#allocation2 + $0x1a8] sm:$0xff] %vm687_vm2, %v5834_v8  ;;  %v1347_v46 = vld [vmem:[#allocation2 + $0x1d2] sm:$0xff]  ;;  %v1377_v43 = vmax.f32 %v1313_v48, %v1345_v55  ;;  %v2184_v61 = vmax.f32 %v2120_v53, %v5786_v54  ;;  %v1029_v48 = vmax.f32 %v5480_v7, %v5500_v0 }
 0x148   : > { %v5851_v25 = vmax.f32 %v1314_v50, %v1346_v20  ;;  %v1317_v37 = vmax.f32 %v1253_v27, %v1285_v45  ;;  %v1077_v36 = vld [vmem:[#allocation2 + $0x330] sm:$0xff]  ;;  %v5859_v3 = vld [vmem:[#allocation2 + $0x168] sm:$0xff]  ;;  %v5867_v26 = vmax.f32 %v1315_v24, %v1347_v46  ;;  %v1040_v27 = vmax.f32 %v5773_v29, %v5759_v47 }
 0x149   : > { %v1349_v17 = vld [vmem:[#allocation2 + $0x1f2] sm:$0xff]  ;;  %v1284_v13 = vld [vmem:[#allocation2 + $0x1e9] sm:$0xff]  ;;  %4556 = vmatmul.mubr.msk.f32.gmra.mrb[42].mxu0 %vm687_vm2, %v1377_v43  ;;  %2060 = vst.msk [vmem:[#allocation2 + $0x1b0] sm:$0xff] %vm687_vm2, %v1377_v43  ;;  %v2185_v32 = vmax.f32 %v2121_v63, %v5859_v3  ;;  %v5890_v29 = vmax.f32 %v1042_v4, %v1012_v56  ;;  %v5892_v54 = vmax.f32 %v1044_v11, %v1077_v36 }
 0x14a   : > { %v5863_v28 = vld [vmem:[#allocation2 + $0x190] sm:$0xff]  ;;  %2061 = vst.msk [vmem:[#allocation2 + $0x1c8] sm:$0xff] %vm687_vm2, %v5851_v25  ;;  %v5869_v50 = vmax.f32 %v1317_v37, %v1349_v17  ;;  %v1316_v20 = vmax.f32 %v1252_v2, %v1284_v13  ;;  %2062 = vst.msk [vmem:[#allocation2 + $0x1d0] sm:$0xff] %vm687_vm2, %v5867_v26  ;;  %4558 = vmatprep.mubr.msk.f32.mxu0 %vm687_vm2, %v5851_v25  ;;  %v5888_v47 = vmax.f32 %v1040_v27, %v1010_v21  ;;  %v5897_v53 = vld [vmem:[#allocation2 + $0x188] sm:$0xff] }
 0x14b   : > { %v5877_v19 = vmax.f32 %v2246_v6, %v5863_v28  ;;  %v1348_v30 = vld [vmem:[#allocation2 + $0x1ea] sm:$0xff]  ;;  %v2241_v21 = vmax.f32 %v5463_v33, %v5742_v31  ;;  %v2123_v56 = vmax.f32 %v5834_v8, %v5859_v3  ;;  %1139 = vst.msk [vmem:[#allocation2 + $0x2d0] sm:$0xff] %vm687_vm2, %v5890_v29  ;;  %1141 = vst.msk [vmem:[#allocation2 + $0x2f0] sm:$0xff] %vm687_vm2, %v5892_v54 }
 0x14c   : > { %2064 = vst.msk [vmem:[#allocation2 + $0x1f0] sm:$0xff] %vm687_vm2, %v5869_v50  ;;  %v5899_v45 = vmax.f32 %v1316_v20, %v1348_v30  ;;  %1137 = vst.msk [vmem:[#allocation2 + $0x2b0] sm:$0xff] %vm687_vm2, %v5888_v47  ;;  %v1031_v6 = vmax.f32 %v5517_v23, %v5575_v38  ;;  %v2243_v7 = vmax.f32 %v5609_v49, %v5825_v10 }
 0x14d   : > { %2342 = vst.msk [vmem:[#allocation2 + $0x150] sm:$0xff] %vm687_vm2, %v5877_v19  ;;  %v1033_v33 = vmax.f32 %v5537_v60, %v5630_v42  ;;  %4559 = vmatmul.mubr.msk.f32.gmra.mrb[44].mxu0 %vm687_vm2, %v5867_v26  ;;  %v5926_v31 = vmax.f32 %v1029_v48, %v5575_v38  ;;  %v5929_v8 = vmax.f32 %v2241_v21, %v5825_v10 }
 0x14e   : > { %2063 = vst.msk [vmem:[#allocation2 + $0x1e8] sm:$0xff] %vm687_vm2, %v5899_v45  ;;  %v5921_v0 = vld [vmem:[#allocation2 + $0x1a8] sm:$0xff]  ;;  %v2245_v23 = vmax.f32 %v5781_v39, %v5859_v3  ;;  %v1035_v60 = vmax.f32 %v5615_v22, %v5707_v59  ;;  %v2124_v49 = vmax.f32 %v1377_v43, %v5832_v44  ;;  %4561 = vmatprep.mubr.msk.f32.mxu0 %vm687_vm2, %v5899_v45 }
 0x14f   : > { %v5939_v24 = vmax.f32 %v1031_v6, %v5630_v42  ;;  %v5942_v38 = vmax.f32 %v2243_v7, %v5859_v3  ;;  %v2247_v10 = vmax.f32 %v5840_v34, %v5897_v53  ;;  %v2248_v37 = vmax.f32 %v2184_v61, %v5863_v28  ;;  %1126 = vst.msk [vmem:[#allocation2 + $0x208] sm:$0xff] %vm687_vm2, %v5926_v31  ;;  %v1236_v48 = vld [vmem:[#allocation2 + $0x2e7] sm:$0xff] }
 0x150   : > { %2337 = vst.msk [vmem:[#allocation2 + $0x108] sm:$0xff] %vm687_vm2, %v5929_v8  ;;  %v5954_v22 = vmax.f32 %v1033_v33, %v5707_v59  ;;  %v5957_v42 = vmax.f32 %v2245_v23, %v5897_v53  ;;  %v5960_v44 = vmax.f32 %v1035_v60, %v5722_v57  ;;  %v2188_v34 = vmax.f32 %v2124_v49, %v5863_v28  ;;  %v5963_v55 = vld [vmem:[#allocation2 + $0x1b0] sm:$0xff] }
 0x151   : > { %v5947_v39 = vld [vmem:[#allocation2 + $0x1c8] sm:$0xff]  ;;  %1128 = vst.msk [vmem:[#allocation2 + $0x228] sm:$0xff] %vm687_vm2, %v5939_v24  ;;  %2339 = vst.msk [vmem:[#allocation2 + $0x128] sm:$0xff] %vm687_vm2, %v5942_v38  ;;  %v2249_v5 = vmax.f32 %v2185_v32, %v5921_v0  ;;  %v5971_v36 = vmax.f32 %v2247_v10, %v5921_v0  ;;  %v1037_v3 = vmax.f32 %v5649_v35, %v5722_v57  ;;  %v5976_v17 = vld [vmem:[#allocation2 + $0x1d0] sm:$0xff]  ;;  %4562 = vmatmul.mubr.msk.f32.gmra.mrb[46].mxu0 %vm687_vm2, %v5869_v50 }
 0x152   : > { %v2187_v46 = vmax.f32 %v2123_v56, %v5897_v53  ;;  %v2250_v43 = vmax.f32 %v2186_v41, %v5963_v55  ;;  %v5982_v4 = vmax.f32 %v2248_v37, %v5963_v55  ;;  %v7336_v11 = vmax.f32 %v5665_v12, %v5707_v59  ;;  %1130 = vst.msk [vmem:[#allocation2 + $0x248] sm:$0xff] %vm687_vm2, %v5954_v22  ;;  %v1172_v35 = vld [vmem:[#allocation2 + $0x2e6] sm:$0xff]  ;;  %v1287_v37 = vld [vmem:[#allocation2 + $0x211] sm:$0xff] }
 0x153   : > { %v5979_v2 = vld [vmem:[#allocation2 + $0x1f0] sm:$0xff]  ;;  %2341 = vst.msk [vmem:[#allocation2 + $0x148] sm:$0xff] %vm687_vm2, %v5957_v42  ;;  %1132 = vst.msk [vmem:[#allocation2 + $0x268] sm:$0xff] %vm687_vm2, %v5960_v44  ;;  %v2252_v13 = vmax.f32 %v2188_v34, %v5976_v17  ;;  %v5998_v27 = vmax.f32 %v2249_v5, %v5947_v39  ;;  %v6003_v12 = vmax.f32 %v1037_v3, %v5761_v1 }
 0x154   : > { %v976_v63 = vmax.f32 %v7336_v11, %v5722_v57  ;;  %2343 = vst.msk [vmem:[#allocation2 + $0x168] sm:$0xff] %vm687_vm2, %v5971_v36  ;;  %v1039_v59 = vmax.f32 %v5733_v9, %v5761_v1  ;;  %v2251_v57 = vmax.f32 %v2187_v46, %v5947_v39  ;;  %v6009_v61 = vmax.f32 %v2250_v43, %v5976_v17  ;;  %v1364_v60 = vld [vmem:[#allocation2 + $0x2ea] sm:$0xff] }
 0x155   : > { %2344 = vst.msk [vmem:[#allocation2 + $0x170] sm:$0xff] %vm687_vm2, %v5982_v4  ;;  %v6015_v30 = vmax.f32 %v2252_v13, %v5979_v2  ;;  %v6017_v20 = vld [vmem:[#allocation2 + $0x1e8] sm:$0xff]  ;;  %2345 = vst.msk [vmem:[#allocation2 + $0x188] sm:$0xff] %vm687_vm2, %v5998_v27  ;;  %v1204_v1 = vmax.f32 %v5829_v52, %v1172_v35  ;;  %v2125_v46 = vmax.f32 %v5851_v25, %v5897_v53 }
 0x156   : > { %v1041_v58 = vmax.f32 %v976_v63, %v5837_v40  ;;  %1134 = vst.msk [vmem:[#allocation2 + $0x288] sm:$0xff] %vm687_vm2, %v6003_v12  ;;  %v6024_v9 = vmax.f32 %v1039_v59, %v5837_v40  ;;  %2346 = vst.msk [vmem:[#allocation2 + $0x190] sm:$0xff] %vm687_vm2, %v6009_v61  ;;  %v6030_v32 = vmax.f32 %v2251_v57, %v6017_v20  ;;  %v1158_v21 = vld [vmem:[#allocation2 + $0x206] sm:$0xff]  ;;  %v1159_v56 = vld [vmem:[#allocation2 + $0x20e] sm:$0xff] }
 0x157   : > { %2348 = vst.msk [vmem:[#allocation2 + $0x1b0] sm:$0xff] %vm687_vm2, %v6015_v30  ;;  %v1268_v40 = vmax.f32 %v1204_v1, %v1236_v48  ;;  %v1190_v52 = vmax.f32 %v5926_v31, %v1158_v21  ;;  %v1222_v6 = vld [vmem:[#allocation2 + $0x207] sm:$0xff]  ;;  %v1191_v7 = vmax.f32 %v5558_v14, %v1159_v56  ;;  %v1223_v10 = vld [vmem:[#allocation2 + $0x20f] sm:$0xff]  ;;  %v2126_v59 = vmax.f32 %v5867_v26, %v5863_v28 }
 0x158   : > { %v6033_v41 = vmax.f32 %v1041_v58, %v5763_v62  ;;  %1136 = vst.msk [vmem:[#allocation2 + $0x2a8] sm:$0xff] %vm687_vm2, %v6024_v9  ;;  %2347 = vst.msk [vmem:[#allocation2 + $0x1a8] sm:$0xff] %vm687_vm2, %v6030_v32  ;;  %v1300_v62 = vld [vmem:[#allocation2 + $0x2e9] sm:$0xff]  ;;  %v1351_v58 = vld [vmem:[#allocation2 + $0x212] sm:$0xff]  ;;  %v2127_v25 = vmax.f32 %v5899_v45, %v5921_v0 }
 0x159   : > { %v2369_v33 = vld [vmem:[#allocation2 + $0x106] sm:$0xff]  ;;  %v1332_v23 = vmax.f32 %v1268_v40, %v1300_v62  ;;  %v1254_v49 = vmax.f32 %v1190_v52, %v1222_v6  ;;  %v2370_v31 = vld [vmem:[#allocation2 + $0x10e] sm:$0xff]  ;;  %v1255_v11 = vmax.f32 %v1191_v7, %v1223_v10 }
 0x15a   : > { %1138 = vst.msk [vmem:[#allocation2 + $0x2c8] sm:$0xff] %vm687_vm2, %v6033_v41  ;;  %v2401_v34 = vmax.f32 %v5929_v8, %v2369_v33  ;;  %v6046_v5 = vld [vmem:[#allocation2 + $0x2ee] sm:$0xff]  ;;  %v2402_v14 = vmax.f32 %v5796_v15, %v2370_v31  ;;  %v1160_v35 = vld [vmem:[#allocation2 + $0x226] sm:$0xff] }
 0x15b   : > { %v6048_v3 = vld [vmem:[#allocation2 + $0x2ef] sm:$0xff]  ;;  %v2433_v63 = vld [vmem:[#allocation2 + $0x107] sm:$0xff]  ;;  %v6053_v13 = vmax.f32 %v1332_v23, %v1364_v60  ;;  %v1192_v21 = vmax.f32 %v5939_v24, %v1160_v35  ;;  %v1319_v53 = vmax.f32 %v1255_v11, %v1287_v37 }
 0x15c   : > { %v1286_v43 = vld [vmem:[#allocation2 + $0x209] sm:$0xff]  ;;  %v2465_v1 = vmax.f32 %v2401_v34, %v2433_v63  ;;  %v2498_v7 = vld [vmem:[#allocation2 + $0x111] sm:$0xff] }
 0x15d   : > { %v1318_v8 = vmax.f32 %v1254_v49, %v1286_v43  ;;  %v1350_v57 = vld [vmem:[#allocation2 + $0x20a] sm:$0xff]  ;;  %2079 = vst.msk [vmem:[#allocation2 + $0x2e8] sm:$0xff] %vm687_vm2, %v6053_v13  ;;  %v6066_v45 = vmax.f32 %v1319_v53, %v1351_v58  ;;  %v6070_v43 = vmax.f32 %v2126_v59, %v5963_v55  ;;  %v2562_v11 = vld [vmem:[#allocation2 + $0x112] sm:$0xff]  ;;  %v6089_v53 = vmax.f32 %v2125_v46, %v5921_v0 }
 0x15e   : > { %v2434_v48 = vld [vmem:[#allocation2 + $0x10f] sm:$0xff]  ;;  %v1224_v56 = vld [vmem:[#allocation2 + $0x227] sm:$0xff]  ;;  %v6102_v0 = vmax.f32 %v2127_v25, %v5947_v39 }
 0x15f   : > { %v1161_v40 = vld [vmem:[#allocation2 + $0x22e] sm:$0xff]  ;;  %v2466_v15 = vmax.f32 %v2402_v14, %v2434_v48  ;;  %v2371_v6 = vld [vmem:[#allocation2 + $0x126] sm:$0xff]  ;;  %v6063_v28 = vmax.f32 %v1318_v8, %v1350_v57  ;;  %v1256_v33 = vmax.f32 %v1192_v21, %v1224_v56  ;;  %2066 = vst.msk [vmem:[#allocation2 + $0x210] sm:$0xff] %vm687_vm2, %v6066_v45 }
 0x160   : > { %v2497_v52 = vld [vmem:[#allocation2 + $0x109] sm:$0xff]  ;;  %v1193_v62 = vmax.f32 %v5628_v16, %v1161_v40  ;;  %v2403_v23 = vmax.f32 %v5942_v38, %v2371_v6  ;;  %v1289_v14 = vld [vmem:[#allocation2 + $0x231] sm:$0xff]  ;;  %v1205_v40 = vmax.f32 %v5892_v54, %v6046_v5  ;;  %v2254_v54 = vmax.f32 %v6070_v43, %v5979_v2  ;;  %v4845_v25 = vld [vmem:[%s7295_s3 + $0x6] sm:$0x3] }
 0x161   : > { %v2529_v26 = vmax.f32 %v2465_v1, %v2497_v52  ;;  %v1225_v24 = vld [vmem:[#allocation2 + $0x22f] sm:$0xff]  ;;  %v2530_v10 = vmax.f32 %v2466_v15, %v2498_v7  ;;  %v2435_v16 = vld [vmem:[#allocation2 + $0x127] sm:$0xff]  ;;  %4564 = vmatprep.mubr.msk.f32.mxu0 %vm687_vm2, %v6063_v28  ;;  %2065 = vst.msk [vmem:[#allocation2 + $0x208] sm:$0xff] %vm687_vm2, %v6063_v28  ;;  %v2128_v52 = vmax.f32 %v5869_v50, %v5963_v55 }
 0x162   : > { %v2372_v60 = vld [vmem:[#allocation2 + $0x12e] sm:$0xff]  ;;  %v1257_v34 = vmax.f32 %v1193_v62, %v1225_v24  ;;  %v2467_v35 = vmax.f32 %v2403_v23, %v2435_v16  ;;  %4565 = vmatmul.mubr.msk.f32.gmra.mrb[48].mxu0 %vm687_vm2, %v6066_v45  ;;  %v2373_v46 = vld [vmem:[#allocation2 + $0x146] sm:$0xff] }
 0x163   : > { %v2561_v49 = vld [vmem:[#allocation2 + $0x10a] sm:$0xff]  ;;  %v2404_v31 = vmax.f32 %v5845_v18, %v2372_v60  ;;  %v6084_v59 = vmax.f32 %v2530_v10, %v2562_v11  ;;  %v1353_v1 = vld [vmem:[#allocation2 + $0x232] sm:$0xff]  ;;  %v6113_v24 = vmax.f32 %v2128_v52, %v5976_v17 }
 0x164   : > { %v1288_v37 = vld [vmem:[#allocation2 + $0x229] sm:$0xff]  ;;  %v6076_v38 = vmax.f32 %v2529_v26, %v2561_v49  ;;  %v1321_v58 = vmax.f32 %v1257_v34, %v1289_v14  ;;  %v2500_v6 = vld [vmem:[#allocation2 + $0x131] sm:$0xff] }
 0x165   : > { %v1320_v63 = vmax.f32 %v1256_v33, %v1288_v37  ;;  %v2436_v8 = vld [vmem:[#allocation2 + $0x12f] sm:$0xff]  ;;  %v1162_v26 = vld [vmem:[#allocation2 + $0x246] sm:$0xff]  ;;  %2984 = vst.msk [vmem:[#allocation2 + $0x110] sm:$0xff] %vm687_vm2, %v6084_v59  ;;  %v2253_v33 = vmax.f32 %v6089_v53, %v6017_v20  ;;  %v2129_v37 = vmax.f32 %v6063_v28, %v5947_v39 }
 0x166   : > { %v6082_v18 = vld [vmem:[#allocation2 + $0xc8] sm:$0xff]  ;;  %v2468_v21 = vmax.f32 %v2404_v31, %v2436_v8  ;;  %4640 = vmatprep.mubr.msk.f32.mxu1 %vm687_vm2, %v6076_v38  ;;  %2983 = vst.msk [vmem:[#allocation2 + $0x108] sm:$0xff] %vm687_vm2, %v6076_v38  ;;  %v6108_v50 = vmax.f32 %v1321_v58, %v1353_v1  ;;  %v2564_v60 = vld [vmem:[#allocation2 + $0x132] sm:$0xff]  ;;  %v1194_v16 = vmax.f32 %v5954_v22, %v1162_v26 }
 0x167   : > { %v1352_v57 = vld [vmem:[#allocation2 + $0x22a] sm:$0xff]  ;;  %4641 = vmatmul.mubr.msk.f32.vlgmr.msra.gmra.mrb[16].mxu1 %vm687_vm2, %v6084_v59  ;;  %v6135_v31 = vmax.f32 %v1205_v40, %v6048_v3  ;;  %v3047_v43 = vmax.f32 %v6076_v38, %v6082_v18  ;;  %v2405_v22 = vmax.f32 %v5957_v42, %v2373_v46  ;;  %v2130_v38 = vmax.f32 %v6066_v45, %v5976_v17 }
 0x168   : > { %v2499_v48 = vld [vmem:[#allocation2 + $0x129] sm:$0xff]  ;;  %v6097_v15 = vmax.f32 %v1320_v63, %v1352_v57  ;;  %v2532_v55 = vmax.f32 %v2468_v21, %v2500_v6  ;;  %4689 = vmatpush3.msk.msra.mxu1 %vm1496_vm3, %v4845_v25  ;;  %2068 = vst.msk [vmem:[#allocation2 + $0x230] sm:$0xff] %vm687_vm2, %v6108_v50  ;;  %v6159_v42 = vmax.f32 %v2129_v37, %v6017_v20  ;;  %v1291_v1 = vld [vmem:[#allocation2 + $0x251] sm:$0xff]  ;;  %vm4052_vm3 = vcmask 64512  }
 0x169   : > { %v2531_v56 = vmax.f32 %v2467_v35, %v2499_v48  ;;  %v2563_v62 = vld [vmem:[#allocation2 + $0x12a] sm:$0xff]  ;;  %v6164_v40 = vmax.f32 %v2130_v38, %v5979_v2  ;;  %v1355_v37 = vld [vmem:[#allocation2 + $0x252] sm:$0xff] }
 0x16a   : > { %v1163_v5 = vld [vmem:[#allocation2 + $0x24e] sm:$0xff]  ;;  %4567 = vmatprep.mubr.msk.f32.mxu0 %vm687_vm2, %v6097_v15  ;;  %2067 = vst.msk [vmem:[#allocation2 + $0x228] sm:$0xff] %vm687_vm2, %v6097_v15  ;;  %v1164_v49 = vld [vmem:[#allocation2 + $0x266] sm:$0xff]  ;;  %v6131_v34 = vmax.f32 %v2532_v55, %v2564_v60 }
 0x16b   : > { %v2374_v7 = vld [vmem:[#allocation2 + $0x14e] sm:$0xff]  ;;  %v6123_v23 = vmax.f32 %v2531_v56, %v2563_v62  ;;  %4568 = vmatmul.mubr.msk.f32.gmra.mrb[50].mxu0 %vm687_vm2, %v6108_v50  ;;  %v1195_v28 = vmax.f32 %v5693_v51, %v1163_v5  ;;  %v1196_v57 = vmax.f32 %v5960_v44, %v1164_v49  ;;  %v7337_v51 = vld [vmem:[#allocation19_spill] sm:$0xff] }
 0x16c   : > { %v1165_v10 = vld [vmem:[#allocation2 + $0x26e] sm:$0xff]  ;;  %v2406_v3 = vmax.f32 %v5877_v19, %v2374_v7  ;;  %2986 = vst.msk [vmem:[#allocation2 + $0x130] sm:$0xff] %vm687_vm2, %v6131_v34 }
 0x16d   : > { %v6139_v11 = vld [vmem:[#allocation2 + $0xe8] sm:$0xff]  ;;  %v6141_v63 = vld [vmem:[#allocation2 + $0xd0] sm:$0xff]  ;;  %4643 = vmatprep.mubr.msk.f32.mxu1 %vm687_vm2, %v6123_v23  ;;  %2985 = vst.msk [vmem:[#allocation2 + $0x128] sm:$0xff] %vm687_vm2, %v6123_v23  ;;  %v1197_v58 = vmax.f32 %v7337_v51, %v1165_v10 }
 0x16e   : > { %v1226_v39 = vld [vmem:[#allocation2 + $0x247] sm:$0xff]  ;;  %4644 = vmatmul.mubr.msk.f32.gmra.mrb[18].mxu1 %vm687_vm2, %v6131_v34  ;;  %v1227_v35 = vld [vmem:[#allocation2 + $0x24f] sm:$0xff]  ;;  %v3048_v44 = vmax.f32 %v6084_v59, %v6141_v63  ;;  %v6172_v5 = vmax.f32 %v3047_v43, %v6139_v11 }
 0x16f   : > { %v1258_v14 = vmax.f32 %v1194_v16, %v1226_v39  ;;  %v2437_v8 = vld [vmem:[#allocation2 + $0x147] sm:$0xff]  ;;  %v2438_v18 = vld [vmem:[#allocation2 + $0x14f] sm:$0xff]  ;;  %v1259_v45 = vmax.f32 %v1195_v28, %v1227_v35  ;;  %v2131_v28 = vmax.f32 %v6097_v15, %v6017_v20 }
 0x170   : > { %v6161_v19 = vld [vmem:[#allocation2 + $0x210] sm:$0xff]  ;;  %v2469_v48 = vmax.f32 %v2405_v22, %v2437_v8  ;;  %v2470_v21 = vmax.f32 %v2406_v3, %v2438_v18  ;;  %v1228_v60 = vld [vmem:[#allocation2 + $0x267] sm:$0xff]  ;;  %v2132_v18 = vmax.f32 %v6108_v50, %v5979_v2  ;;  %v3049_v2 = vmax.f32 %v6123_v23, %v6139_v11 }
 0x171   : > { %v1290_v17 = vld [vmem:[#allocation2 + $0x249] sm:$0xff]  ;;  %v6167_v52 = vmax.f32 %v2254_v54, %v6161_v19  ;;  %v2502_v55 = vld [vmem:[#allocation2 + $0x151] sm:$0xff]  ;;  %v1323_v46 = vmax.f32 %v1259_v45, %v1291_v1  ;;  %v2256_v59 = vmax.f32 %v6113_v24, %v6161_v19  ;;  %v1260_v39 = vmax.f32 %v1196_v57, %v1228_v60 }
 0x172   : > { %v3080_v56 = vld [vmem:[#allocation2 + $0xf0] sm:$0xff]  ;;  %v1322_v62 = vmax.f32 %v1258_v14, %v1290_v17  ;;  %v2534_v25 = vmax.f32 %v2470_v21, %v2502_v55  ;;  %v2375_v10 = vld [vmem:[#allocation2 + $0x166] sm:$0xff]  ;;  %v6225_v11 = vmax.f32 %v2132_v18, %v6161_v19 }
 0x173   : > { %v1354_v6 = vld [vmem:[#allocation2 + $0x24a] sm:$0xff]  ;;  %2350 = vst.msk [vmem:[#allocation2 + $0x1d0] sm:$0xff] %vm687_vm2, %v6167_v52  ;;  %v2566_v63 = vld [vmem:[#allocation2 + $0x152] sm:$0xff]  ;;  %v6186_v38 = vmax.f32 %v1323_v46, %v1355_v37  ;;  %v2407_v45 = vmax.f32 %v5971_v36, %v2375_v10  ;;  %v6206_v1 = vmax.f32 %v3048_v44, %v3080_v56  ;;  %v3050_v50 = vmax.f32 %v6131_v34, %v3080_v56 }
 0x174   : > { %v2501_v26 = vld [vmem:[#allocation2 + $0x149] sm:$0xff]  ;;  %v6178_v54 = vmax.f32 %v1322_v62, %v1354_v6  ;;  %v6190_v35 = vmax.f32 %v2534_v25, %v2566_v63  ;;  %v1293_v8 = vld [vmem:[#allocation2 + $0x271] sm:$0xff] }
 0x175   : > { %v2533_v7 = vmax.f32 %v2469_v48, %v2501_v26  ;;  %v1229_v49 = vld [vmem:[#allocation2 + $0x26f] sm:$0xff]  ;;  %v2377_v17 = vld [vmem:[#allocation2 + $0x186] sm:$0xff]  ;;  %2070 = vst.msk [vmem:[#allocation2 + $0x250] sm:$0xff] %vm687_vm2, %v6186_v38 }
 0x176   : > { %v2565_v16 = vld [vmem:[#allocation2 + $0x14a] sm:$0xff]  ;;  %v1261_v43 = vmax.f32 %v1197_v58, %v1229_v49  ;;  %4570 = vmatprep.mubr.msk.f32.mxu0 %vm687_vm2, %v6178_v54  ;;  %2069 = vst.msk [vmem:[#allocation2 + $0x248] sm:$0xff] %vm687_vm2, %v6178_v54  ;;  %v1357_v48 = vld [vmem:[#allocation2 + $0x272] sm:$0xff]  ;;  %v2409_v25 = vmax.f32 %v5998_v27, %v2377_v17 }
 0x177   : > { %v6182_v22 = vld [vmem:[#allocation2 + $0x208] sm:$0xff]  ;;  %v6184_v3 = vld [vmem:[#allocation2 + $0x230] sm:$0xff]  ;;  %v6188_v14 = vmax.f32 %v2533_v7, %v2565_v16  ;;  %4571 = vmatmul.mubr.msk.f32.gmra.mrb[52].mxu0 %vm687_vm2, %v6186_v38  ;;  %2988 = vst.msk [vmem:[#allocation2 + $0x150] sm:$0xff] %vm687_vm2, %v6190_v35 }
 0x178   : > { %v1292_v24 = vld [vmem:[#allocation2 + $0x269] sm:$0xff]  ;;  %v6195_v57 = vmax.f32 %v2256_v59, %v6184_v3  ;;  %v6222_v34 = vmax.f32 %v2131_v28, %v6182_v22  ;;  %v1325_v44 = vmax.f32 %v1261_v43, %v1293_v8  ;;  %v2258_v26 = vmax.f32 %v6164_v40, %v6184_v3 }
 0x179   : > { %v6197_v51 = vld [vmem:[#allocation2 + $0x108] sm:$0xff]  ;;  %v6199_v15 = vld [vmem:[#allocation2 + $0x110] sm:$0xff]  ;;  %v1324_v58 = vmax.f32 %v1260_v39, %v1292_v24  ;;  %4646 = vmatprep.mubr.msk.f32.mxu1 %vm687_vm2, %v6188_v14  ;;  %2987 = vst.msk [vmem:[#allocation2 + $0x148] sm:$0xff] %vm687_vm2, %v6188_v14  ;;  %v2133_v10 = vmax.f32 %v6178_v54, %v6182_v22 }
 0x17a   : > { %v1356_v36 = vld [vmem:[#allocation2 + $0x26a] sm:$0xff]  ;;  %2352 = vst.msk [vmem:[#allocation2 + $0x1f0] sm:$0xff] %vm687_vm2, %v6195_v57  ;;  %4647 = vmatmul.mubr.msk.f32.gmra.mrb[20].mxu1 %vm687_vm2, %v6190_v35  ;;  %v6236_v55 = vmax.f32 %v3049_v2, %v6197_v51  ;;  %v6239_v46 = vmax.f32 %v3050_v50, %v6199_v15  ;;  %v6248_v59 = vmax.f32 %v1325_v44, %v1357_v48 }
 0x17b   : > { %v2376_v23 = vld [vmem:[#allocation2 + $0x16e] sm:$0xff]  ;;  %v6231_v21 = vmax.f32 %v1324_v58, %v1356_v36  ;;  %v1166_v6 = vld [vmem:[#allocation2 + $0x286] sm:$0xff] }
 0x17c   : > { %v2378_v56 = vld [vmem:[#allocation2 + $0x18e] sm:$0xff]  ;;  %v2408_v63 = vmax.f32 %v5982_v4, %v2376_v23  ;;  %v1198_v8 = vmax.f32 %v6003_v12, %v1166_v6  ;;  %2072 = vst.msk [vmem:[#allocation2 + $0x270] sm:$0xff] %vm687_vm2, %v6248_v59 }
 0x17d   : > { %v2380_v62 = vld [vmem:[#allocation2 + $0x1ae] sm:$0xff]  ;;  %4573 = vmatprep.mubr.msk.f32.mxu0 %vm687_vm2, %v6231_v21  ;;  %2071 = vst.msk [vmem:[#allocation2 + $0x268] sm:$0xff] %vm687_vm2, %v6231_v21  ;;  %v2410_v28 = vmax.f32 %v6009_v61, %v2378_v56  ;;  %v2134_v56 = vmax.f32 %v6186_v38, %v6161_v19  ;;  %v3052_v19 = vmax.f32 %v6190_v35, %v6199_v15 }
 0x17e   : > { %v6241_v7 = vld [vmem:[#allocation2 + $0x130] sm:$0xff]  ;;  %v2439_v60 = vld [vmem:[#allocation2 + $0x167] sm:$0xff]  ;;  %v2412_v54 = vmax.f32 %v6015_v30, %v2380_v62  ;;  %4574 = vmatmul.mubr.msk.f32.gmra.mrb[54].mxu0 %vm687_vm2, %v6248_v59 }
 0x17f   : > { %v1167_v49 = vld [vmem:[#allocation2 + $0x28e] sm:$0xff]  ;;  %v2471_v16 = vmax.f32 %v2407_v45, %v2439_v60  ;;  %v3176_v18 = vmax.f32 %v6206_v1, %v6241_v7 }
 0x180   : > { %v2441_v40 = vld [vmem:[#allocation2 + $0x187] sm:$0xff]  ;;  %v2442_v37 = vld [vmem:[#allocation2 + $0x18f] sm:$0xff] }
 0x181   : > { %v2473_v39 = vmax.f32 %v2409_v25, %v2441_v40  ;;  %v2503_v27 = vld [vmem:[#allocation2 + $0x169] sm:$0xff]  ;;  %v2474_v12 = vmax.f32 %v2410_v28, %v2442_v37  ;;  %v2504_v23 = vld [vmem:[#allocation2 + $0x171] sm:$0xff]  ;;  %v3051_v37 = vmax.f32 %v6188_v14, %v6197_v51 }
 0x182   : > { %v2505_v43 = vld [vmem:[#allocation2 + $0x189] sm:$0xff]  ;;  %v2535_v4 = vmax.f32 %v2471_v16, %v2503_v27  ;;  %v1295_v16 = vld [vmem:[#allocation2 + $0x291] sm:$0xff] }
 0x183   : > { %v2440_v24 = vld [vmem:[#allocation2 + $0x16f] sm:$0xff]  ;;  %v1230_v2 = vld [vmem:[#allocation2 + $0x287] sm:$0xff]  ;;  %v2537_v36 = vmax.f32 %v2473_v39, %v2505_v43 }
 0x184   : > { %v2567_v58 = vld [vmem:[#allocation2 + $0x16a] sm:$0xff]  ;;  %v2472_v45 = vmax.f32 %v2408_v63, %v2440_v24  ;;  %v1262_v1 = vmax.f32 %v1198_v8, %v1230_v2  ;;  %v2568_v24 = vld [vmem:[#allocation2 + $0x172] sm:$0xff] }
 0x185   : > { %v2444_v17 = vld [vmem:[#allocation2 + $0x1af] sm:$0xff]  ;;  %v6271_v60 = vmax.f32 %v2535_v4, %v2567_v58  ;;  %v2379_v43 = vld [vmem:[#allocation2 + $0x1a6] sm:$0xff] }
 0x186   : > { %v7338_v61 = vld [vmem:[#allocation20_spill] sm:$0xff]  ;;  %v2476_v48 = vmax.f32 %v2412_v54, %v2444_v17  ;;  %v6267_v62 = vld [vmem:[#allocation2 + $0x250] sm:$0xff]  ;;  %v2536_v40 = vmax.f32 %v2472_v45, %v2504_v23  ;;  %v6289_v54 = vmax.f32 %v2134_v56, %v6184_v3 }
 0x187   : > { %v1199_v50 = vmax.f32 %v7338_v61, %v1167_v49  ;;  %v6263_v30 = vld [vmem:[#allocation2 + $0x228] sm:$0xff]  ;;  %v6269_v6 = vld [vmem:[#allocation2 + $0x150] sm:$0xff]  ;;  %v6274_v63 = vmax.f32 %v2258_v26, %v6267_v62  ;;  %4649 = vmatprep.mubr.msk.f32.mxu1 %vm687_vm2, %v6271_v60  ;;  %2989 = vst.msk [vmem:[#allocation2 + $0x168] sm:$0xff] %vm687_vm2, %v6271_v60  ;;  %v2260_v2 = vmax.f32 %v6225_v11, %v6267_v62 }
 0x188   : > { %v1231_v44 = vld [vmem:[#allocation2 + $0x28f] sm:$0xff]  ;;  %v6283_v38 = vmax.f32 %v3176_v18, %v6269_v6  ;;  %v6286_v28 = vmax.f32 %v2133_v10, %v6263_v30  ;;  %v6301_v4 = vmax.f32 %v2536_v40, %v2568_v24  ;;  %v2443_v23 = vld [vmem:[#allocation2 + $0x1a7] sm:$0xff] }
 0x189   : > { %v2569_v25 = vld [vmem:[#allocation2 + $0x18a] sm:$0xff]  ;;  %v1263_v49 = vmax.f32 %v1199_v50, %v1231_v44  ;;  %v1359_v15 = vld [vmem:[#allocation2 + $0x292] sm:$0xff]  ;;  %2354 = vst.msk [vmem:[#allocation2 + $0x210] sm:$0xff] %vm687_vm2, %v6274_v63  ;;  %v2135_v44 = vmax.f32 %v6231_v21, %v6263_v30 }
 0x18a   : > { %v6278_v39 = vld [vmem:[#allocation2 + $0x128] sm:$0xff]  ;;  %v2506_v27 = vld [vmem:[#allocation2 + $0x191] sm:$0xff]  ;;  %v6291_v26 = vmax.f32 %v2537_v36, %v2569_v25  ;;  %3272 = vst.msk [vmem:[#allocation2 + $0x110] sm:$0xff] %vm687_vm2, %v6283_v38  ;;  %4650 = vmatmul.mubr.msk.f32.gmra.mrb[22].mxu1 %vm687_vm2, %v6301_v4  ;;  %2990 = vst.msk [vmem:[#allocation2 + $0x170] sm:$0xff] %vm687_vm2, %v6301_v4 }
 0x18b   : > { %v2508_v14 = vld [vmem:[#allocation2 + $0x1b1] sm:$0xff]  ;;  %v2538_v51 = vmax.f32 %v2474_v12, %v2506_v27  ;;  %v1294_v35 = vld [vmem:[#allocation2 + $0x289] sm:$0xff]  ;;  %v1327_v45 = vmax.f32 %v1263_v49, %v1295_v16  ;;  %v6306_v61 = vmax.f32 %v3051_v37, %v6278_v39  ;;  %v6330_v16 = vmax.f32 %v3052_v19, %v6241_v7 }
 0x18c   : > { %v2540_v10 = vmax.f32 %v2476_v48, %v2508_v14  ;;  %v2570_v8 = vld [vmem:[#allocation2 + $0x192] sm:$0xff]  ;;  %v1326_v58 = vmax.f32 %v1262_v1, %v1294_v35  ;;  %v1358_v17 = vld [vmem:[#allocation2 + $0x28a] sm:$0xff]  ;;  %2991 = vst.msk [vmem:[#allocation2 + $0x188] sm:$0xff] %vm687_vm2, %v6291_v26  ;;  %v2411_v48 = vmax.f32 %v6030_v32, %v2379_v43  ;;  %4652 = vmatprep.mubr.msk.f32.mxu1 %vm687_vm2, %v6291_v26 }
 0x18d   : > { %v2572_v18 = vld [vmem:[#allocation2 + $0x1b2] sm:$0xff]  ;;  %v6308_v50 = vld [vmem:[#allocation2 + $0x248] sm:$0xff]  ;;  %v6312_v12 = vmax.f32 %v2538_v51, %v2570_v8  ;;  %v6327_v40 = vmax.f32 %v1327_v45, %v1359_v15  ;;  %v6345_v14 = vmax.f32 %v2253_v33, %v6182_v22  ;;  %v3178_v51 = vmax.f32 %v6239_v46, %v6269_v6 }
 0x18e   : > { %v2507_v36 = vld [vmem:[#allocation2 + $0x1a9] sm:$0xff]  ;;  %v6319_v11 = vmax.f32 %v2540_v10, %v2572_v18  ;;  %v6325_v25 = vmax.f32 %v1326_v58, %v1358_v17  ;;  %v2475_v43 = vmax.f32 %v2411_v48, %v2443_v23  ;;  %v6350_v24 = vmax.f32 %v2135_v44, %v6308_v50 }
 0x18f   : > { %v1168_v1 = vld [vmem:[#allocation2 + $0x2a6] sm:$0xff]  ;;  %v6317_v56 = vld [vmem:[#allocation2 + $0x270] sm:$0xff]  ;;  %2992 = vst.msk [vmem:[#allocation2 + $0x190] sm:$0xff] %vm687_vm2, %v6312_v12  ;;  %v2136_v35 = vmax.f32 %v6248_v59, %v6184_v3  ;;  %v3053_v15 = vmax.f32 %v6271_v60, %v6278_v39  ;;  %2074 = vst.msk [vmem:[#allocation2 + $0x290] sm:$0xff] %vm687_vm2, %v6327_v40  ;;  %4653 = vmatmul.mubr.msk.f32.gmra.mrb[24].mxu1 %vm687_vm2, %v6312_v12  ;;  %v2255_v10 = vmax.f32 %v6102_v0, %v6182_v22 }
 0x190   : > { %v1169_v32 = vld [vmem:[#allocation2 + $0x2ae] sm:$0xff]  ;;  %v1170_v49 = vld [vmem:[#allocation2 + $0x2c6] sm:$0xff]  ;;  %v6333_v21 = vmax.f32 %v2260_v2, %v6317_v56  ;;  %4576 = vmatprep.mubr.msk.f32.mxu0 %vm687_vm2, %v6325_v25  ;;  %2073 = vst.msk [vmem:[#allocation2 + $0x288] sm:$0xff] %vm687_vm2, %v6325_v25  ;;  %v2539_v20 = vmax.f32 %v2475_v43, %v2507_v36  ;;  %2349 = vst.msk [vmem:[#allocation2 + $0x1c8] sm:$0xff] %vm687_vm2, %v6345_v14  ;;  %v1200_v53 = vmax.f32 %v6024_v9, %v1168_v1 }
 0x191   : > { %v6335_v37 = vld [vmem:[#allocation2 + $0x148] sm:$0xff]  ;;  %4577 = vmatmul.mubr.msk.f32.gmra.mrb[56].mxu0 %vm687_vm2, %v6327_v40  ;;  %v1201_v33 = vmax.f32 %v5888_v47, %v1169_v32  ;;  %v1202_v3 = vmax.f32 %v6033_v41, %v1170_v49  ;;  %v6374_v46 = vmax.f32 %v2136_v35, %v6267_v62  ;;  %v3054_v47 = vmax.f32 %v6301_v4, %v6241_v7  ;;  %v1297_v36 = vld [vmem:[#allocation2 + $0x2b1] sm:$0xff] }
 0x192   : > { %v2571_v27 = vld [vmem:[#allocation2 + $0x1aa] sm:$0xff]  ;;  %2356 = vst.msk [vmem:[#allocation2 + $0x230] sm:$0xff] %vm687_vm2, %v6333_v21  ;;  %v6377_v59 = vmax.f32 %v3053_v15, %v6335_v37  ;;  %v2262_v17 = vmax.f32 %v6289_v54, %v6317_v56  ;;  %v3055_v45 = vmax.f32 %v6291_v26, %v6335_v37  ;;  %v2137_v4 = vmax.f32 %v6325_v25, %v6308_v50  ;;  %v1361_v37 = vld [vmem:[#allocation2 + $0x2b2] sm:$0xff] }
 0x193   : > { %v1171_v19 = vld [vmem:[#allocation2 + $0x2ce] sm:$0xff]  ;;  %2994 = vst.msk [vmem:[#allocation2 + $0x1b0] sm:$0xff] %vm687_vm2, %v6319_v11  ;;  %v6386_v41 = vmax.f32 %v2539_v20, %v2571_v27  ;;  %v3118_v22 = vmax.f32 %v3054_v47, %v6269_v6 }
 0x194   : > { %v1232_v60 = vld [vmem:[#allocation2 + $0x2a7] sm:$0xff]  ;;  %v1233_v39 = vld [vmem:[#allocation2 + $0x2af] sm:$0xff]  ;;  %v1203_v9 = vmax.f32 %v5890_v29, %v1171_v19  ;;  %v6393_v29 = vmax.f32 %v2255_v10, %v6263_v30 }
 0x195   : > { %v1264_v8 = vmax.f32 %v1200_v53, %v1232_v60  ;;  %v1265_v18 = vmax.f32 %v1201_v33, %v1233_v39  ;;  %v1234_v58 = vld [vmem:[#allocation2 + $0x2c7] sm:$0xff]  ;;  %v6396_v7 = vld [vmem:[#allocation2 + $0x170] sm:$0xff]  ;;  %2993 = vst.msk [vmem:[#allocation2 + $0x1a8] sm:$0xff] %vm687_vm2, %v6386_v41  ;;  %4655 = vmatprep.mubr.msk.f32.mxu1 %vm687_vm2, %v6386_v41  ;;  %v3056_v39 = vmax.f32 %v6312_v12, %v6269_v6 }
 0x196   : > { %v1296_v2 = vld [vmem:[#allocation2 + $0x2a9] sm:$0xff]  ;;  %v1266_v48 = vmax.f32 %v1202_v3, %v1234_v58  ;;  %v3180_v32 = vmax.f32 %v6330_v16, %v6396_v7  ;;  %v6411_v49 = vmax.f32 %v3178_v51, %v6396_v7  ;;  %2351 = vst.msk [vmem:[#allocation2 + $0x1e8] sm:$0xff] %vm687_vm2, %v6393_v29  ;;  %4656 = vmatmul.mubr.msk.f32.gmra.mrb[26].mxu1 %vm687_vm2, %v6319_v11  ;;  %v1299_v6 = vld [vmem:[#allocation2 + $0x2d1] sm:$0xff] }
 0x197   : > { %v1298_v0 = vld [vmem:[#allocation2 + $0x2c9] sm:$0xff]  ;;  %v1328_v54 = vmax.f32 %v1264_v8, %v1296_v2  ;;  %v1329_v26 = vmax.f32 %v1265_v18, %v1297_v36  ;;  %v2138_v16 = vmax.f32 %v6327_v40, %v6267_v62  ;;  %v2257_v12 = vmax.f32 %v6159_v42, %v6263_v30 }
 0x198   : > { %v6400_v23 = vld [vmem:[#allocation2 + $0x268] sm:$0xff]  ;;  %v6406_v44 = vld [vmem:[#allocation2 + $0x190] sm:$0xff]  ;;  %v1330_v27 = vmax.f32 %v1266_v48, %v1298_v0  ;;  %3274 = vst.msk [vmem:[#allocation2 + $0x130] sm:$0xff] %vm687_vm2, %v6411_v49 }
 0x199   : > { %v1235_v1 = vld [vmem:[#allocation2 + $0x2cf] sm:$0xff]  ;;  %v3182_v19 = vmax.f32 %v3118_v22, %v6406_v44  ;;  %v6426_v53 = vmax.f32 %v1329_v26, %v1361_v37  ;;  %v6431_v3 = vmax.f32 %v3180_v32, %v6406_v44  ;;  %v6436_v60 = vmax.f32 %v2137_v4, %v6400_v23  ;;  %v2381_v18 = vld [vmem:[#allocation2 + $0x1c6] sm:$0xff] }
 0x19a   : > { %v1360_v25 = vld [vmem:[#allocation2 + $0x2aa] sm:$0xff]  ;;  %v1267_v43 = vmax.f32 %v1203_v9, %v1235_v1  ;;  %v6447_v9 = vmax.f32 %v2138_v16, %v6317_v56  ;;  %v1363_v22 = vld [vmem:[#allocation2 + $0x2d2] sm:$0xff]  ;;  %v6475_v4 = vmax.f32 %v2257_v12, %v6308_v50  ;;  %v2259_v16 = vmax.f32 %v6222_v34, %v6308_v50 }
 0x19b   : > { %v6418_v35 = vld [vmem:[#allocation2 + $0x1b0] sm:$0xff]  ;;  %v3087_v51 = vld [vmem:[#allocation2 + $0x168] sm:$0xff]  ;;  %v6424_v20 = vmax.f32 %v1328_v54, %v1360_v25  ;;  %2076 = vst.msk [vmem:[#allocation2 + $0x2b0] sm:$0xff] %vm687_vm2, %v6426_v53  ;;  %3276 = vst.msk [vmem:[#allocation2 + $0x150] sm:$0xff] %vm687_vm2, %v6431_v3 }
 0x19c   : > { %v6422_v15 = vld [vmem:[#allocation2 + $0x290] sm:$0xff]  ;;  %v6428_v33 = vld [vmem:[#allocation2 + $0x188] sm:$0xff]  ;;  %v6444_v10 = vmax.f32 %v3182_v19, %v6418_v35  ;;  %v3057_v2 = vmax.f32 %v6386_v41, %v3087_v51  ;;  %v1331_v36 = vmax.f32 %v1267_v43, %v1299_v6  ;;  %v6470_v30 = vmax.f32 %v3055_v45, %v3087_v51  ;;  %2353 = vst.msk [vmem:[#allocation2 + $0x208] sm:$0xff] %vm687_vm2, %v6475_v4 }
 0x19d   : > { %v6439_v62 = vmax.f32 %v2262_v17, %v6422_v15  ;;  %v2382_v40 = vld [vmem:[#allocation2 + $0x1ce] sm:$0xff]  ;;  %4579 = vmatprep.mubr.msk.f32.mxu0 %vm687_vm2, %v6424_v20  ;;  %2075 = vst.msk [vmem:[#allocation2 + $0x2a8] sm:$0xff] %vm687_vm2, %v6424_v20  ;;  %v2413_v17 = vmax.f32 %v6345_v14, %v2381_v18  ;;  %v3181_v42 = vmax.f32 %v6377_v59, %v6428_v33 }
 0x19e   : > { %v2414_v47 = vmax.f32 %v6167_v52, %v2382_v40  ;;  %v1362_v8 = vld [vmem:[#allocation2 + $0x2ca] sm:$0xff]  ;;  %4580 = vmatmul.mubr.msk.f32.gmra.mrb[58].mxu0 %vm687_vm2, %v6426_v53  ;;  %3278 = vst.msk [vmem:[#allocation2 + $0x170] sm:$0xff] %vm687_vm2, %v6444_v10  ;;  %v6478_v14 = vmax.f32 %v3056_v39, %v6396_v7  ;;  %v6483_v45 = vmax.f32 %v3057_v2, %v6428_v33  ;;  %v2574_v51 = vld [vmem:[#allocation2 + $0x1d2] sm:$0xff] }
 0x19f   : > { %2358 = vst.msk [vmem:[#allocation2 + $0x250] sm:$0xff] %vm687_vm2, %v6439_v62  ;;  %v2446_v58 = vld [vmem:[#allocation2 + $0x1cf] sm:$0xff]  ;;  %v6464_v52 = vmax.f32 %v1330_v27, %v1362_v8  ;;  %v2445_v0 = vld [vmem:[#allocation2 + $0x1c7] sm:$0xff]  ;;  %v6485_v26 = vmax.f32 %v1331_v36, %v1363_v22  ;;  %v2264_v32 = vmax.f32 %v6374_v46, %v6422_v15  ;;  %v6513_v12 = vmax.f32 %v2259_v16, %v6400_v23 }
 0x1a0   : > { %v2478_v48 = vmax.f32 %v2414_v47, %v2446_v58  ;;  %v2510_v54 = vld [vmem:[#allocation2 + $0x1d1] sm:$0xff]  ;;  %v2477_v41 = vmax.f32 %v2413_v17, %v2445_v0  ;;  %v2509_v25 = vld [vmem:[#allocation2 + $0x1c9] sm:$0xff]  ;;  %v3184_v40 = vmax.f32 %v6478_v14, %v6418_v35  ;;  %v2139_v58 = vmax.f32 %v6424_v20, %v6400_v23 }
 0x1a1   : > { %4582 = vmatprep.mubr.msk.f32.mxu0 %vm687_vm2, %v6464_v52  ;;  %2077 = vst.msk [vmem:[#allocation2 + $0x2c8] sm:$0xff] %vm687_vm2, %v6464_v52  ;;  %v1301_v1 = vld [vmem:[#allocation2 + $0x2f1] sm:$0xff]  ;;  %v6491_v27 = vld [vmem:[#allocation2 + $0x288] sm:$0xff]  ;;  %2078 = vst.msk [vmem:[#allocation2 + $0x2d0] sm:$0xff] %vm687_vm2, %v6485_v26 }
 0x1a2   : > { %v2542_v37 = vmax.f32 %v2478_v48, %v2510_v54  ;;  %v2384_v43 = vld [vmem:[#allocation2 + $0x1ee] sm:$0xff]  ;;  %v1333_v19 = vmax.f32 %v6135_v31, %v1301_v1  ;;  %v2541_v39 = vmax.f32 %v2477_v41, %v2509_v25  ;;  %4583 = vmatmul.mubr.msk.f32.gmra.mrb[60].mxu0 %vm687_vm2, %v6485_v26  ;;  %v2383_v47 = vld [vmem:[#allocation2 + $0x1e6] sm:$0xff]  ;;  %v2261_v31 = vmax.f32 %v6286_v28, %v6400_v23 }
 0x1a3   : > { %v2416_v46 = vmax.f32 %v6195_v57, %v2384_v43  ;;  %v1365_v8 = vld [vmem:[#allocation2 + $0x2f2] sm:$0xff]  ;;  %v2573_v18 = vld [vmem:[#allocation2 + $0x1ca] sm:$0xff]  ;;  %4585 = vmatprep.mubr.msk.f32.mxu0 %vm687_vm2, %v6053_v13  ;;  %v2415_v57 = vmax.f32 %v6393_v29, %v2383_v47  ;;  %v2140_v29 = vmax.f32 %v6426_v53, %v6317_v56  ;;  %v3058_v23 = vmax.f32 %v6319_v11, %v6396_v7 }
 0x1a4   : > { %v6507_v34 = vmax.f32 %v2542_v37, %v2574_v51  ;;  %v2448_v50 = vld [vmem:[#allocation2 + $0x1ef] sm:$0xff]  ;;  %v1397_v6 = vmax.f32 %v1333_v19, %v1365_v8  ;;  %v6519_v28 = vmax.f32 %v2541_v39, %v2573_v18  ;;  %v6522_v48 = vmax.f32 %v2261_v31, %v6491_v27  ;;  %v2447_v20 = vld [vmem:[#allocation2 + $0x1e7] sm:$0xff]  ;;  %2355 = vst.msk [vmem:[#allocation2 + $0x228] sm:$0xff] %vm687_vm2, %v6513_v12 }
 0x1a5   : > { %v2234_v17 = vld [vmem:[#allocation2 + $0x2b0] sm:$0xff]  ;;  %v6517_v2 = vld [vmem:[#allocation2 + $0x2a8] sm:$0xff]  ;;  %v2480_v36 = vmax.f32 %v2416_v46, %v2448_v50  ;;  %v2263_v54 = vmax.f32 %v6350_v24, %v6491_v27  ;;  %v2203_v41 = vmax.f32 %v2139_v58, %v6491_v27  ;;  %v2479_v53 = vmax.f32 %v2415_v57, %v2447_v20  ;;  %v7340_v20 = vld [vmem:[#allocation3_spill] sm:$0xff] }
 0x1a6   : > { %2996 = vst.msk [vmem:[#allocation2 + $0x1d0] sm:$0xff] %vm687_vm2, %v6507_v34  ;;  %v6528_v0 = vmax.f32 %v2264_v32, %v2234_v17  ;;  %v2512_v22 = vld [vmem:[#allocation2 + $0x1f1] sm:$0xff]  ;;  %2080 = vst.msk [vmem:[#allocation2 + $0x2f0] sm:$0xff] %vm687_vm2, %v1397_v6  ;;  %v2266_v1 = vmax.f32 %v6447_v9, %v2234_v17  ;;  %4658 = vmatprep.mubr.msk.f32.mxu1 %vm687_vm2, %v6519_v28  ;;  %v2511_v11 = vld [vmem:[#allocation2 + $0x1e9] sm:$0xff]  ;;  %v2142_v7 = vmax.f32 %v6485_v26, %v6422_v15 }
 0x1a7   : > { %2995 = vst.msk [vmem:[#allocation2 + $0x1c8] sm:$0xff] %vm687_vm2, %v6519_v28  ;;  %v2544_v56 = vmax.f32 %v2480_v36, %v2512_v22  ;;  %2357 = vst.msk [vmem:[#allocation2 + $0x248] sm:$0xff] %vm687_vm2, %v6522_v48  ;;  %v2576_v24 = vld [vmem:[#allocation2 + $0x1f2] sm:$0xff]  ;;  %4659 = vmatmul.mubr.msk.f32.gmra.mrb[28].mxu1 %vm687_vm2, %v6507_v34  ;;  %4586 = vmatmul.mubr.msk.f32.gmra.mrb[62].mxu0 %vm687_vm2, %v1397_v6  ;;  %v2144_v32 = vmax.f32 %v1397_v6, %v2234_v17  ;;  %v6555_v37 = vld [vmem:[#allocation2 + $0x1a8] sm:$0xff] }
 0x1a8   : > { %2360 = vst.msk [vmem:[#allocation2 + $0x270] sm:$0xff] %vm687_vm2, %v6528_v0  ;;  %v2175_v9 = vld [vmem:[#allocation2 + $0x2c8] sm:$0xff]  ;;  %v6553_v25 = vmax.f32 %v2263_v54, %v6517_v2  ;;  %v2204_v43 = vmax.f32 %v2140_v29, %v6422_v15  ;;  %v2141_v19 = vmax.f32 %v6464_v52, %v6491_v27  ;;  %v2543_v26 = vmax.f32 %v2479_v53, %v2511_v11  ;;  %v2236_v8 = vld [vmem:[#allocation2 + $0x2d0] sm:$0xff] }
 0x1a9   : > { %v6560_v16 = vmax.f32 %v2544_v56, %v2576_v24  ;;  %v2386_v51 = vld [vmem:[#allocation2 + $0x20e] sm:$0xff]  ;;  %v2206_v47 = vmax.f32 %v2142_v7, %v2234_v17  ;;  %v2385_v18 = vld [vmem:[#allocation2 + $0x206] sm:$0xff]  ;;  %v2265_v15 = vmax.f32 %v6436_v60, %v6517_v2  ;;  %v2267_v52 = vmax.f32 %v2203_v41, %v2175_v9 }
 0x1aa   : > { %v7339_v39 = vld [vmem:[#allocation4_spill] sm:$0xff]  ;;  %v2418_v31 = vmax.f32 %v6274_v63, %v2386_v51  ;;  %2359 = vst.msk [vmem:[#allocation2 + $0x268] sm:$0xff] %vm687_vm2, %v6553_v25  ;;  %v6572_v27 = vmax.f32 %v3058_v23, %v6406_v44  ;;  %v2268_v50 = vmax.f32 %v2204_v43, %v2236_v8  ;;  %v6574_v57 = vmax.f32 %v2266_v1, %v2236_v8  ;;  %v2514_v36 = vld [vmem:[#allocation2 + $0x211] sm:$0xff] }
 0x1ab   : > { %4590 = vmatprep.mubr.msk.f32.mxu0 %vm687_vm2, %v7339_v39  ;;  %v2575_v46 = vld [vmem:[#allocation2 + $0x1ea] sm:$0xff]  ;;  %v2143_v58 = vmax.f32 %v6053_v13, %v6517_v2  ;;  %v2208_v29 = vmax.f32 %v2144_v32, %v2236_v8  ;;  %v2417_v22 = vmax.f32 %v6475_v4, %v2385_v18  ;;  %v3183_v54 = vmax.f32 %v6470_v30, %v6555_v37  ;;  %v7341_v1 = vld [vmem:[#allocation6_spill] sm:$0xff] }
 0x1ac   : > { %2998 = vst.msk [vmem:[#allocation2 + $0x1f0] sm:$0xff] %vm687_vm2, %v6560_v16  ;;  %v6576_v6 = vmax.f32 %v2543_v26, %v2575_v46  ;;  %v2450_v63 = vld [vmem:[#allocation2 + $0x20f] sm:$0xff]  ;;  %4591 = vmatmul.mubr.msk.f32.vlgmr.msra.gmra.mrb[32].mxu0 %vm687_vm2, %v7340_v20  ;;  %2362 = vst.msk [vmem:[#allocation2 + $0x290] sm:$0xff] %vm687_vm2, %v6574_v57  ;;  %v6599_v56 = vmax.f32 %v2265_v15, %v2175_v9  ;;  %v6611_v24 = vmax.f32 %v2141_v19, %v6517_v2  ;;  %v2449_v26 = vld [vmem:[#allocation2 + $0x207] sm:$0xff] }
 0x1ad   : > { %v2482_v17 = vmax.f32 %v2418_v31, %v2450_v63  ;;  %v6580_v60 = vld [vmem:[#allocation2 + $0x310] sm:$0xff]  ;;  %v6585_v23 = vld [vmem:[#allocation2 + $0x2e8] sm:$0xff]  ;;  %4593 = vmatprep.mubr.msk.f32.mxu0 %vm687_vm2, %v7341_v1  ;;  %v3059_v51 = vmax.f32 %v6519_v28, %v6428_v33  ;;  %v6626_v2 = vmax.f32 %v2143_v58, %v2175_v9 }
 0x1ae   : > { %v6589_v41 = vld [vmem:[#allocation2 + $0x1d0] sm:$0xff]  ;;  %2997 = vst.msk [vmem:[#allocation2 + $0x1e8] sm:$0xff] %vm687_vm2, %v6576_v6  ;;  %4661 = vmatprep.mubr.msk.f32.mxu1 %vm687_vm2, %v6576_v6  ;;  %v6602_v53 = vmax.f32 %v2267_v52, %v6585_v23  ;;  %v2272_v46 = vmax.f32 %v2208_v29, %v6580_v60  ;;  %v2387_v8 = vld [vmem:[#allocation2 + $0x226] sm:$0xff]  ;;  %2361 = vst.msk [vmem:[#allocation2 + $0x288] sm:$0xff] %vm687_vm2, %v6599_v56 }
 0x1af   : > { %v2238_v13 = vld [vmem:[#allocation2 + $0x2f0] sm:$0xff]  ;;  %v6608_v11 = vmax.f32 %v3184_v40, %v6589_v41  ;;  %v2546_v7 = vmax.f32 %v2482_v17, %v2514_v36  ;;  %4662 = vmatmul.mubr.msk.f32.gmra.mrb[30].mxu1 %vm687_vm2, %v6560_v16  ;;  %v2481_v40 = vmax.f32 %v2417_v22, %v2449_v26  ;;  %v6628_v19 = vld [vmem:[#allocation2 + $0x308] sm:$0xff]  ;;  %v3186_v9 = vmax.f32 %v6572_v27, %v6589_v41 }
 0x1b0   : > { %v2388_v4 = vld [vmem:[#allocation2 + $0x22e] sm:$0xff]  ;;  %v2270_v32 = vmax.f32 %v2206_v47, %v2238_v13  ;;  %v6620_v14 = vmax.f32 %v2268_v50, %v2238_v13  ;;  %2363 = vst.msk [vmem:[#allocation2 + $0x2a8] sm:$0xff] %vm687_vm2, %v6602_v53  ;;  %v2419_v36 = vmax.f32 %v6513_v12, %v2387_v8  ;;  %v3060_v27 = vmax.f32 %v6507_v34, %v6406_v44 }
 0x1b1   : > { %v6613_v43 = vld [vmem:[#allocation2 + $0x330] sm:$0xff]  ;;  %3280 = vst.msk [vmem:[#allocation2 + $0x190] sm:$0xff] %vm687_vm2, %v6608_v11  ;;  %v2420_v18 = vmax.f32 %v6333_v21, %v2388_v4  ;;  %v7343_v29 = vld [vmem:[#allocation8_spill] sm:$0xff] }
 0x1b2   : > { %v2578_v39 = vld [vmem:[#allocation2 + $0x212] sm:$0xff]  ;;  %v2513_v47 = vld [vmem:[#allocation2 + $0x209] sm:$0xff]  ;;  %v6635_v28 = vmax.f32 %v2270_v32, %v6580_v60  ;;  %v6643_v63 = vmax.f32 %v2272_v46, %v6613_v43  ;;  %2364 = vst.msk [vmem:[#allocation2 + $0x2b0] sm:$0xff] %vm687_vm2, %v6620_v14  ;;  %v6664_v32 = vmax.f32 %v3059_v51, %v6555_v37 }
 0x1b3   : > { %v6630_v31 = vmax.f32 %v2546_v7, %v2578_v39  ;;  %v2390_v15 = vld [vmem:[#allocation2 + $0x24e] sm:$0xff]  ;;  %v2545_v58 = vmax.f32 %v2481_v40, %v2513_v47  ;;  %v2389_v21 = vld [vmem:[#allocation2 + $0x246] sm:$0xff] }
 0x1b4   : > { %v7342_v52 = vld [vmem:[#allocation5_spill] sm:$0xff]  ;;  %2366 = vst.msk [vmem:[#allocation2 + $0x2d0] sm:$0xff] %vm687_vm2, %v6635_v28  ;;  %v2451_v13 = vld [vmem:[#allocation2 + $0x227] sm:$0xff]  ;;  %v2422_v4 = vmax.f32 %v6439_v62, %v2390_v15  ;;  %v2421_v12 = vmax.f32 %v6522_v48, %v2389_v21  ;;  %2368 = vst.msk [vmem:[#allocation2 + $0x2f0] sm:$0xff] %vm687_vm2, %v6643_v63  ;;  %v3124_v62 = vmax.f32 %v3060_v27, %v6418_v35 }
 0x1b5   : > { %4594 = vmatmul.mubr.msk.f32.gmra.mrb[34].mxu0 %vm687_vm2, %v7342_v52  ;;  %v2577_v50 = vld [vmem:[#allocation2 + $0x20a] sm:$0xff]  ;;  %v2483_v26 = vmax.f32 %v2419_v36, %v2451_v13  ;;  %v2580_v8 = vld [vmem:[#allocation2 + $0x232] sm:$0xff]  ;;  %v7344_v15 = vld [vmem:[#allocation7_spill] sm:$0xff] }
 0x1b6   : > { %v2452_v17 = vld [vmem:[#allocation2 + $0x22f] sm:$0xff]  ;;  %4596 = vmatprep.mubr.msk.f32.mxu0 %vm687_vm2, %v7343_v29  ;;  %3000 = vst.msk [vmem:[#allocation2 + $0x210] sm:$0xff] %vm687_vm2, %v6630_v31  ;;  %v6668_v44 = vmax.f32 %v2545_v58, %v2577_v50  ;;  %v2453_v46 = vld [vmem:[#allocation2 + $0x247] sm:$0xff]  ;;  %v3062_v50 = vmax.f32 %v6560_v16, %v6418_v35  ;;  %v7345_v16 = vld [vmem:[#allocation10_spill] sm:$0xff] }
 0x1b7   : > { %v6650_v22 = vld [vmem:[#allocation2 + $0x1f0] sm:$0xff]  ;;  %v2484_v20 = vmax.f32 %v2420_v18, %v2452_v17  ;;  %v2485_v18 = vmax.f32 %v2421_v12, %v2453_v46  ;;  %v2391_v51 = vld [vmem:[#allocation2 + $0x266] sm:$0xff]  ;;  %v3061_v12 = vmax.f32 %v6576_v6, %v6555_v37 }
 0x1b8   : > { %v2392_v1 = vld [vmem:[#allocation2 + $0x26e] sm:$0xff]  ;;  %v6661_v7 = vmax.f32 %v3186_v9, %v6650_v22  ;;  %v2271_v9 = vmax.f32 %v6626_v2, %v6628_v19  ;;  %2999 = vst.msk [vmem:[#allocation2 + $0x208] sm:$0xff] %vm687_vm2, %v6668_v44  ;;  %4664 = vmatprep.mubr.msk.f32.mxu1 %vm687_vm2, %v6668_v44  ;;  %v3188_v46 = vmax.f32 %v3124_v62, %v6650_v22 }
 0x1b9   : > { %v2516_v34 = vld [vmem:[#allocation2 + $0x231] sm:$0xff]  ;;  %v2515_v40 = vld [vmem:[#allocation2 + $0x229] sm:$0xff]  ;;  %4597 = vmatmul.mubr.msk.f32.gmra.mrb[36].mxu0 %vm687_vm2, %v7344_v15  ;;  %v2424_v29 = vmax.f32 %v6528_v0, %v2392_v1  ;;  %4665 = vmatmul.mubr.msk.f32.gmra.mrb[0].mxu1 %vm687_vm2, %v6630_v31 }
 0x1ba   : > { %v2454_v39 = vld [vmem:[#allocation2 + $0x24f] sm:$0xff]  ;;  %v2548_v48 = vmax.f32 %v2484_v20, %v2516_v34  ;;  %3282 = vst.msk [vmem:[#allocation2 + $0x1b0] sm:$0xff] %vm687_vm2, %v6661_v7  ;;  %v2547_v58 = vmax.f32 %v2483_v26, %v2515_v40  ;;  %4599 = vmatprep.mubr.msk.f32.mxu0 %vm687_vm2, %v7345_v16 }
 0x1bb   : > { %v2486_v47 = vmax.f32 %v2422_v4, %v2454_v39  ;;  %v6673_v52 = vld [vmem:[#allocation2 + $0x1c8] sm:$0xff]  ;;  %v2518_v36 = vld [vmem:[#allocation2 + $0x251] sm:$0xff]  ;;  %v2423_v39 = vmax.f32 %v6553_v25, %v2391_v51 }
 0x1bc   : > { %v2517_v17 = vld [vmem:[#allocation2 + $0x249] sm:$0xff]  ;;  %v6686_v27 = vmax.f32 %v2548_v48, %v2580_v8  ;;  %v2582_v0 = vld [vmem:[#allocation2 + $0x252] sm:$0xff]  ;;  %v3185_v25 = vmax.f32 %v6483_v45, %v6673_v52 }
 0x1bd   : > { %v2579_v21 = vld [vmem:[#allocation2 + $0x22a] sm:$0xff]  ;;  %v2550_v20 = vmax.f32 %v2486_v47, %v2518_v36  ;;  %v2549_v13 = vmax.f32 %v2485_v18, %v2517_v17  ;;  %v2584_v16 = vld [vmem:[#allocation2 + $0x272] sm:$0xff] }
 0x1be   : > { %v2456_v35 = vld [vmem:[#allocation2 + $0x26f] sm:$0xff]  ;;  %v6694_v34 = vmax.f32 %v2547_v58, %v2579_v21  ;;  %3002 = vst.msk [vmem:[#allocation2 + $0x230] sm:$0xff] %vm687_vm2, %v6686_v27  ;;  %v2455_v18 = vld [vmem:[#allocation2 + $0x267] sm:$0xff] }
 0x1bf   : > { %v2394_v4 = vld [vmem:[#allocation2 + $0x28e] sm:$0xff]  ;;  %v2488_v1 = vmax.f32 %v2424_v29, %v2456_v35  ;;  %v6700_v40 = vmax.f32 %v2550_v20, %v2582_v0  ;;  %v2393_v58 = vld [vmem:[#allocation2 + $0x286] sm:$0xff]  ;;  %v2487_v17 = vmax.f32 %v2423_v39, %v2455_v18  ;;  %v3126_v35 = vmax.f32 %v3062_v50, %v6589_v41 }
 0x1c0   : > { %v2581_v26 = vld [vmem:[#allocation2 + $0x24a] sm:$0xff]  ;;  %v2426_v6 = vmax.f32 %v6574_v57, %v2394_v4  ;;  %3001 = vst.msk [vmem:[#allocation2 + $0x228] sm:$0xff] %vm687_vm2, %v6694_v34  ;;  %4667 = vmatprep.mubr.msk.f32.mxu1 %vm687_vm2, %v6694_v34  ;;  %v3064_v0 = vmax.f32 %v6630_v31, %v6589_v41  ;;  %v2425_v39 = vmax.f32 %v6599_v56, %v2393_v58 }
 0x1c1   : > { %v6702_v48 = vmax.f32 %v2549_v13, %v2581_v26  ;;  %v2519_v8 = vld [vmem:[#allocation2 + $0x269] sm:$0xff]  ;;  %v2520_v47 = vld [vmem:[#allocation2 + $0x271] sm:$0xff]  ;;  %v6723_v13 = vmax.f32 %v3061_v12, %v6673_v52  ;;  %3004 = vst.msk [vmem:[#allocation2 + $0x250] sm:$0xff] %vm687_vm2, %v6700_v40  ;;  %4668 = vmatmul.mubr.msk.f32.gmra.mrb[2].mxu1 %vm687_vm2, %v6686_v27  ;;  %v2269_v41 = vmax.f32 %v6611_v24, %v6585_v23 }
 0x1c2   : > { %v7346_v15 = vld [vmem:[#allocation9_spill] sm:$0xff]  ;;  %v2552_v51 = vmax.f32 %v2488_v1, %v2520_v47  ;;  %v7347_v29 = vld [vmem:[#allocation12_spill] sm:$0xff]  ;;  %v2551_v12 = vmax.f32 %v2487_v17, %v2519_v8  ;;  %v3063_v8 = vmax.f32 %v6668_v44, %v6673_v52  ;;  %v3128_v58 = vmax.f32 %v3064_v0, %v6650_v22 }
 0x1c3   : > { %4600 = vmatmul.mubr.msk.f32.gmra.mrb[38].mxu0 %vm687_vm2, %v7346_v15  ;;  %v6709_v62 = vld [vmem:[#allocation2 + $0x210] sm:$0xff]  ;;  %v6717_v21 = vld [vmem:[#allocation2 + $0x1e8] sm:$0xff]  ;;  %3003 = vst.msk [vmem:[#allocation2 + $0x248] sm:$0xff] %vm687_vm2, %v6702_v48  ;;  %4670 = vmatprep.mubr.msk.f32.mxu1 %vm687_vm2, %v6702_v48  ;;  %v7348_v15 = vld [vmem:[#allocation11_spill] sm:$0xff] }
 0x1c4   : > { %v2458_v36 = vld [vmem:[#allocation2 + $0x28f] sm:$0xff]  ;;  %4602 = vmatprep.mubr.msk.f32.mxu0 %vm687_vm2, %v7347_v29  ;;  %v6720_v20 = vmax.f32 %v3188_v46, %v6709_v62  ;;  %v2395_v26 = vld [vmem:[#allocation2 + $0x2a6] sm:$0xff]  ;;  %v6734_v1 = vmax.f32 %v2552_v51, %v2584_v16  ;;  %v3187_v56 = vmax.f32 %v6664_v32, %v6717_v21  ;;  %v3190_v23 = vmax.f32 %v3126_v35, %v6709_v62 }
 0x1c5   : > { %v2396_v57 = vld [vmem:[#allocation2 + $0x2ae] sm:$0xff]  ;;  %v2490_v4 = vmax.f32 %v2426_v6, %v2458_v36  ;;  %v2427_v6 = vmax.f32 %v6602_v53, %v2395_v26  ;;  %v7349_v36 = vld [vmem:[#allocation14_spill] sm:$0xff]  ;;  %4671 = vmatmul.mubr.msk.f32.gmra.mrb[4].mxu1 %vm687_vm2, %v6700_v40  ;;  %v3065_v2 = vmax.f32 %v6694_v34, %v6717_v21 }
 0x1c6   : > { %v2522_v50 = vld [vmem:[#allocation2 + $0x291] sm:$0xff]  ;;  %3284 = vst.msk [vmem:[#allocation2 + $0x1d0] sm:$0xff] %vm687_vm2, %v6720_v20  ;;  %v2428_v18 = vmax.f32 %v6620_v14, %v2396_v57  ;;  %v6747_v31 = vld [vmem:[#allocation2 + $0x328] sm:$0xff] }
 0x1c7   : > { %v2583_v46 = vld [vmem:[#allocation2 + $0x26a] sm:$0xff]  ;;  %v2554_v47 = vmax.f32 %v2490_v4, %v2522_v50  ;;  %4603 = vmatmul.mubr.msk.f32.gmra.mrb[40].mxu0 %vm687_vm2, %v7348_v15  ;;  %v2586_v14 = vld [vmem:[#allocation2 + $0x292] sm:$0xff] }
 0x1c8   : > { %3006 = vst.msk [vmem:[#allocation2 + $0x270] sm:$0xff] %vm687_vm2, %v6734_v1  ;;  %v6756_v53 = vmax.f32 %v2551_v12, %v2583_v46  ;;  %v2457_v51 = vld [vmem:[#allocation2 + $0x287] sm:$0xff]  ;;  %v2460_v17 = vld [vmem:[#allocation2 + $0x2af] sm:$0xff]  ;;  %4605 = vmatprep.mubr.msk.f32.mxu0 %vm687_vm2, %v7349_v36  ;;  %v3066_v12 = vmax.f32 %v6686_v27, %v6650_v22  ;;  %v6774_v46 = vmax.f32 %v2269_v41, %v6628_v19 }
 0x1c9   : > { %v2521_v24 = vld [vmem:[#allocation2 + $0x289] sm:$0xff]  ;;  %v6761_v29 = vmax.f32 %v2554_v47, %v2586_v14  ;;  %v2489_v44 = vmax.f32 %v2425_v39, %v2457_v51  ;;  %v2492_v57 = vmax.f32 %v2428_v18, %v2460_v17  ;;  %v6780_v39 = vmax.f32 %v2271_v9, %v6747_v31  ;;  %v2588_v36 = vld [vmem:[#allocation2 + $0x2b2] sm:$0xff] }
 0x1ca   : > { %v2459_v16 = vld [vmem:[#allocation2 + $0x2a7] sm:$0xff]  ;;  %v3222_v0 = vld [vmem:[#allocation2 + $0x230] sm:$0xff]  ;;  %3005 = vst.msk [vmem:[#allocation2 + $0x268] sm:$0xff] %vm687_vm2, %v6756_v53  ;;  %4673 = vmatprep.mubr.msk.f32.mxu1 %vm687_vm2, %v6756_v53  ;;  %v6785_v22 = vmax.f32 %v3063_v8, %v6717_v21  ;;  %v3130_v9 = vmax.f32 %v3066_v12, %v6709_v62  ;;  %v3068_v8 = vmax.f32 %v6700_v40, %v6709_v62  ;;  %2365 = vst.msk [vmem:[#allocation2 + $0x2c8] sm:$0xff] %vm687_vm2, %v6774_v46 }
 0x1cb   : > { %v3143_v4 = vld [vmem:[#allocation2 + $0x128] sm:$0xff]  ;;  %v2491_v50 = vmax.f32 %v2427_v6, %v2459_v16  ;;  %v6782_v47 = vmax.f32 %v3190_v23, %v3222_v0  ;;  %v3192_v27 = vmax.f32 %v3128_v58, %v3222_v0  ;;  %v2553_v18 = vmax.f32 %v2489_v44, %v2521_v24  ;;  %v2524_v6 = vld [vmem:[#allocation2 + $0x2b1] sm:$0xff]  ;;  %2367 = vst.msk [vmem:[#allocation2 + $0x2e8] sm:$0xff] %vm687_vm2, %v6780_v39 }
 0x1cc   : > { %v6765_v26 = vld [vmem:[#allocation2 + $0x208] sm:$0xff]  ;;  %v7350_v15 = vld [vmem:[#allocation13_spill] sm:$0xff]  ;;  %v2556_v14 = vmax.f32 %v2492_v57, %v2524_v6  ;;  %4674 = vmatmul.mubr.msk.f32.gmra.mrb[6].mxu1 %vm687_vm2, %v6734_v1  ;;  %v3175_v23 = vmax.f32 %v6172_v5, %v3143_v4  ;;  %v3132_v57 = vmax.f32 %v3068_v8, %v3222_v0  ;;  %v3070_v4 = vmax.f32 %v6734_v1, %v3222_v0  ;;  %v7353_v0 = vld [vmem:[#allocation18_spill] sm:$0xff] }
 0x1cd   : > { %v2585_v35 = vld [vmem:[#allocation2 + $0x28a] sm:$0xff]  ;;  %4606 = vmatmul.mubr.msk.f32.gmra.mrb[42].mxu0 %vm687_vm2, %v7350_v15  ;;  %3286 = vst.msk [vmem:[#allocation2 + $0x1f0] sm:$0xff] %vm687_vm2, %v6782_v47  ;;  %v3067_v34 = vmax.f32 %v6702_v48, %v6765_v26 }
 0x1ce   : > { %3008 = vst.msk [vmem:[#allocation2 + $0x290] sm:$0xff] %vm687_vm2, %v6761_v29  ;;  %v6791_v41 = vld [vmem:[#allocation2 + $0x250] sm:$0xff]  ;;  %v7351_v58 = vld [vmem:[#allocation16_spill] sm:$0xff]  ;;  %v6811_v40 = vmax.f32 %v2553_v18, %v2585_v35  ;;  %v6819_v16 = vmax.f32 %v2556_v14, %v2588_v36  ;;  %v7352_v18 = vld [vmem:[#allocation15_spill] sm:$0xff] }
 0x1cf   : > { %4608 = vmatprep.mubr.msk.f32.mxu0 %vm687_vm2, %v7351_v58  ;;  %v3207_v51 = vld [vmem:[#allocation2 + $0x148] sm:$0xff]  ;;  %v6805_v17 = vmax.f32 %v3192_v27, %v6791_v41  ;;  %v3194_v44 = vmax.f32 %v3130_v9, %v6791_v41  ;;  %v6823_v35 = vld [vmem:[#allocation2 + $0x270] sm:$0xff]  ;;  %v3129_v9 = vmax.f32 %v3065_v2, %v6765_v26  ;;  %v3134_v2 = vmax.f32 %v3070_v4, %v6791_v41 }
 0x1d0   : > { %v2523_v62 = vld [vmem:[#allocation2 + $0x2a9] sm:$0xff]  ;;  %3007 = vst.msk [vmem:[#allocation2 + $0x288] sm:$0xff] %vm687_vm2, %v6811_v40  ;;  %4676 = vmatprep.mubr.msk.f32.mxu1 %vm687_vm2, %v6811_v40  ;;  %v3177_v15 = vmax.f32 %v6236_v55, %v3207_v51  ;;  %v3196_v14 = vmax.f32 %v3132_v57, %v6823_v35 }
 0x1d1   : > { %v6816_v24 = vld [vmem:[#allocation2 + $0x228] sm:$0xff]  ;;  %v2555_v12 = vmax.f32 %v2491_v50, %v2523_v62  ;;  %3288 = vst.msk [vmem:[#allocation2 + $0x210] sm:$0xff] %vm687_vm2, %v6805_v17  ;;  %4609 = vmatmul.mubr.msk.f32.gmra.mrb[44].mxu0 %vm687_vm2, %v7352_v18  ;;  %v6834_v50 = vmax.f32 %v3175_v23, %v3207_v51  ;;  %v6839_v8 = vmax.f32 %v3194_v44, %v6823_v35  ;;  %v7354_v4 = vld [vmem:[#allocation17_spill] sm:$0xff] }
 0x1d2   : > { %v3209_v27 = vld [vmem:[#allocation2 + $0x168] sm:$0xff]  ;;  %4611 = vmatprep.mubr.msk.f32.mxu0 %vm687_vm2, %v7353_v0  ;;  %v6849_v62 = vmax.f32 %v3067_v34, %v6816_v24  ;;  %4677 = vmatmul.mubr.msk.f32.gmra.mrb[8].mxu1 %vm687_vm2, %v6761_v29  ;;  %v3189_v44 = vmax.f32 %v6723_v13, %v6765_v26  ;;  %v3191_v34 = vmax.f32 %v6785_v22, %v6816_v24 }
 0x1d3   : > { %v3213_v6 = vld [vmem:[#allocation2 + $0x1a8] sm:$0xff]  ;;  %3271 = vst.msk [vmem:[#allocation2 + $0x108] sm:$0xff] %vm687_vm2, %v6834_v50  ;;  %v6858_v51 = vmax.f32 %v3177_v15, %v3209_v27  ;;  %v3179_v36 = vmax.f32 %v6306_v61, %v3209_v27  ;;  %3290 = vst.msk [vmem:[#allocation2 + $0x230] sm:$0xff] %vm687_vm2, %v6839_v8 }
 0x1d4   : > { %v6821_v48 = vld [vmem:[#allocation2 + $0x248] sm:$0xff]  ;;  %v6877_v61 = vmax.f32 %v3181_v42, %v3213_v6  ;;  %v6903_v6 = vmax.f32 %v3185_v25, %v6717_v21  ;;  %v6919_v45 = vmax.f32 %v3189_v44, %v6816_v24 }
 0x1d5   : > { %v2587_v5 = vld [vmem:[#allocation2 + $0x2aa] sm:$0xff]  ;;  %v3193_v57 = vmax.f32 %v3129_v9, %v6821_v48  ;;  %4612 = vmatmul.mubr.msk.f32.gmra.mrb[46].mxu0 %vm687_vm2, %v7354_v4  ;;  %3273 = vst.msk [vmem:[#allocation2 + $0x128] sm:$0xff] %vm687_vm2, %v6858_v51 }
 0x1d6   : > { %3010 = vst.msk [vmem:[#allocation2 + $0x2b0] sm:$0xff] %vm687_vm2, %v6819_v16  ;;  %v6844_v1 = vmax.f32 %v2555_v12, %v2587_v5  ;;  %v3211_v58 = vld [vmem:[#allocation2 + $0x188] sm:$0xff]  ;;  %v6866_v12 = vld [vmem:[#allocation2 + $0x290] sm:$0xff]  ;;  %3277 = vst.msk [vmem:[#allocation2 + $0x168] sm:$0xff] %vm687_vm2, %v6877_v61 }
 0x1d7   : > { %v6851_v55 = vld [vmem:[#allocation2 + $0x268] sm:$0xff]  ;;  %v6882_v22 = vmax.f32 %v3196_v14, %v6866_v12  ;;  %v3198_v27 = vmax.f32 %v3134_v2, %v6866_v12  ;;  %v6889_v18 = vmax.f32 %v3179_v36, %v3211_v58  ;;  %v2526_v9 = vld [vmem:[#allocation2 + $0x2d1] sm:$0xff]  ;;  %3281 = vst.msk [vmem:[#allocation2 + $0x1a8] sm:$0xff] %vm687_vm2, %v6903_v6  ;;  %3285 = vst.msk [vmem:[#allocation2 + $0x1e8] sm:$0xff] %vm687_vm2, %v6919_v45 }
 0x1d8   : > { %v3215_v23 = vld [vmem:[#allocation2 + $0x1c8] sm:$0xff]  ;;  %3009 = vst.msk [vmem:[#allocation2 + $0x2a8] sm:$0xff] %vm687_vm2, %v6844_v1  ;;  %4679 = vmatprep.mubr.msk.f32.mxu1 %vm687_vm2, %v6844_v1  ;;  %v3195_v13 = vmax.f32 %v6849_v62, %v6851_v55  ;;  %v6925_v32 = vmax.f32 %v3193_v57, %v6851_v55  ;;  %v2590_v14 = vld [vmem:[#allocation2 + $0x2d2] sm:$0xff] }
 0x1d9   : > { %v2398_v5 = vld [vmem:[#allocation2 + $0x2ce] sm:$0xff]  ;;  %v2397_v33 = vld [vmem:[#allocation2 + $0x2c6] sm:$0xff]  ;;  %v6897_v42 = vmax.f32 %v3183_v54, %v3215_v23  ;;  %3292 = vst.msk [vmem:[#allocation2 + $0x250] sm:$0xff] %vm687_vm2, %v6882_v22  ;;  %4680 = vmatmul.mubr.msk.f32.gmra.mrb[10].mxu1 %vm687_vm2, %v6819_v16  ;;  %3275 = vst.msk [vmem:[#allocation2 + $0x148] sm:$0xff] %vm687_vm2, %v6889_v18  ;;  %v6922_v54 = vmax.f32 %v3191_v34, %v6821_v48 }
 0x1da   : > { %v2430_v59 = vmax.f32 %v6635_v28, %v2398_v5  ;;  %v6909_v28 = vmax.f32 %v3187_v56, %v6765_v26  ;;  %v2462_v15 = vld [vmem:[#allocation2 + $0x2cf] sm:$0xff]  ;;  %v2429_v30 = vmax.f32 %v6774_v46, %v2397_v33  ;;  %v2399_v37 = vld [vmem:[#allocation2 + $0x2e6] sm:$0xff]  ;;  %3289 = vst.msk [vmem:[#allocation2 + $0x228] sm:$0xff] %vm687_vm2, %v6925_v32 }
 0x1db   : > { %v6927_v52 = vld [vmem:[#allocation2 + $0x288] sm:$0xff]  ;;  %v2431_v56 = vmax.f32 %v6780_v39, %v2399_v37  ;;  %3279 = vst.msk [vmem:[#allocation2 + $0x188] sm:$0xff] %vm687_vm2, %v6897_v42  ;;  %3287 = vst.msk [vmem:[#allocation2 + $0x208] sm:$0xff] %vm687_vm2, %v6922_v54  ;;  %v2528_v4 = vld [vmem:[#allocation2 + $0x2f1] sm:$0xff] }
 0x1dc   : > { %v2494_v25 = vmax.f32 %v2430_v59, %v2462_v15  ;;  %v2461_v21 = vld [vmem:[#allocation2 + $0x2c7] sm:$0xff]  ;;  %3283 = vst.msk [vmem:[#allocation2 + $0x1c8] sm:$0xff] %vm687_vm2, %v6909_v28  ;;  %v2464_v44 = vld [vmem:[#allocation2 + $0x2ef] sm:$0xff]  ;;  %v6950_v15 = vmax.f32 %v3195_v13, %v6927_v52 }
 0x1dd   : > { %v2400_v26 = vld [vmem:[#allocation2 + $0x2ee] sm:$0xff]  ;;  %v2493_v0 = vmax.f32 %v2429_v30, %v2461_v21  ;;  %v3303_v34 = vld [vmem:[#allocation2 + $0x106] sm:$0xff] }
 0x1de   : > { %v6936_v46 = vld [vmem:[#allocation2 + $0x2b0] sm:$0xff]  ;;  %v2463_v58 = vld [vmem:[#allocation2 + $0x2e7] sm:$0xff]  ;;  %v2432_v62 = vmax.f32 %v6643_v63, %v2400_v26  ;;  %v2558_v36 = vmax.f32 %v2494_v25, %v2526_v9  ;;  %v3335_v59 = vmax.f32 %v6834_v50, %v3303_v34  ;;  %3291 = vst.msk [vmem:[#allocation2 + $0x248] sm:$0xff] %vm687_vm2, %v6950_v15 }
 0x1df   : > { %v6946_v39 = vmax.f32 %v3198_v27, %v6936_v46  ;;  %v2525_v2 = vld [vmem:[#allocation2 + $0x2c9] sm:$0xff]  ;;  %v2495_v23 = vmax.f32 %v2431_v56, %v2463_v58  ;;  %v3074_v27 = vmax.f32 %v6819_v16, %v6823_v35  ;;  %v3072_v16 = vmax.f32 %v6761_v29, %v6791_v41 }
 0x1e0   : > { %v2557_v57 = vmax.f32 %v2493_v0, %v2525_v2  ;;  %v2527_v5 = vld [vmem:[#allocation2 + $0x2e9] sm:$0xff]  ;;  %v2496_v63 = vmax.f32 %v2432_v62, %v2464_v44  ;;  %v2622_v37 = vmax.f32 %v2558_v36, %v2590_v14 }
 0x1e1   : > { %v3304_v33 = vld [vmem:[#allocation2 + $0x10e] sm:$0xff]  ;;  %3294 = vst.msk [vmem:[#allocation2 + $0x270] sm:$0xff] %vm687_vm2, %v6946_v39  ;;  %v2559_v9 = vmax.f32 %v2495_v23, %v2527_v5  ;;  %v3305_v56 = vld [vmem:[#allocation2 + $0x126] sm:$0xff]  ;;  %v3136_v29 = vmax.f32 %v3072_v16, %v6823_v35 }
 0x1e2   : > { %v2589_v30 = vld [vmem:[#allocation2 + $0x2ca] sm:$0xff]  ;;  %v3336_v21 = vmax.f32 %v6283_v38, %v3304_v33  ;;  %v2560_v0 = vmax.f32 %v2496_v63, %v2528_v4  ;;  %v3337_v62 = vmax.f32 %v6858_v51, %v3305_v56  ;;  %v2592_v38 = vld [vmem:[#allocation2 + $0x2f2] sm:$0xff]  ;;  %v3076_v41 = vmax.f32 %v2622_v37, %v6866_v12 }
 0x1e3   : > { %v3367_v25 = vld [vmem:[#allocation2 + $0x107] sm:$0xff]  ;;  %v6957_v26 = vmax.f32 %v2557_v57, %v2589_v30  ;;  %v3368_v13 = vld [vmem:[#allocation2 + $0x10f] sm:$0xff]  ;;  %3012 = vst.msk [vmem:[#allocation2 + $0x2d0] sm:$0xff] %vm687_vm2, %v2622_v37  ;;  %v3138_v30 = vmax.f32 %v3074_v27, %v6866_v12 }
 0x1e4   : > { %v2591_v50 = vld [vmem:[#allocation2 + $0x2ea] sm:$0xff]  ;;  %v3399_v58 = vmax.f32 %v3335_v59, %v3367_v25  ;;  %v3400_v23 = vmax.f32 %v3336_v21, %v3368_v13  ;;  %v2624_v51 = vmax.f32 %v2560_v0, %v2592_v38  ;;  %v3200_v21 = vmax.f32 %v3136_v29, %v6936_v46 }
 0x1e5   : > { %v3306_v14 = vld [vmem:[#allocation2 + $0x12e] sm:$0xff]  ;;  %v6965_v2 = vmax.f32 %v2559_v9, %v2591_v50  ;;  %3011 = vst.msk [vmem:[#allocation2 + $0x2c8] sm:$0xff] %vm687_vm2, %v6957_v26  ;;  %4682 = vmatprep.mubr.msk.f32.mxu1 %vm687_vm2, %v6957_v26  ;;  %v3307_v63 = vld [vmem:[#allocation2 + $0x146] sm:$0xff]  ;;  %v3140_v38 = vmax.f32 %v3076_v41, %v6936_v46 }
 0x1e6   : > { %v3431_v36 = vld [vmem:[#allocation2 + $0x109] sm:$0xff]  ;;  %v3338_v34 = vmax.f32 %v6411_v49, %v3306_v14  ;;  %4683 = vmatmul.mubr.msk.f32.gmra.mrb[12].mxu1 %vm687_vm2, %v2622_v37  ;;  %v3432_v49 = vld [vmem:[#allocation2 + $0x111] sm:$0xff]  ;;  %3014 = vst.msk [vmem:[#allocation2 + $0x2f0] sm:$0xff] %vm687_vm2, %v2624_v51  ;;  %v3078_v37 = vmax.f32 %v2624_v51, %v6936_v46  ;;  %v3339_v50 = vmax.f32 %v6889_v18, %v3307_v63 }
 0x1e7   : > { %v3369_v44 = vld [vmem:[#allocation2 + $0x127] sm:$0xff]  ;;  %v3463_v57 = vmax.f32 %v3399_v58, %v3431_v36  ;;  %3013 = vst.msk [vmem:[#allocation2 + $0x2e8] sm:$0xff] %vm687_vm2, %v6965_v2  ;;  %v3370_v59 = vld [vmem:[#allocation2 + $0x12f] sm:$0xff]  ;;  %4685 = vmatprep.mubr.msk.f32.mxu1 %vm687_vm2, %v6965_v2  ;;  %v3464_v25 = vmax.f32 %v3400_v23, %v3432_v49 }
 0x1e8   : > { %v3401_v5 = vmax.f32 %v3337_v62, %v3369_v44  ;;  %v3308_v4 = vld [vmem:[#allocation2 + $0x14e] sm:$0xff]  ;;  %v3309_v33 = vld [vmem:[#allocation2 + $0x166] sm:$0xff]  ;;  %v3402_v35 = vmax.f32 %v3338_v34, %v3370_v59 }
 0x1e9   : > { %v3495_v9 = vld [vmem:[#allocation2 + $0x10a] sm:$0xff]  ;;  %v3340_v0 = vmax.f32 %v6431_v3, %v3308_v4  ;;  %v3341_v14 = vmax.f32 %v6877_v61, %v3309_v33  ;;  %v3496_v36 = vld [vmem:[#allocation2 + $0x112] sm:$0xff]  ;;  %v3069_v33 = vmax.f32 %v6756_v53, %v6816_v24 }
 0x1ea   : > { %v3433_v56 = vld [vmem:[#allocation2 + $0x129] sm:$0xff]  ;;  %v3527_v12 = vmax.f32 %v3463_v57, %v3495_v9  ;;  %4686 = vmatmul.mubr.msk.f32.gmra.mrb[14].mxu1 %vm687_vm2, %v2624_v51  ;;  %v3434_v23 = vld [vmem:[#allocation2 + $0x131] sm:$0xff]  ;;  %v3528_v3 = vmax.f32 %v3464_v25, %v3496_v36 }
 0x1eb   : > { %v3310_v58 = vld [vmem:[#allocation2 + $0x16e] sm:$0xff]  ;;  %v3311_v13 = vld [vmem:[#allocation2 + $0x186] sm:$0xff]  ;;  %v3465_v27 = vmax.f32 %v3401_v5, %v3433_v56  ;;  %v3466_v63 = vmax.f32 %v3402_v35, %v3434_v23  ;;  %v3071_v35 = vmax.f32 %v6811_v40, %v6821_v48 }
 0x1ec   : > { %v3371_v62 = vld [vmem:[#allocation2 + $0x147] sm:$0xff]  ;;  %v3232_v34 = vld [vmem:[#allocation2 + $0x2d0] sm:$0xff]  ;;  %4690 = vmatprep.mubr.msk.f32.mxu1 %vm687_vm2, %v3527_v12  ;;  %v3342_v5 = vmax.f32 %v6444_v10, %v3310_v58  ;;  %v3343_v61 = vmax.f32 %v6897_v42, %v3311_v13  ;;  %v3073_v10 = vmax.f32 %v6844_v1, %v6851_v55 }
 0x1ed   : > { %v6986_v16 = vld [vmem:[#allocation2 + $0x2a8] sm:$0xff]  ;;  %v3403_v44 = vmax.f32 %v3339_v50, %v3371_v62  ;;  %v6993_v4 = vmax.f32 %v3200_v21, %v3232_v34  ;;  %v3202_v29 = vmax.f32 %v3138_v30, %v3232_v34  ;;  %v3142_v46 = vmax.f32 %v3078_v37, %v3232_v34  ;;  %v3172_v30 = vld [vmem:[#allocation2 + $0x2f0] sm:$0xff] }
 0x1ee   : > { %v3497_v18 = vld [vmem:[#allocation2 + $0x12a] sm:$0xff]  ;;  %v3077_v42 = vmax.f32 %v6965_v2, %v6986_v16  ;;  %4691 = vmatmul.mubr.msk.f32.vlgmr.msra.gmra.mrb[16].mxu1 %vm687_vm2, %v3528_v3  ;;  %v3498_v53 = vld [vmem:[#allocation2 + $0x132] sm:$0xff]  ;;  %v3204_v37 = vmax.f32 %v3140_v38, %v3172_v30 }
 0x1ef   : > { %v3372_v57 = vld [vmem:[#allocation2 + $0x14f] sm:$0xff]  ;;  %v3373_v49 = vld [vmem:[#allocation2 + $0x167] sm:$0xff]  ;;  %v3529_v9 = vmax.f32 %v3465_v27, %v3497_v18  ;;  %3296 = vst.msk [vmem:[#allocation2 + $0x290] sm:$0xff] %vm687_vm2, %v6993_v4  ;;  %v3206_v21 = vmax.f32 %v3142_v46, %v6580_v60  ;;  %v7007_v50 = vmax.f32 %v3202_v29, %v3172_v30  ;;  %v3530_v40 = vmax.f32 %v3466_v63, %v3498_v53 }
 0x1f0   : > { %v3435_v41 = vld [vmem:[#allocation2 + $0x149] sm:$0xff]  ;;  %v3404_v51 = vmax.f32 %v3340_v0, %v3372_v57  ;;  %v3405_v56 = vmax.f32 %v3341_v14, %v3373_v49  ;;  %v3436_v1 = vld [vmem:[#allocation2 + $0x151] sm:$0xff]  ;;  %v3135_v57 = vmax.f32 %v3071_v35, %v6851_v55 }
 0x1f1   : > { %v3312_v59 = vld [vmem:[#allocation2 + $0x18e] sm:$0xff]  ;;  %v3467_v25 = vmax.f32 %v3403_v44, %v3435_v41  ;;  %v3313_v24 = vld [vmem:[#allocation2 + $0x1a6] sm:$0xff]  ;;  %4693 = vmatprep.mubr.msk.f32.mxu1 %vm687_vm2, %v3529_v9  ;;  %v7012_v2 = vmax.f32 %v3206_v21, %v6613_v43  ;;  %3298 = vst.msk [vmem:[#allocation2 + $0x2b0] sm:$0xff] %vm687_vm2, %v7007_v50 }
 0x1f2   : > { %v3374_v0 = vld [vmem:[#allocation2 + $0x16f] sm:$0xff]  ;;  %v3375_v58 = vld [vmem:[#allocation2 + $0x187] sm:$0xff]  ;;  %v3344_v13 = vmax.f32 %v6608_v11, %v3312_v59  ;;  %v3468_v60 = vmax.f32 %v3404_v51, %v3436_v1  ;;  %v3345_v34 = vmax.f32 %v6903_v6, %v3313_v24  ;;  %v3133_v11 = vmax.f32 %v3069_v33, %v6821_v48  ;;  %4694 = vmatmul.mubr.msk.f32.gmra.mrb[18].mxu1 %vm687_vm2, %v3530_v40 }
 0x1f3   : > { %v3499_v12 = vld [vmem:[#allocation2 + $0x14a] sm:$0xff]  ;;  %v3406_v62 = vmax.f32 %v3342_v5, %v3374_v0  ;;  %v3407_v14 = vmax.f32 %v3343_v61, %v3375_v58  ;;  %3302 = vst.msk [vmem:[#allocation2 + $0x2f0] sm:$0xff] %vm687_vm2, %v7012_v2  ;;  %v3500_v18 = vld [vmem:[#allocation2 + $0x152] sm:$0xff]  ;;  %v7027_v5 = vmax.f32 %v3073_v10, %v6927_v52  ;;  %v3075_v6 = vmax.f32 %v6957_v26, %v6927_v52 }
 0x1f4   : > { %v3437_v27 = vld [vmem:[#allocation2 + $0x169] sm:$0xff]  ;;  %v3531_v23 = vmax.f32 %v3467_v25, %v3499_v12  ;;  %v3438_v29 = vld [vmem:[#allocation2 + $0x171] sm:$0xff]  ;;  %v3532_v41 = vmax.f32 %v3468_v60, %v3500_v18  ;;  %v3197_v10 = vmax.f32 %v3133_v11, %v6927_v52 }
 0x1f5   : > { %v4846_v36 = vld [vmem:[#allocation2 + $0x310] sm:$0xff]  ;;  %v3469_v44 = vmax.f32 %v3405_v56, %v3437_v27  ;;  %v7020_v43 = vld [vmem:[#allocation2 + $0x2c8] sm:$0xff]  ;;  %v3470_v51 = vmax.f32 %v3406_v62, %v3438_v29  ;;  %v3139_v53 = vmax.f32 %v3075_v6, %v6986_v16 }
 0x1f6   : > { %v7014_v38 = vmax.f32 %v3204_v37, %v4846_v36  ;;  %v3314_v3 = vld [vmem:[#allocation2 + $0x1ae] sm:$0xff]  ;;  %v3315_v63 = vld [vmem:[#allocation2 + $0x1c6] sm:$0xff]  ;;  %v3141_v61 = vmax.f32 %v3077_v42, %v7020_v43  ;;  %4696 = vmatprep.mubr.msk.f32.mxu1 %vm687_vm2, %v3531_v23  ;;  %v3199_v42 = vmax.f32 %v3135_v57, %v6986_v16 }
 0x1f7   : > { %v3501_v48 = vld [vmem:[#allocation2 + $0x16a] sm:$0xff]  ;;  %v3346_v33 = vmax.f32 %v6661_v7, %v3314_v3  ;;  %v3347_v35 = vmax.f32 %v6909_v28, %v3315_v63  ;;  %4697 = vmatmul.mubr.msk.f32.gmra.mrb[20].mxu1 %vm687_vm2, %v3532_v41  ;;  %v3502_v30 = vld [vmem:[#allocation2 + $0x172] sm:$0xff]  ;;  %v3201_v28 = vmax.f32 %v7027_v5, %v7020_v43 }
 0x1f8   : > { %3300 = vst.msk [vmem:[#allocation2 + $0x2d0] sm:$0xff] %vm687_vm2, %v7014_v38  ;;  %v3376_v46 = vld [vmem:[#allocation2 + $0x18f] sm:$0xff]  ;;  %v3377_v59 = vld [vmem:[#allocation2 + $0x1a7] sm:$0xff]  ;;  %v3533_v25 = vmax.f32 %v3469_v44, %v3501_v48  ;;  %v3205_v24 = vmax.f32 %v3141_v61, %v6628_v19  ;;  %v3534_v52 = vmax.f32 %v3470_v51, %v3502_v30  ;;  %v7052_v44 = vmax.f32 %v3199_v42, %v7020_v43 }
 0x1f9   : > { %v3439_v49 = vld [vmem:[#allocation2 + $0x189] sm:$0xff]  ;;  %v3408_v55 = vmax.f32 %v3344_v13, %v3376_v46  ;;  %v3409_v56 = vmax.f32 %v3345_v34, %v3377_v59  ;;  %v3440_v37 = vld [vmem:[#allocation2 + $0x191] sm:$0xff] }
 0x1fa   : > { %v3316_v9 = vld [vmem:[#allocation2 + $0x1ce] sm:$0xff]  ;;  %v3471_v26 = vmax.f32 %v3407_v14, %v3439_v49  ;;  %v3317_v21 = vld [vmem:[#allocation2 + $0x1e6] sm:$0xff]  ;;  %4699 = vmatprep.mubr.msk.f32.mxu1 %vm687_vm2, %v3533_v25  ;;  %3295 = vst.msk [vmem:[#allocation2 + $0x288] sm:$0xff] %vm687_vm2, %v7052_v44 }
 0x1fb   : > { %v3503_v7 = vld [vmem:[#allocation2 + $0x18a] sm:$0xff]  ;;  %v3348_v1 = vmax.f32 %v6720_v20, %v3316_v9  ;;  %v3472_v0 = vmax.f32 %v3408_v55, %v3440_v37  ;;  %v3349_v19 = vmax.f32 %v6919_v45, %v3317_v21  ;;  %4700 = vmatmul.mubr.msk.f32.gmra.mrb[22].mxu1 %vm687_vm2, %v3534_v52  ;;  %v7049_v20 = vmax.f32 %v3197_v10, %v6986_v16  ;;  %v3504_v3 = vld [vmem:[#allocation2 + $0x192] sm:$0xff] }
 0x1fc   : > { %v3378_v40 = vld [vmem:[#allocation2 + $0x1af] sm:$0xff]  ;;  %v3379_v12 = vld [vmem:[#allocation2 + $0x1c7] sm:$0xff]  ;;  %v3535_v27 = vmax.f32 %v3471_v26, %v3503_v7  ;;  %v7057_v45 = vmax.f32 %v3205_v24, %v6747_v31 }
 0x1fd   : > { %v3441_v58 = vld [vmem:[#allocation2 + $0x1a9] sm:$0xff]  ;;  %v3410_v13 = vmax.f32 %v3346_v33, %v3378_v40  ;;  %v3411_v14 = vmax.f32 %v3347_v35, %v3379_v12  ;;  %v3442_v11 = vld [vmem:[#allocation2 + $0x1b1] sm:$0xff]  ;;  %v3536_v5 = vmax.f32 %v3472_v0, %v3504_v3  ;;  %3293 = vst.msk [vmem:[#allocation2 + $0x268] sm:$0xff] %vm687_vm2, %v7049_v20 }
 0x1fe   : > { %v3318_v60 = vld [vmem:[#allocation2 + $0x1ee] sm:$0xff]  ;;  %v3473_v62 = vmax.f32 %v3409_v56, %v3441_v58  ;;  %v3319_v23 = vld [vmem:[#allocation2 + $0x206] sm:$0xff]  ;;  %4702 = vmatprep.mubr.msk.f32.mxu1 %vm687_vm2, %v3535_v27 }
 0x1ff   : > { %v3380_v36 = vld [vmem:[#allocation2 + $0x1cf] sm:$0xff]  ;;  %v3350_v63 = vmax.f32 %v6782_v47, %v3318_v60  ;;  %v3474_v61 = vmax.f32 %v3410_v13, %v3442_v11  ;;  %v3381_v48 = vld [vmem:[#allocation2 + $0x1e7] sm:$0xff]  ;;  %v3351_v31 = vmax.f32 %v6922_v54, %v3319_v23  ;;  %4703 = vmatmul.mubr.msk.f32.gmra.mrb[24].mxu1 %vm687_vm2, %v3536_v5 }
 0x200   : > { %v3235_v34 = vld [vmem:[#allocation2 + $0x308] sm:$0xff]  ;;  %v3412_v18 = vmax.f32 %v3348_v1, %v3380_v36  ;;  %v3413_v41 = vmax.f32 %v3349_v19, %v3381_v48  ;;  %v3506_v59 = vld [vmem:[#allocation2 + $0x1b2] sm:$0xff] }
 0x201   : > { %v3233_v57 = vld [vmem:[#allocation2 + $0x2e8] sm:$0xff]  ;;  %v3444_v33 = vld [vmem:[#allocation2 + $0x1d1] sm:$0xff]  ;;  %v3538_v25 = vmax.f32 %v3474_v61, %v3506_v59 }
 0x202   : > { %v3505_v6 = vld [vmem:[#allocation2 + $0x1aa] sm:$0xff]  ;;  %v7063_v43 = vmax.f32 %v3201_v28, %v3233_v57  ;;  %v3203_v29 = vmax.f32 %v3139_v53, %v3233_v57  ;;  %3301 = vst.msk [vmem:[#allocation2 + $0x2e8] sm:$0xff] %vm687_vm2, %v7057_v45  ;;  %v3476_v54 = vmax.f32 %v3412_v18, %v3444_v33  ;;  %v3508_v40 = vld [vmem:[#allocation2 + $0x1d2] sm:$0xff] }
 0x203   : > { %v3443_v16 = vld [vmem:[#allocation2 + $0x1c9] sm:$0xff]  ;;  %v3537_v46 = vmax.f32 %v3473_v62, %v3505_v6  ;;  %v3446_v1 = vld [vmem:[#allocation2 + $0x1f1] sm:$0xff] }
 0x204   : > { %v3475_v47 = vmax.f32 %v3411_v14, %v3443_v16  ;;  %v3320_v51 = vld [vmem:[#allocation2 + $0x20e] sm:$0xff]  ;;  %v3321_v49 = vld [vmem:[#allocation2 + $0x226] sm:$0xff]  ;;  %3297 = vst.msk [vmem:[#allocation2 + $0x2a8] sm:$0xff] %vm687_vm2, %v7063_v43  ;;  %v7071_v55 = vmax.f32 %v3203_v29, %v3235_v34  ;;  %v3540_v52 = vmax.f32 %v3476_v54, %v3508_v40 }
 0x205   : > { %4705 = vmatprep.mubr.msk.f32.mxu1 %vm687_vm2, %v3537_v46  ;;  %v3382_v9 = vld [vmem:[#allocation2 + $0x1ef] sm:$0xff]  ;;  %v3383_v10 = vld [vmem:[#allocation2 + $0x207] sm:$0xff]  ;;  %v3352_v42 = vmax.f32 %v6805_v17, %v3320_v51  ;;  %v3353_v24 = vmax.f32 %v6925_v32, %v3321_v49 }
 0x206   : > { %v3507_v26 = vld [vmem:[#allocation2 + $0x1ca] sm:$0xff]  ;;  %v3414_v35 = vmax.f32 %v3350_v63, %v3382_v9  ;;  %3299 = vst.msk [vmem:[#allocation2 + $0x2c8] sm:$0xff] %vm687_vm2, %v7071_v55  ;;  %v3415_v53 = vmax.f32 %v3351_v31, %v3383_v10  ;;  %4706 = vmatmul.mubr.msk.f32.gmra.mrb[26].mxu1 %vm687_vm2, %v3538_v25  ;;  %v3510_v23 = vld [vmem:[#allocation2 + $0x1f2] sm:$0xff] }
 0x207   : > { %v3445_v56 = vld [vmem:[#allocation2 + $0x1e9] sm:$0xff]  ;;  %v3539_v30 = vmax.f32 %v3475_v47, %v3507_v26  ;;  %v3448_v34 = vld [vmem:[#allocation2 + $0x211] sm:$0xff] }
 0x208   : > { %v3477_v21 = vmax.f32 %v3413_v41, %v3445_v56  ;;  %v3322_v7 = vld [vmem:[#allocation2 + $0x22e] sm:$0xff]  ;;  %v3323_v37 = vld [vmem:[#allocation2 + $0x246] sm:$0xff]  ;;  %v3478_v17 = vmax.f32 %v3414_v35, %v3446_v1 }
 0x209   : > { %4708 = vmatprep.mubr.msk.f32.mxu1 %vm687_vm2, %v3539_v30  ;;  %v3384_v28 = vld [vmem:[#allocation2 + $0x20f] sm:$0xff]  ;;  %v3385_v12 = vld [vmem:[#allocation2 + $0x227] sm:$0xff]  ;;  %v3354_v60 = vmax.f32 %v6839_v8, %v3322_v7  ;;  %v3355_v14 = vmax.f32 %v6950_v15, %v3323_v37 }
 0x20a   : > { %v3509_v0 = vld [vmem:[#allocation2 + $0x1ea] sm:$0xff]  ;;  %v3416_v13 = vmax.f32 %v3352_v42, %v3384_v28  ;;  %v3417_v32 = vmax.f32 %v3353_v24, %v3385_v12  ;;  %4709 = vmatmul.mubr.msk.f32.gmra.mrb[28].mxu1 %vm687_vm2, %v3540_v52  ;;  %v3542_v11 = vmax.f32 %v3478_v17, %v3510_v23  ;;  %v3512_v47 = vld [vmem:[#allocation2 + $0x212] sm:$0xff] }
 0x20b   : > { %v3447_v58 = vld [vmem:[#allocation2 + $0x209] sm:$0xff]  ;;  %v3541_v27 = vmax.f32 %v3477_v21, %v3509_v0  ;;  %v3450_v41 = vld [vmem:[#allocation2 + $0x231] sm:$0xff] }
 0x20c   : > { %v3479_v62 = vmax.f32 %v3415_v53, %v3447_v58  ;;  %v3324_v19 = vld [vmem:[#allocation2 + $0x24e] sm:$0xff]  ;;  %v3325_v36 = vld [vmem:[#allocation2 + $0x266] sm:$0xff]  ;;  %v3480_v63 = vmax.f32 %v3416_v13, %v3448_v34 }
 0x20d   : > { %4711 = vmatprep.mubr.msk.f32.mxu1 %vm687_vm2, %v3541_v27  ;;  %v3386_v3 = vld [vmem:[#allocation2 + $0x22f] sm:$0xff]  ;;  %v3387_v8 = vld [vmem:[#allocation2 + $0x247] sm:$0xff]  ;;  %v3356_v6 = vmax.f32 %v6882_v22, %v3324_v19  ;;  %v3357_v48 = vmax.f32 %v7049_v20, %v3325_v36 }
 0x20e   : > { %v3511_v18 = vld [vmem:[#allocation2 + $0x20a] sm:$0xff]  ;;  %v3418_v5 = vmax.f32 %v3354_v60, %v3386_v3  ;;  %v3419_v15 = vmax.f32 %v3355_v14, %v3387_v8  ;;  %4712 = vmatmul.mubr.msk.f32.gmra.mrb[30].mxu1 %vm687_vm2, %v3542_v11  ;;  %v3544_v51 = vmax.f32 %v3480_v63, %v3512_v47  ;;  %v3514_v42 = vld [vmem:[#allocation2 + $0x232] sm:$0xff] }
 0x20f   : > { %v3449_v57 = vld [vmem:[#allocation2 + $0x229] sm:$0xff]  ;;  %v3543_v61 = vmax.f32 %v3479_v62, %v3511_v18  ;;  %v3452_v30 = vld [vmem:[#allocation2 + $0x251] sm:$0xff] }
 0x210   : > { %v3481_v16 = vmax.f32 %v3417_v32, %v3449_v57  ;;  %v3326_v29 = vld [vmem:[#allocation2 + $0x26e] sm:$0xff]  ;;  %v3327_v46 = vld [vmem:[#allocation2 + $0x286] sm:$0xff]  ;;  %v3482_v59 = vmax.f32 %v3418_v5, %v3450_v41 }
 0x211   : > { %4714 = vmatprep.mubr.msk.f32.mxu1 %vm687_vm2, %v3543_v61  ;;  %v3388_v31 = vld [vmem:[#allocation2 + $0x24f] sm:$0xff]  ;;  %v3389_v22 = vld [vmem:[#allocation2 + $0x267] sm:$0xff]  ;;  %v3358_v25 = vmax.f32 %v6946_v39, %v3326_v29  ;;  %v3359_v56 = vmax.f32 %v7052_v44, %v3327_v46 }
 0x212   : > { %v3513_v49 = vld [vmem:[#allocation2 + $0x22a] sm:$0xff]  ;;  %v3420_v9 = vmax.f32 %v3356_v6, %v3388_v31  ;;  %v3421_v20 = vmax.f32 %v3357_v48, %v3389_v22  ;;  %4715 = vmatmul.mubr.msk.f32.gmra.mrb[0].mxu1 %vm687_vm2, %v3544_v51  ;;  %v3546_v53 = vmax.f32 %v3482_v59, %v3514_v42  ;;  %v3516_v13 = vld [vmem:[#allocation2 + $0x252] sm:$0xff] }
 0x213   : > { %v3451_v33 = vld [vmem:[#allocation2 + $0x249] sm:$0xff]  ;;  %v3545_v26 = vmax.f32 %v3481_v16, %v3513_v49  ;;  %v3454_v12 = vld [vmem:[#allocation2 + $0x271] sm:$0xff] }
 0x214   : > { %v3483_v54 = vmax.f32 %v3419_v15, %v3451_v33  ;;  %v3328_v35 = vld [vmem:[#allocation2 + $0x28e] sm:$0xff]  ;;  %v3329_v10 = vld [vmem:[#allocation2 + $0x2a6] sm:$0xff]  ;;  %v3484_v7 = vmax.f32 %v3420_v9, %v3452_v30 }
 0x215   : > { %4717 = vmatprep.mubr.msk.f32.mxu1 %vm687_vm2, %v3545_v26  ;;  %v3390_v21 = vld [vmem:[#allocation2 + $0x26f] sm:$0xff]  ;;  %v3391_v39 = vld [vmem:[#allocation2 + $0x287] sm:$0xff]  ;;  %v3360_v1 = vmax.f32 %v6993_v4, %v3328_v35  ;;  %v3361_v0 = vmax.f32 %v7063_v43, %v3329_v10 }
 0x216   : > { %v3515_v24 = vld [vmem:[#allocation2 + $0x24a] sm:$0xff]  ;;  %v3422_v40 = vmax.f32 %v3358_v25, %v3390_v21  ;;  %v3423_v44 = vmax.f32 %v3359_v56, %v3391_v39  ;;  %4718 = vmatmul.mubr.msk.f32.gmra.mrb[2].mxu1 %vm687_vm2, %v3546_v53  ;;  %v3548_v27 = vmax.f32 %v3484_v7, %v3516_v13  ;;  %v3518_v63 = vld [vmem:[#allocation2 + $0x272] sm:$0xff] }
 0x217   : > { %v3453_v37 = vld [vmem:[#allocation2 + $0x269] sm:$0xff]  ;;  %v3547_v28 = vmax.f32 %v3483_v54, %v3515_v24  ;;  %v3456_v57 = vld [vmem:[#allocation2 + $0x291] sm:$0xff] }
 0x218   : > { %v3485_v52 = vmax.f32 %v3421_v20, %v3453_v37  ;;  %v3330_v17 = vld [vmem:[#allocation2 + $0x2ae] sm:$0xff]  ;;  %v3331_v58 = vld [vmem:[#allocation2 + $0x2c6] sm:$0xff]  ;;  %v3486_v32 = vmax.f32 %v3422_v40, %v3454_v12 }
 0x219   : > { %4720 = vmatprep.mubr.msk.f32.mxu1 %vm687_vm2, %v3547_v28  ;;  %v3392_v60 = vld [vmem:[#allocation2 + $0x28f] sm:$0xff]  ;;  %v3393_v4 = vld [vmem:[#allocation2 + $0x2a7] sm:$0xff]  ;;  %v3362_v36 = vmax.f32 %v7007_v50, %v3330_v17  ;;  %v3363_v3 = vmax.f32 %v7071_v55, %v3331_v58 }
 0x21a   : > { %v3517_v62 = vld [vmem:[#allocation2 + $0x26a] sm:$0xff]  ;;  %v3424_v19 = vmax.f32 %v3360_v1, %v3392_v60  ;;  %v3425_v43 = vmax.f32 %v3361_v0, %v3393_v4  ;;  %4721 = vmatmul.mubr.msk.f32.gmra.mrb[4].mxu1 %vm687_vm2, %v3548_v27  ;;  %v3550_v8 = vmax.f32 %v3486_v32, %v3518_v63  ;;  %v3520_v31 = vld [vmem:[#allocation2 + $0x292] sm:$0xff] }
 0x21b   : > { %v3455_v14 = vld [vmem:[#allocation2 + $0x289] sm:$0xff]  ;;  %v3549_v23 = vmax.f32 %v3485_v52, %v3517_v62  ;;  %v3458_v51 = vld [vmem:[#allocation2 + $0x2b1] sm:$0xff] }
 0x21c   : > { %v3487_v34 = vmax.f32 %v3423_v44, %v3455_v14  ;;  %v3332_v11 = vld [vmem:[#allocation2 + $0x2ce] sm:$0xff]  ;;  %v3333_v18 = vld [vmem:[#allocation2 + $0x2e6] sm:$0xff]  ;;  %v3488_v61 = vmax.f32 %v3424_v19, %v3456_v57 }
 0x21d   : > { %4723 = vmatprep.mubr.msk.f32.mxu1 %vm687_vm2, %v3549_v23  ;;  %v3394_v5 = vld [vmem:[#allocation2 + $0x2af] sm:$0xff]  ;;  %v3395_v50 = vld [vmem:[#allocation2 + $0x2c7] sm:$0xff]  ;;  %v3364_v48 = vmax.f32 %v7014_v38, %v3332_v11  ;;  %v3365_v47 = vmax.f32 %v7057_v45, %v3333_v18 }
 0x21e   : > { %v3519_v6 = vld [vmem:[#allocation2 + $0x28a] sm:$0xff]  ;;  %v3426_v15 = vmax.f32 %v3362_v36, %v3394_v5  ;;  %v3427_v55 = vmax.f32 %v3363_v3, %v3395_v50  ;;  %4724 = vmatmul.mubr.msk.f32.gmra.mrb[6].mxu1 %vm687_vm2, %v3550_v8  ;;  %v3552_v59 = vmax.f32 %v3488_v61, %v3520_v31  ;;  %v3522_v45 = vld [vmem:[#allocation2 + $0x2b2] sm:$0xff]  ;;  %v7161_v31 = vld [vmem:[%s7296_s4] ss:$0 sm:$0xff] }
 0x21f   : > { %v3457_v16 = vld [vmem:[#allocation2 + $0x2a9] sm:$0xff]  ;;  %v3551_v29 = vmax.f32 %v3487_v34, %v3519_v6  ;;  %v3460_v35 = vld [vmem:[#allocation2 + $0x2d1] sm:$0xff] }
 0x220   : > { %v3489_v46 = vmax.f32 %v3425_v43, %v3457_v16  ;;  %v3334_v41 = vld [vmem:[#allocation2 + $0x2ee] sm:$0xff]  ;;  %v3490_v9 = vmax.f32 %v3426_v15, %v3458_v51 }
 0x221   : > { %4726 = vmatprep.mubr.msk.f32.mxu1 %vm687_vm2, %v3551_v29  ;;  %v3396_v49 = vld [vmem:[#allocation2 + $0x2cf] sm:$0xff]  ;;  %v3397_v26 = vld [vmem:[#allocation2 + $0x2e7] sm:$0xff]  ;;  %v3366_v38 = vmax.f32 %v7012_v2, %v3334_v41 }
 0x222   : > { %v3521_v33 = vld [vmem:[#allocation2 + $0x2aa] sm:$0xff]  ;;  %v3428_v25 = vmax.f32 %v3364_v48, %v3396_v49  ;;  %v3429_v56 = vmax.f32 %v3365_v47, %v3397_v26  ;;  %4727 = vmatmul.mubr.msk.f32.gmra.mrb[8].mxu1 %vm687_vm2, %v3552_v59  ;;  %v3554_v42 = vmax.f32 %v3490_v9, %v3522_v45  ;;  %v3524_v2 = vld [vmem:[#allocation2 + $0x2d2] sm:$0xff] }
 0x223   : > { %v3459_v22 = vld [vmem:[#allocation2 + $0x2c9] sm:$0xff]  ;;  %v3553_v54 = vmax.f32 %v3489_v46, %v3521_v33  ;;  %v3462_v40 = vld [vmem:[#allocation2 + $0x2f1] sm:$0xff] }
 0x224   : > { %v3491_v20 = vmax.f32 %v3427_v55, %v3459_v22  ;;  %v3398_v10 = vld [vmem:[#allocation2 + $0x2ef] sm:$0xff]  ;;  %v3492_v21 = vmax.f32 %v3428_v25, %v3460_v35 }
 0x225   : > { %4729 = vmatprep.mubr.msk.f32.mxu1 %vm687_vm2, %v3553_v54  ;;  %v3523_v30 = vld [vmem:[#allocation2 + $0x2ca] sm:$0xff]  ;;  %v3430_v24 = vmax.f32 %v3366_v38, %v3398_v10  ;;  %v3526_v44 = vld [vmem:[#allocation2 + $0x2f2] sm:$0xff] }
 0x226   : > { %v3461_v53 = vld [vmem:[#allocation2 + $0x2e9] sm:$0xff]  ;;  %v3555_v7 = vmax.f32 %v3491_v20, %v3523_v30  ;;  %4730 = vmatmul.mubr.msk.f32.gmra.mrb[10].mxu1 %vm687_vm2, %v3554_v42  ;;  %v3556_v39 = vmax.f32 %v3492_v21, %v3524_v2 }
 0x227   : > { %v3493_v37 = vmax.f32 %v3429_v56, %v3461_v53  ;;  %v3525_v1 = vld [vmem:[#allocation2 + $0x2ea] sm:$0xff]  ;;  %v3494_v28 = vmax.f32 %v3430_v24, %v3462_v40 }
 0x228   : > { %4732 = vmatprep.mubr.msk.f32.mxu1 %vm687_vm2, %v3555_v7 }
 0x229   : > { %v3557_v52 = vmax.f32 %v3493_v37, %v3525_v1  ;;  %v3558_v0 = vmax.f32 %v3494_v28, %v3526_v44 }
 0x22a   : > { %4733 = vmatmul.mubr.msk.f32.gmra.mrb[12].mxu1 %vm687_vm2, %v3556_v39 }
 0x22b   : > { %4735 = vmatprep.mubr.msk.f32.mxu1 %vm687_vm2, %v3557_v52 }
 0x22e   : > { %4736 = vmatmul.mubr.msk.f32.gmra.mrb[14].mxu1 %vm687_vm2, %v3558_v0 }
 0x235   : > { %v7112_v17 = vpop.f32.mrb[48].mxu0 }
 0x236   : > { %v7114_v58 = vpop.f32.mrb[49].mxu0 }
 0x23e   : > { %v7116_v13 = vpop.f32.mrb[50].mxu0 }
 0x23f   : > { %v7118_v12 = vpop.f32.mrb[51].mxu0 }
 0x24a   : > { %v7120_v60 = vpop.f32.mrb[52].mxu0 }
 0x24b   : > { %v7122_v27 = vpop.f32.mrb[53].mxu0 }
 0x251   : > { %v7124_v62 = vpop.f32.mrb[54].mxu0 }
 0x252   : > { %v7126_v32 = vpop.f32.mrb[55].mxu0 }
 0x264   : > { %v7128_v14 = vpop.f32.mrb[56].mxu0 }
 0x265   : > { %v7130_v19 = vpop.f32.mrb[57].mxu0 }
 0x271   : > { %v7132_v4 = vpop.f32.mrb[58].mxu0 }
 0x272   : > { %v7134_v36 = vpop.f32.mrb[59].mxu0 }
 0x275   : > { %v7136_v23 = vpop.f32.mrb[60].mxu0 }
 0x276   : > { %v7138_v34 = vpop.f32.mrb[61].mxu0 }
 0x27a   : > { %v7140_v43 = vpop.f32.mrb[62].mxu0 }
 0x27b   : > { %v7142_v3 = vpop.f32.mrb[63].mxu0 }
 0x27f   : > { %v4592_v11 = vpop.f32.mrb[32].mxu0 }
 0x280   : > { %v1890_v18 = vpop.f32.mrb[33].mxu0 }
 0x288   : > { %v4595_v63 = vpop.f32.mrb[34].mxu0 }
 0x289   : > { %v1900_v57 = vpop.f32.mrb[35].mxu0 }
 0x28c   : > { %v4598_v5 = vpop.f32.mrb[36].mxu0 }
 0x28d   : > { %v1910_v8 = vpop.f32.mrb[37].mxu0 }
 0x296   : > { %v4601_v6 = vpop.f32.mrb[38].mxu0 }
 0x297   : > { %v1920_v61 = vpop.f32.mrb[39].mxu0 }
 0x29a   : > { %v4604_v16 = vpop.f32.mrb[40].mxu0 }
 0x29b   : > { %v7144_v15 = vpop.f32.mrb[41].mxu0 }
 0x2a0   : > { %v7146_v50 = vpop.f32.mrb[42].mxu0 }
 0x2a1   : > { %v7148_v48 = vpop.f32.mrb[43].mxu0 }
 0x2a4   : > { %v7150_v29 = vpop.f32.mrb[44].mxu0 }
 0x2a5   : > { %v7152_v46 = vpop.f32.mrb[45].mxu0 }
 0x2a8   : > { %v7154_v55 = vpop.f32.mrb[46].mxu0 }
 0x2a9   : > { %v7156_v47 = vpop.f32.mrb[47].mxu0 }
 0x2c1   : > { %v4692_v41 = vpop.f32.mrb[16].mxu1 }
 0x2c2   : > { %v4740_v51 = vadd.f32 %v4692_v41, %v4592_v11  ;;  %v3726_v49 = vpop.f32.mrb[17].mxu1 }
 0x2c3   : > { %v4741_v59 = vadd.f32 %v3726_v49, %v1890_v18 }
 0x2c4   : > { %v3925_v33 = vadd.f32 %v4740_v51, %v7161_v31 }
 0x2c5   : > { %v3924_v9 = vadd.f32 %v4741_v59, %v7161_v31  ;;  %v4695_v22 = vpop.f32.mrb[18].mxu1 }
 0x2c6   : > { %vm3957_vm2 = vcmp.gt.f32.partialorder %v3925_v33, 0.0  ;;  %v3989_v25 = vmul.f32 0.1, %v3925_v33  ;;  %v4742_v26 = vadd.f32 %v4695_v22, %v4595_v63  ;;  %v3736_v38 = vpop.f32.mrb[19].mxu1 }
 0x2c7   : > { %vm3956_vm8 = vcmp.gt.f32.partialorder %v3924_v9, 0.0  ;;  %v3988_v54 = vmul.f32 0.1, %v3924_v9  ;;  %v4743_v20 = vadd.f32 %v3736_v38, %v1900_v57 }
 0x2c8   : > { %v4021_v56 = vsel %vm3957_vm2, %v3925_v33, %v3989_v25  ;;  %v3927_v45 = vadd.f32 %v4742_v26, %v7161_v31 }
 0x2c9   : > { %4054 = vst.msk [vmem:[%s7170_s17 + $0x8] sm:$0xff] %vm4052_vm3, %v4021_v56  ;;  %v4020_v35 = vsel %vm3956_vm8, %v3924_v9, %v3988_v54  ;;  %v3926_v10 = vadd.f32 %v4743_v20, %v7161_v31 }
 0x2ca   : > { %v4698_v42 = vpop.f32.mrb[20].mxu1  ;;  %4053 = vst.msk [vmem:[%s7170_s17] sm:$0xff] %vm4052_vm3, %v4020_v35  ;;  %vm3959_vm9 = vcmp.gt.f32.partialorder %v3927_v45, 0.0  ;;  %v3991_v30 = vmul.f32 0.1, %v3927_v45 }
 0x2cb   : > { %v4744_v21 = vadd.f32 %v4698_v42, %v4598_v5  ;;  %v3746_v53 = vpop.f32.mrb[21].mxu1  ;;  %vm3958_vm10 = vcmp.gt.f32.partialorder %v3926_v10, 0.0  ;;  %v3990_v24 = vmul.f32 0.1, %v3926_v10 }
 0x2cc   : > { %v4745_v7 = vadd.f32 %v3746_v53, %v1910_v8  ;;  %v4023_v37 = vsel %vm3959_vm9, %v3927_v45, %v3991_v30 }
 0x2cd   : > { %v3929_v2 = vadd.f32 %v4744_v21, %v7161_v31  ;;  %4056 = vst.msk [vmem:[%s7170_s17 + $0x18] sm:$0xff] %vm4052_vm3, %v4023_v37  ;;  %v4022_v40 = vsel %vm3958_vm10, %v3926_v10, %v3990_v24 }
 0x2ce   : > { %v3928_v39 = vadd.f32 %v4745_v7, %v7161_v31  ;;  %v4701_v1 = vpop.f32.mrb[22].mxu1  ;;  %4055 = vst.msk [vmem:[%s7170_s17 + $0x10] sm:$0xff] %vm4052_vm3, %v4022_v40 }
 0x2cf   : > { %vm3961_vm11 = vcmp.gt.f32.partialorder %v3929_v2, 0.0  ;;  %v3993_v28 = vmul.f32 0.1, %v3929_v2  ;;  %v4746_v52 = vadd.f32 %v4701_v1, %v4601_v6  ;;  %v3756_v44 = vpop.f32.mrb[23].mxu1 }
 0x2d0   : > { %vm3960_vm12 = vcmp.gt.f32.partialorder %v3928_v39, 0.0  ;;  %v3992_v0 = vmul.f32 0.1, %v3928_v39  ;;  %v4747_v11 = vadd.f32 %v3756_v44, %v1920_v61 }
 0x2d1   : > { %v4025_v18 = vsel %vm3961_vm11, %v3929_v2, %v3993_v28  ;;  %v3931_v63 = vadd.f32 %v4746_v52, %v7161_v31 }
 0x2d2   : > { %4058 = vst.msk [vmem:[%s7170_s17 + $0x28] sm:$0xff] %vm4052_vm3, %v4025_v18  ;;  %v4024_v57 = vsel %vm3960_vm12, %v3928_v39, %v3992_v0  ;;  %v3930_v5 = vadd.f32 %v4747_v11, %v7161_v31  ;;  %v4704_v8 = vpop.f32.mrb[24].mxu1 }
 0x2d3   : > { %4057 = vst.msk [vmem:[%s7170_s17 + $0x20] sm:$0xff] %vm4052_vm3, %v4024_v57  ;;  %vm3963_vm13 = vcmp.gt.f32.partialorder %v3931_v63, 0.0  ;;  %v3995_v41 = vmul.f32 0.1, %v3931_v63  ;;  %v4748_v6 = vadd.f32 %v4704_v8, %v4604_v16  ;;  %v3766_v51 = vpop.f32.mrb[25].mxu1 }
 0x2d4   : > { %vm3962_vm14 = vcmp.gt.f32.partialorder %v3930_v5, 0.0  ;;  %v3994_v49 = vmul.f32 0.1, %v3930_v5  ;;  %v4749_v61 = vadd.f32 %v3766_v51, %v7144_v15 }
 0x2d5   : > { %v4027_v59 = vsel %vm3963_vm13, %v3931_v63, %v3995_v41  ;;  %v3933_v33 = vadd.f32 %v4748_v6, %v7161_v31 }
 0x2d6   : > { %4060 = vst.msk [vmem:[%s7170_s17 + $0x38] sm:$0xff] %vm4052_vm3, %v4027_v59  ;;  %v4026_v9 = vsel %vm3962_vm14, %v3930_v5, %v3994_v49  ;;  %v3932_v22 = vadd.f32 %v4749_v61, %v7161_v31 }
 0x2d7   : > { %4059 = vst.msk [vmem:[%s7170_s17 + $0x30] sm:$0xff] %vm4052_vm3, %v4026_v9  ;;  %vm3965_vm15 = vcmp.gt.f32.partialorder %v3933_v33, 0.0  ;;  %v3997_v16 = vmul.f32 0.1, %v3933_v33 }
 0x2d8   : > { %vm3964_vm0 = vcmp.gt.f32.partialorder %v3932_v22, 0.0  ;;  %v3996_v15 = vmul.f32 0.1, %v3932_v22 }
 0x2d9   : > { %v4707_v25 = vpop.f32.mrb[26].mxu1  ;;  %v4029_v20 = vsel %vm3965_vm15, %v3933_v33, %v3997_v16 }
 0x2da   : > { %v4750_v26 = vadd.f32 %v4707_v25, %v7146_v50  ;;  %v3776_v38 = vpop.f32.mrb[27].mxu1  ;;  %4062 = vst.msk [vmem:[%s7170_s17 + $0x48] sm:$0xff] %vm4052_vm3, %v4029_v20  ;;  %v4028_v45 = vsel %vm3964_vm0, %v3932_v22, %v3996_v15 }
 0x2db   : > { %v4751_v54 = vadd.f32 %v3776_v38, %v7148_v48  ;;  %4061 = vst.msk [vmem:[%s7170_s17 + $0x40] sm:$0xff] %vm4052_vm3, %v4028_v45 }
 0x2dc   : > { %v3935_v56 = vadd.f32 %v4750_v26, %v7161_v31 }
 0x2dd   : > { %v3934_v35 = vadd.f32 %v4751_v54, %v7161_v31  ;;  %v4710_v10 = vpop.f32.mrb[28].mxu1 }
 0x2de   : > { %vm3967_vm1 = vcmp.gt.f32.partialorder %v3935_v56, 0.0  ;;  %v3999_v50 = vmul.f32 0.1, %v3935_v56  ;;  %v4752_v42 = vadd.f32 %v4710_v10, %v7150_v29  ;;  %v3786_v30 = vpop.f32.mrb[29].mxu1 }
 0x2df   : > { %vm3966_vm4 = vcmp.gt.f32.partialorder %v3934_v35, 0.0  ;;  %v3998_v48 = vmul.f32 0.1, %v3934_v35  ;;  %v4753_v21 = vadd.f32 %v3786_v30, %v7152_v46 }
 0x2e0   : > { %v4031_v53 = vsel %vm3967_vm1, %v3935_v56, %v3999_v50  ;;  %v3937_v24 = vadd.f32 %v4752_v42, %v7161_v31 }
 0x2e1   : > { %4064 = vst.msk [vmem:[%s7170_s17 + $0x58] sm:$0xff] %vm4052_vm3, %v4031_v53  ;;  %v4030_v7 = vsel %vm3966_vm4, %v3934_v35, %v3998_v48  ;;  %v3936_v37 = vadd.f32 %v4753_v21, %v7161_v31  ;;  %v4713_v2 = vpop.f32.mrb[30].mxu1 }
 0x2e2   : > { %4063 = vst.msk [vmem:[%s7170_s17 + $0x50] sm:$0xff] %vm4052_vm3, %v4030_v7  ;;  %vm3969_vm5 = vcmp.gt.f32.partialorder %v3937_v24, 0.0  ;;  %v4001_v29 = vmul.f32 0.1, %v3937_v24  ;;  %v4754_v40 = vadd.f32 %v4713_v2, %v7154_v55  ;;  %v3796_v39 = vpop.f32.mrb[31].mxu1 }
 0x2e3   : > { %vm3968_vm6 = vcmp.gt.f32.partialorder %v3936_v37, 0.0  ;;  %v4000_v46 = vmul.f32 0.1, %v3936_v37  ;;  %v4755_v1 = vadd.f32 %v3796_v39, %v7156_v47 }
 0x2e4   : > { %v4033_v28 = vsel %vm3969_vm5, %v3937_v24, %v4001_v29  ;;  %v3939_v52 = vadd.f32 %v4754_v40, %v7161_v31 }
 0x2e5   : > { %4066 = vst.msk [vmem:[%s7170_s17 + $0x68] sm:$0xff] %vm4052_vm3, %v4033_v28  ;;  %v4032_v44 = vsel %vm3968_vm6, %v3936_v37, %v4000_v46  ;;  %v3938_v0 = vadd.f32 %v4755_v1, %v7161_v31  ;;  %v4716_v11 = vpop.f32.mrb[0].mxu1 }
 0x2e6   : > { %4065 = vst.msk [vmem:[%s7170_s17 + $0x60] sm:$0xff] %vm4052_vm3, %v4032_v44  ;;  %vm3971_vm7 = vcmp.gt.f32.partialorder %v3939_v52, 0.0  ;;  %v4003_v55 = vmul.f32 0.1, %v3939_v52  ;;  %v4756_v18 = vadd.f32 %v4716_v11, %v7112_v17  ;;  %v3806_v63 = vpop.f32.mrb[1].mxu1 }
 0x2e7   : > { %vm3970_vm2 = vcmp.gt.f32.partialorder %v3938_v0, 0.0  ;;  %v4002_v47 = vmul.f32 0.1, %v3938_v0  ;;  %v4757_v57 = vadd.f32 %v3806_v63, %v7114_v58 }
 0x2e8   : > { %v4035_v5 = vsel %vm3971_vm7, %v3939_v52, %v4003_v55  ;;  %v3941_v8 = vadd.f32 %v4756_v18, %v7161_v31 }
 0x2e9   : > { %4068 = vst.msk [vmem:[%s7170_s17 + $0x78] sm:$0xff] %vm4052_vm3, %v4035_v5  ;;  %v4034_v41 = vsel %vm3970_vm2, %v3938_v0, %v4002_v47  ;;  %v3940_v6 = vadd.f32 %v4757_v57, %v7161_v31  ;;  %v4719_v51 = vpop.f32.mrb[2].mxu1 }
 0x2ea   : > { %4067 = vst.msk [vmem:[%s7170_s17 + $0x70] sm:$0xff] %vm4052_vm3, %v4034_v41  ;;  %vm3973_vm8 = vcmp.gt.f32.partialorder %v3941_v8, 0.0  ;;  %v4005_v17 = vmul.f32 0.1, %v3941_v8  ;;  %v4758_v49 = vadd.f32 %v4719_v51, %v7116_v13  ;;  %v3816_v61 = vpop.f32.mrb[3].mxu1 }
 0x2eb   : > { %vm3972_vm9 = vcmp.gt.f32.partialorder %v3940_v6, 0.0  ;;  %v4004_v58 = vmul.f32 0.1, %v3940_v6  ;;  %v4759_v59 = vadd.f32 %v3816_v61, %v7118_v12 }
 0x2ec   : > { %v4037_v33 = vsel %vm3973_vm8, %v3941_v8, %v4005_v17  ;;  %v3943_v9 = vadd.f32 %v4758_v49, %v7161_v31 }
 0x2ed   : > { %4070 = vst.msk [vmem:[%s7170_s17 + $0x88] sm:$0xff] %vm4052_vm3, %v4037_v33  ;;  %v4036_v22 = vsel %vm3972_vm9, %v3940_v6, %v4004_v58  ;;  %v3942_v25 = vadd.f32 %v4759_v59, %v7161_v31  ;;  %v4722_v16 = vpop.f32.mrb[4].mxu1 }
 0x2ee   : > { %4069 = vst.msk [vmem:[%s7170_s17 + $0x80] sm:$0xff] %vm4052_vm3, %v4036_v22  ;;  %vm3975_vm10 = vcmp.gt.f32.partialorder %v3943_v9, 0.0  ;;  %v4007_v13 = vmul.f32 0.1, %v3943_v9  ;;  %v4760_v26 = vadd.f32 %v4722_v16, %v7120_v60  ;;  %v3826_v38 = vpop.f32.mrb[5].mxu1 }
 0x2ef   : > { %vm3974_vm11 = vcmp.gt.f32.partialorder %v3942_v25, 0.0  ;;  %v4006_v12 = vmul.f32 0.1, %v3942_v25  ;;  %v4761_v15 = vadd.f32 %v3826_v38, %v7122_v27 }
 0x2f0   : > { %v4039_v54 = vsel %vm3975_vm10, %v3943_v9, %v4007_v13  ;;  %v3945_v20 = vadd.f32 %v4760_v26, %v7161_v31 }
 0x2f1   : > { %4072 = vst.msk [vmem:[%s7170_s17 + $0x98] sm:$0xff] %vm4052_vm3, %v4039_v54  ;;  %v4038_v56 = vsel %vm3974_vm11, %v3942_v25, %v4006_v12  ;;  %v3944_v45 = vadd.f32 %v4761_v15, %v7161_v31  ;;  %v4725_v35 = vpop.f32.mrb[6].mxu1 }
 0x2f2   : > { %4071 = vst.msk [vmem:[%s7170_s17 + $0x90] sm:$0xff] %vm4052_vm3, %v4038_v56  ;;  %vm3977_vm12 = vcmp.gt.f32.partialorder %v3945_v20, 0.0  ;;  %v4009_v60 = vmul.f32 0.1, %v3945_v20  ;;  %v4762_v10 = vadd.f32 %v4725_v35, %v7124_v62  ;;  %v3836_v50 = vpop.f32.mrb[7].mxu1 }
 0x2f3   : > { %vm3976_vm13 = vcmp.gt.f32.partialorder %v3944_v45, 0.0  ;;  %v4008_v27 = vmul.f32 0.1, %v3944_v45  ;;  %v4763_v42 = vadd.f32 %v3836_v50, %v7126_v32 }
 0x2f4   : > { %v4041_v30 = vsel %vm3977_vm12, %v3945_v20, %v4009_v60  ;;  %v3947_v48 = vadd.f32 %v4762_v10, %v7161_v31 }
 0x2f5   : > { %4074 = vst.msk [vmem:[%s7170_s17 + $0xa8] sm:$0xff] %vm4052_vm3, %v4041_v30  ;;  %v4040_v21 = vsel %vm3976_vm13, %v3944_v45, %v4008_v27  ;;  %v3946_v53 = vadd.f32 %v4763_v42, %v7161_v31  ;;  %v4728_v24 = vpop.f32.mrb[8].mxu1 }
 0x2f6   : > { %4073 = vst.msk [vmem:[%s7170_s17 + $0xa0] sm:$0xff] %vm4052_vm3, %v4040_v21  ;;  %vm3979_vm14 = vcmp.gt.f32.partialorder %v3947_v48, 0.0  ;;  %v4011_v62 = vmul.f32 0.1, %v3947_v48  ;;  %v4764_v7 = vadd.f32 %v4728_v24, %v7128_v14  ;;  %v3846_v37 = vpop.f32.mrb[9].mxu1 }
 0x2f7   : > { %vm3978_vm15 = vcmp.gt.f32.partialorder %v3946_v53, 0.0  ;;  %v4010_v32 = vmul.f32 0.1, %v3946_v53  ;;  %v4765_v2 = vadd.f32 %v3846_v37, %v7130_v19 }
 0x2f8   : > { %v4043_v29 = vsel %vm3979_vm14, %v3947_v48, %v4011_v62  ;;  %v3949_v40 = vadd.f32 %v4764_v7, %v7161_v31 }
 0x2f9   : > { %4076 = vst.msk [vmem:[%s7170_s17 + $0xb8] sm:$0xff] %vm4052_vm3, %v4043_v29  ;;  %v4042_v39 = vsel %vm3978_vm15, %v3946_v53, %v4010_v32  ;;  %v3948_v46 = vadd.f32 %v4765_v2, %v7161_v31  ;;  %v4731_v1 = vpop.f32.mrb[10].mxu1 }
 0x2fa   : > { %4075 = vst.msk [vmem:[%s7170_s17 + $0xb0] sm:$0xff] %vm4052_vm3, %v4042_v39  ;;  %vm3981_vm0 = vcmp.gt.f32.partialorder %v3949_v40, 0.0  ;;  %v4013_v14 = vmul.f32 0.1, %v3949_v40  ;;  %v4766_v28 = vadd.f32 %v4731_v1, %v7132_v4  ;;  %v3856_v52 = vpop.f32.mrb[11].mxu1 }
 0x2fb   : > { %vm3980_vm1 = vcmp.gt.f32.partialorder %v3948_v46, 0.0  ;;  %v4012_v19 = vmul.f32 0.1, %v3948_v46  ;;  %v4767_v44 = vadd.f32 %v3856_v52, %v7134_v36 }
 0x2fc   : > { %v4045_v0 = vsel %vm3981_vm0, %v3949_v40, %v4013_v14  ;;  %v3951_v11 = vadd.f32 %v4766_v28, %v7161_v31 }
 0x2fd   : > { %4078 = vst.msk [vmem:[%s7170_s17 + $0xc8] sm:$0xff] %vm4052_vm3, %v4045_v0  ;;  %v4044_v55 = vsel %vm3980_vm1, %v3948_v46, %v4012_v19  ;;  %v3950_v18 = vadd.f32 %v4767_v44, %v7161_v31  ;;  %v4734_v63 = vpop.f32.mrb[12].mxu1 }
 0x2fe   : > { %4077 = vst.msk [vmem:[%s7170_s17 + $0xc0] sm:$0xff] %vm4052_vm3, %v4044_v55  ;;  %vm3983_vm4 = vcmp.gt.f32.partialorder %v3951_v11, 0.0  ;;  %v4015_v4 = vmul.f32 0.1, %v3951_v11  ;;  %v4768_v47 = vadd.f32 %v4734_v63, %v7136_v23  ;;  %v3866_v57 = vpop.f32.mrb[13].mxu1 }
 0x2ff   : > { %vm3982_vm5 = vcmp.gt.f32.partialorder %v3950_v18, 0.0  ;;  %v4014_v36 = vmul.f32 0.1, %v3950_v18  ;;  %v4769_v5 = vadd.f32 %v3866_v57, %v7138_v34 }
 0x300   : > { %v4047_v8 = vsel %vm3983_vm4, %v3951_v11, %v4015_v4  ;;  %v3953_v41 = vadd.f32 %v4768_v47, %v7161_v31 }
 0x301   : > { %4080 = vst.msk [vmem:[%s7170_s17 + $0xd8] sm:$0xff] %vm4052_vm3, %v4047_v8  ;;  %v4046_v6 = vsel %vm3982_vm5, %v3950_v18, %v4014_v36  ;;  %v3952_v51 = vadd.f32 %v4769_v5, %v7161_v31  ;;  %v4737_v17 = vpop.f32.mrb[14].mxu1 }
 0x302   : > { %4079 = vst.msk [vmem:[%s7170_s17 + $0xd0] sm:$0xff] %vm4052_vm3, %v4046_v6  ;;  %vm3985_vm6 = vcmp.gt.f32.partialorder %v3953_v41, 0.0  ;;  %v4017_v23 = vmul.f32 0.1, %v3953_v41  ;;  %v4770_v49 = vadd.f32 %v4737_v17, %v7140_v43  ;;  %v3876_v61 = vpop.f32.mrb[15].mxu1 }
 0x303   : > { %vm3984_vm7 = vcmp.gt.f32.partialorder %v3952_v51, 0.0  ;;  %v4016_v34 = vmul.f32 0.1, %v3952_v51  ;;  %v4771_v58 = vadd.f32 %v3876_v61, %v7142_v3 }
 0x304   : > { %v4049_v59 = vsel %vm3985_vm6, %v3953_v41, %v4017_v23  ;;  %v3955_v33 = vadd.f32 %v4770_v49, %v7161_v31 }
 0x305   : > { %4082 = vst.msk [vmem:[%s7170_s17 + $0xe8] sm:$0xff] %vm4052_vm3, %v4049_v59  ;;  %v4048_v9 = vsel %vm3984_vm7, %v3952_v51, %v4016_v34  ;;  %v3954_v22 = vadd.f32 %v4771_v58, %v7161_v31 }
 0x306   : > { %4081 = vst.msk [vmem:[%s7170_s17 + $0xe0] sm:$0xff] %vm4052_vm3, %v4048_v9  ;;  %vm3987_vm2 = vcmp.gt.f32.partialorder %v3955_v33, 0.0  ;;  %v4019_v25 = vmul.f32 0.1, %v3955_v33 }
 0x307   : > { %vm3986_vm8 = vcmp.gt.f32.partialorder %v3954_v22, 0.0  ;;  %v4018_v43 = vmul.f32 0.1, %v3954_v22 }
 0x308   : > { %v4051_v16 = vsel %vm3987_vm2, %v3955_v33, %v4019_v25 }
 0x309   : > { %4084 = vst.msk [vmem:[%s7170_s17 + $0xf8] sm:$0xff] %vm4052_vm3, %v4051_v16  ;;  %v4050_v13 = vsel %vm3986_vm8, %v3954_v22, %v4018_v43 }
 0x30a   : > { %4083 = vst.msk [vmem:[%s7170_s17 + $0xf0] sm:$0xff] %vm4052_vm3, %v4050_v13 }
 0x30b PF: > { %s15_s18 = sadd.s32 1, %s4853_s18  }
 0x30c   : > { %p12_p4 = scmp.ge.s32.totalorder %s15_s18, 4  }
 0x30e   :  { %14 = sbr.rel (!%p12_p4) target bundleno = 1 (0x1), region = 78 }

</bundles_post_ra>
